<compile_context>
chip_gen: v7x
topology: tpu7x:2x2x1
jax: 0.10.0
libtpu: 0.0.40
codegen_flags: <defaults>
</compile_context>

<pallas_src>
import functools
import math

import jax
import jax.numpy as jnp
from jax.experimental import pallas as pl
from jax.experimental.pallas import tpu as pltpu

LAYER_DIMS = [(100, 128), (128, 256), (256, 512), (512, 1024), (1024, 28 * 28)]
IN_DIM = LAYER_DIMS[0][0]                    # 100
IN_PAD = ((IN_DIM + 127) // 128) * 128       # 128 -> lane-dense z DMA, aligned K
OUT_DIM = LAYER_DIMS[-1][1]                  # 784
OUT_PAD = ((OUT_DIM + 127) // 128) * 128     # 896 -> lane-dense final store
MAX_BLOCK_B = 256                            # full MXU M tile on v6e/v7x


def generator_kernel(z_ref,
                     w1, b1, w2, b2, w3, b3, w4, b4, w5, b5,
                     out_ref):
    """Whole MLP fused: 5 MXU matmuls (f32 accumulation) + bias adds + tanh."""
    wdt = w1.dtype  # matmul input dtype (bf16 default fast path, or exact f32)
    h = jnp.dot(z_ref[...].astype(wdt), w1[...],
                preferred_element_type=jnp.float32) + b1[...]
    h = jnp.dot(h.astype(wdt), w2[...],
                preferred_element_type=jnp.float32) + b2[...]
    h = jnp.dot(h.astype(wdt), w3[...],
                preferred_element_type=jnp.float32) + b3[...]
    h = jnp.dot(h.astype(wdt), w4[...],
                preferred_element_type=jnp.float32) + b4[...]
    h = jnp.dot(h.astype(wdt), w5[...],
                preferred_element_type=jnp.float32) + b5[...]
    out_ref[...] = jnp.tanh(h).astype(out_ref.dtype)


@functools.partial(jax.jit,
                   static_argnames=("block_b", "weight_dtype", "out_dtype"))
def _generator_forward(z, params, block_b, weight_dtype, out_dtype):
    B, in_dim = z.shape
    assert in_dim == IN_DIM
    out_dtype = z.dtype if out_dtype is None else out_dtype

    # Zero-pad: batch to a tile multiple (rows sliced off at the end) and
    # K from 100 -> 128 (padded z columns hit zero-padded w1 rows, so the
    # result is unchanged).
    B_pad = ((B + block_b - 1) // block_b) * block_b
    z = jnp.pad(z, ((0, B_pad - B), (0, IN_PAD - IN_DIM)))

    (w1, b1), (w2, b2), (w3, b3), (w4, b4), (w5, b5) = params
    w1 = jnp.pad(w1, ((0, IN_PAD - IN_DIM), (0, 0)))
    # Final layer N padded 784 -> 896 (7*128): lane-dense output stores; the
    # padded columns are exactly zero (tanh(0)=0) and get sliced off.
    w5 = jnp.pad(w5, ((0, 0), (0, OUT_PAD - OUT_DIM)))
    b5 = jnp.pad(b5, ((0, 0), (0, OUT_PAD - OUT_DIM)))

    weights = [w1, w2, w3, w4, w5]
    biases = [b1, b2, b3, b4, b5]
    if weight_dtype is not None:
        # Default: bf16 weights (MXU-native, halves the dominant HBM weight
        # traffic); biases and accumulation stay f32.
        weights = [w.astype(weight_dtype) for w in weights]
    flat_params = []
    for w, b in zip(weights, biases):
        flat_params += [w, b]

    # Weights/biases: full arrays, block index constant across the grid ->
    # single-buffered (one resident VMEM copy instead of two).
    param_specs = [
        pl.BlockSpec(p.shape, lambda i: (0, 0), pipeline_mode=pl.Buffered(1))
        for p in flat_params
    ]

    grid = (B_pad // block_b,)

    padded_dims = [(IN_PAD, 128), (128, 256), (256, 512), (512, 1024),
                   (1024, OUT_PAD)]
    flops = 2 * B_pad * sum(k * n for k, n in padded_dims)
    bytes_accessed = (z.size * z.dtype.itemsize
                      + sum(p.size * p.dtype.itemsize for p in flat_params)
                      + B_pad * OUT_PAD * jnp.dtype(out_dtype).itemsize)
    cost = pl.CostEstimate(flops=flops,
                           transcendentals=B_pad * OUT_PAD,
                           bytes_accessed=bytes_accessed)

    out = pl.pallas_call(
        generator_kernel,
        out_shape=jax.ShapeDtypeStruct((B_pad, OUT_PAD), out_dtype),
        grid_spec=pltpu.PrefetchScalarGridSpec(
            num_scalar_prefetch=0,
            grid=grid,
            in_specs=[pl.BlockSpec((block_b, IN_PAD), lambda i: (i, 0))]
                     + param_specs,
            out_specs=pl.BlockSpec((block_b, OUT_PAD), lambda i: (i, 0)),
        ),
        compiler_params=pltpu.CompilerParams(
            dimension_semantics=("parallel",),
            # ~4-10 MiB actual footprint; 32 MiB leaves plenty of headroom and
            # stays well under v7x's 64 MiB/TC physical VMEM.
            vmem_limit_bytes=32 * 1024 * 1024,
        ),
        cost_estimate=cost,
    )(z, *flat_params)

    return out[:B, :OUT_DIM]


def _choose_block_b(B):
    """Largest batch tile <= 256 rows with minimal padding.

    * B <= 256: one grid step (no pointless split on single-TC v5e/v6e; no
      duplicated per-core weight DMA on v7x megacore while weight-DMA bound).
    * B > 256: near-equal tiles of >= ~128 rows, so when the 'parallel' grid
      axis is sharded across v7x's two TensorCores each core still gets a
      full MXU M tile and enough compute to amortize its weight load.
    """
    B8 = ((max(B, 1) + 7) // 8) * 8
    steps = -(-B8 // MAX_BLOCK_B)
    bb = -(-B8 // steps)
    return ((bb + 7) // 8) * 8


def generator_forward(z, params, *, weight_dtype=jnp.bfloat16, out_dtype=None):
    """Fused Generator forward. Default: bf16 weights, f32 accumulation/output.
    Pass weight_dtype=None for the exact-f32 (testing) path; out_dtype=
    jnp.bfloat16 if the consumer tolerates bf16 outputs."""
    return _generator_forward(z, params,
                              block_b=_choose_block_b(z.shape[0]),
                              weight_dtype=weight_dtype,
                              out_dtype=out_dtype)


def init_params(key):
    """Deterministic init mimicking PyTorch's default Linear init
    (U(-1/sqrt(fan_in), 1/sqrt(fan_in)) for both weight and bias)."""
    params = []
    for (fan_in, fan_out) in LAYER_DIMS:
        key, kw, kb = jax.random.split(key, 3)
        bound = 1.0 / math.sqrt(fan_in)
        w = jax.random.uniform(kw, (fan_in, fan_out), jnp.float32, -bound, bound)
        b = jax.random.uniform(kb, (1, fan_out), jnp.float32, -bound, bound)
        params.append((w, b))
    return params


def reference_forward(z, params):
    """Pure-JAX reference computed with the same dtypes/accumulation order."""
    h = z
    for (w, b) in params:
        h = jnp.dot(h.astype(w.dtype), w, preferred_element_type=jnp.float32)
        h = h + b.astype(jnp.float32)
    return jnp.tanh(h)


if __name__ == "__main__":
    key = jax.random.PRNGKey(0)
    key, kz = jax.random.split(key)

    B = 4  # latent dim is fixed at 100 by the module
    z = jax.random.normal(kz, (B, 100), jnp.float32)
    params = init_params(key)
    params_bf16 = [(w.astype(jnp.bfloat16), b) for (w, b) in params]

    # Default (bf16-weight) path vs a matching bf16-weight pure-JAX reference.
    out = jax.block_until_ready(generator_forward(z, params))
    ref_bf16 = reference_forward(z, params_bf16)
    assert out.shape == (B, 28 * 28), out.shape
    assert out.dtype == jnp.float32, out.dtype
    assert jnp.allclose(out, ref_bf16, atol=2e-2, rtol=2e-2), \
        "bf16-weight path mismatch vs reference"

    # Exact f32 path (testing only): must match the reference tightly.
    out_f32 = jax.block_until_ready(generator_forward(z, params,
                                                      weight_dtype=None))
    ref_f32 = reference_forward(z, params)
    assert jnp.allclose(out_f32, ref_f32, atol=1e-5, rtol=1e-5), \
        "f32 path mismatch vs reference"

    # Non-tile-multiple batch > 256: exercises batch padding and the
    # multi-step (megacore-shardable) grid with ~equal 152-row tiles.
    key, kz2 = jax.random.split(key)
    B2 = 300
    z2 = jax.random.normal(kz2, (B2, 100), jnp.float32)
    out2 = jax.block_until_ready(generator_forward(z2, params))
    ref2 = reference_forward(z2, params_bf16)
    assert out2.shape == (B2, 28 * 28), out2.shape
    assert jnp.allclose(out2, ref2, atol=2e-2, rtol=2e-2), \
        "padded/multi-step batch mismatch vs reference"

    print("KERNEL_OK")
</pallas_src>

<mosaic_0001>
module attributes {stable_mosaic.version = 11 : i64} {
  func.func @generator_kernel(%arg0: i32, %arg1: memref<8x128xf32, #tpu.memory_space<vmem>>, %arg2: memref<128x128xbf16, #tpu.memory_space<vmem>>, %arg3: memref<1x128xf32, #tpu.memory_space<vmem>>, %arg4: memref<128x256xbf16, #tpu.memory_space<vmem>>, %arg5: memref<1x256xf32, #tpu.memory_space<vmem>>, %arg6: memref<256x512xbf16, #tpu.memory_space<vmem>>, %arg7: memref<1x512xf32, #tpu.memory_space<vmem>>, %arg8: memref<512x1024xbf16, #tpu.memory_space<vmem>>, %arg9: memref<1x1024xf32, #tpu.memory_space<vmem>>, %arg10: memref<1024x896xbf16, #tpu.memory_space<vmem>>, %arg11: memref<1x896xf32, #tpu.memory_space<vmem>>, %arg12: memref<8x896xf32, #tpu.memory_space<vmem>>) attributes {dimension_semantics = [#tpu.dimension_semantics<parallel>], iteration_bounds = array<i64: 1>, scalar_prefetch = 0 : i64, scratch_operands = 0 : i64, tpu.core_type = #tpu.core_type<tc>, window_params = [{transform_indices = @transform_0, window_bounds = array<i64: 8, 128>}, {pipeline_mode = #tpu.pipeline_mode<synchronous>, transform_indices = @transform_1, window_bounds = array<i64: 128, 128>}, {pipeline_mode = #tpu.pipeline_mode<synchronous>, transform_indices = @transform_2, window_bounds = array<i64: 1, 128>}, {pipeline_mode = #tpu.pipeline_mode<synchronous>, transform_indices = @transform_3, window_bounds = array<i64: 128, 256>}, {pipeline_mode = #tpu.pipeline_mode<synchronous>, transform_indices = @transform_4, window_bounds = array<i64: 1, 256>}, {pipeline_mode = #tpu.pipeline_mode<synchronous>, transform_indices = @transform_5, window_bounds = array<i64: 256, 512>}, {pipeline_mode = #tpu.pipeline_mode<synchronous>, transform_indices = @transform_6, window_bounds = array<i64: 1, 512>}, {pipeline_mode = #tpu.pipeline_mode<synchronous>, transform_indices = @transform_7, window_bounds = array<i64: 512, 1024>}, {pipeline_mode = #tpu.pipeline_mode<synchronous>, transform_indices = @transform_8, window_bounds = array<i64: 1, 1024>}, {pipeline_mode = #tpu.pipeline_mode<synchronous>, transform_indices = @transform_9, window_bounds = array<i64: 1024, 896>}, {pipeline_mode = #tpu.pipeline_mode<synchronous>, transform_indices = @transform_10, window_bounds = array<i64: 1, 896>}, {transform_indices = @transform_11, window_bounds = array<i64: 8, 896>}]} {
    %c0 = arith.constant 0 : index
    %c0_0 = arith.constant 0 : index
    %0 = vector.load %arg1[%c0, %c0_0] : memref<8x128xf32, #tpu.memory_space<vmem>>, vector<8x128xf32>
    %1 = arith.truncf %0 : vector<8x128xf32> to vector<8x128xbf16>
    %c0_1 = arith.constant 0 : index
    %c0_2 = arith.constant 0 : index
    %2 = vector.load %arg2[%c0_1, %c0_2] : memref<128x128xbf16, #tpu.memory_space<vmem>>, vector<128x128xbf16>
    %cst = arith.constant dense<0.000000e+00> : vector<8x128xf32>
    %3 = tpu.matmul %1, %2, %cst {dimension_numbers = #tpu.dot_dimension_numbers<[1], [0], [0], [1], [0, 0, 1, 1], [], []>} : vector<8x128xbf16>, vector<128x128xbf16>, vector<8x128xf32> -> vector<8x128xf32>
    %c0_3 = arith.constant 0 : index
    %c0_4 = arith.constant 0 : index
    %4 = vector.load %arg3[%c0_3, %c0_4] : memref<1x128xf32, #tpu.memory_space<vmem>>, vector<1x128xf32>
    %5 = vector.broadcast %4 : vector<1x128xf32> to vector<8x128xf32>
    %6 = arith.addf %3, %5 : vector<8x128xf32>
    %7 = arith.truncf %6 : vector<8x128xf32> to vector<8x128xbf16>
    %c0_5 = arith.constant 0 : index
    %c0_6 = arith.constant 0 : index
    %8 = vector.load %arg4[%c0_5, %c0_6] : memref<128x256xbf16, #tpu.memory_space<vmem>>, vector<128x256xbf16>
    %cst_7 = arith.constant dense<0.000000e+00> : vector<8x256xf32>
    %9 = tpu.matmul %7, %8, %cst_7 {dimension_numbers = #tpu.dot_dimension_numbers<[1], [0], [0], [1], [0, 0, 1, 1], [], []>} : vector<8x128xbf16>, vector<128x256xbf16>, vector<8x256xf32> -> vector<8x256xf32>
    %c0_8 = arith.constant 0 : index
    %c0_9 = arith.constant 0 : index
    %10 = vector.load %arg5[%c0_8, %c0_9] : memref<1x256xf32, #tpu.memory_space<vmem>>, vector<1x256xf32>
    %11 = vector.broadcast %10 : vector<1x256xf32> to vector<8x256xf32>
    %12 = arith.addf %9, %11 : vector<8x256xf32>
    %13 = arith.truncf %12 : vector<8x256xf32> to vector<8x256xbf16>
    %c0_10 = arith.constant 0 : index
    %c0_11 = arith.constant 0 : index
    %14 = vector.load %arg6[%c0_10, %c0_11] : memref<256x512xbf16, #tpu.memory_space<vmem>>, vector<256x512xbf16>
    %cst_12 = arith.constant dense<0.000000e+00> : vector<8x512xf32>
    %15 = tpu.matmul %13, %14, %cst_12 {dimension_numbers = #tpu.dot_dimension_numbers<[1], [0], [0], [1], [0, 0, 1, 1], [], []>} : vector<8x256xbf16>, vector<256x512xbf16>, vector<8x512xf32> -> vector<8x512xf32>
    %c0_13 = arith.constant 0 : index
    %c0_14 = arith.constant 0 : index
    %16 = vector.load %arg7[%c0_13, %c0_14] : memref<1x512xf32, #tpu.memory_space<vmem>>, vector<1x512xf32>
    %17 = vector.broadcast %16 : vector<1x512xf32> to vector<8x512xf32>
    %18 = arith.addf %15, %17 : vector<8x512xf32>
    %19 = arith.truncf %18 : vector<8x512xf32> to vector<8x512xbf16>
    %c0_15 = arith.constant 0 : index
    %c0_16 = arith.constant 0 : index
    %20 = vector.load %arg8[%c0_15, %c0_16] : memref<512x1024xbf16, #tpu.memory_space<vmem>>, vector<512x1024xbf16>
    %cst_17 = arith.constant dense<0.000000e+00> : vector<8x1024xf32>
    %21 = tpu.matmul %19, %20, %cst_17 {dimension_numbers = #tpu.dot_dimension_numbers<[1], [0], [0], [1], [0, 0, 1, 1], [], []>} : vector<8x512xbf16>, vector<512x1024xbf16>, vector<8x1024xf32> -> vector<8x1024xf32>
    %c0_18 = arith.constant 0 : index
    %c0_19 = arith.constant 0 : index
    %22 = vector.load %arg9[%c0_18, %c0_19] : memref<1x1024xf32, #tpu.memory_space<vmem>>, vector<1x1024xf32>
    %23 = vector.broadcast %22 : vector<1x1024xf32> to vector<8x1024xf32>
    %24 = arith.addf %21, %23 : vector<8x1024xf32>
    %25 = arith.truncf %24 : vector<8x1024xf32> to vector<8x1024xbf16>
    %c0_20 = arith.constant 0 : index
    %c0_21 = arith.constant 0 : index
    %26 = vector.load %arg10[%c0_20, %c0_21] : memref<1024x896xbf16, #tpu.memory_space<vmem>>, vector<1024x896xbf16>
    %cst_22 = arith.constant dense<0.000000e+00> : vector<8x896xf32>
    %27 = tpu.matmul %25, %26, %cst_22 {dimension_numbers = #tpu.dot_dimension_numbers<[1], [0], [0], [1], [0, 0, 1, 1], [], []>} : vector<8x1024xbf16>, vector<1024x896xbf16>, vector<8x896xf32> -> vector<8x896xf32>
    %c0_23 = arith.constant 0 : index
    %c0_24 = arith.constant 0 : index
    %28 = vector.load %arg11[%c0_23, %c0_24] : memref<1x896xf32, #tpu.memory_space<vmem>>, vector<1x896xf32>
    %29 = vector.broadcast %28 : vector<1x896xf32> to vector<8x896xf32>
    %30 = arith.addf %27, %29 : vector<8x896xf32>
    %31 = math.tanh %30 : vector<8x896xf32>
    %c0_25 = arith.constant 0 : index
    %c0_26 = arith.constant 0 : index
    %32 = vector.load %arg12[%c0_25, %c0_26] : memref<8x896xf32, #tpu.memory_space<vmem>>, vector<8x896xf32>
    tpu.vector_store %arg12[%c0_25, %c0_26], %31 {strides = array<i32>} : memref<8x896xf32, #tpu.memory_space<vmem>>, vector<8x896xf32>,
    return
  }
  func.func @transform_0(%arg0: i32) -> (i32, i32) {
    %c0_i32 = arith.constant 0 : i32
    %c0_i32_0 = arith.constant 0 : i32
    return %arg0, %c0_i32 : i32, i32
  }
  func.func @transform_1(%arg0: i32) -> (i32, i32) {
    %c0_i32 = arith.constant 0 : i32
    %c0_i32_0 = arith.constant 0 : i32
    %c0_i32_1 = arith.constant 0 : i32
    return %c0_i32, %c0_i32_0 : i32, i32
  }
  func.func @transform_2(%arg0: i32) -> (i32, i32) {
    %c0_i32 = arith.constant 0 : i32
    %c0_i32_0 = arith.constant 0 : i32
    %c0_i32_1 = arith.constant 0 : i32
    return %c0_i32, %c0_i32_0 : i32, i32
  }
  func.func @transform_3(%arg0: i32) -> (i32, i32) {
    %c0_i32 = arith.constant 0 : i32
    %c0_i32_0 = arith.constant 0 : i32
    %c0_i32_1 = arith.constant 0 : i32
    return %c0_i32, %c0_i32_0 : i32, i32
  }
  func.func @transform_4(%arg0: i32) -> (i32, i32) {
    %c0_i32 = arith.constant 0 : i32
    %c0_i32_0 = arith.constant 0 : i32
    %c0_i32_1 = arith.constant 0 : i32
    return %c0_i32, %c0_i32_0 : i32, i32
  }
  func.func @transform_5(%arg0: i32) -> (i32, i32) {
    %c0_i32 = arith.constant 0 : i32
    %c0_i32_0 = arith.constant 0 : i32
    %c0_i32_1 = arith.constant 0 : i32
    return %c0_i32, %c0_i32_0 : i32, i32
  }
  func.func @transform_6(%arg0: i32) -> (i32, i32) {
    %c0_i32 = arith.constant 0 : i32
    %c0_i32_0 = arith.constant 0 : i32
    %c0_i32_1 = arith.constant 0 : i32
    return %c0_i32, %c0_i32_0 : i32, i32
  }
  func.func @transform_7(%arg0: i32) -> (i32, i32) {
    %c0_i32 = arith.constant 0 : i32
    %c0_i32_0 = arith.constant 0 : i32
    %c0_i32_1 = arith.constant 0 : i32
    return %c0_i32, %c0_i32_0 : i32, i32
  }
  func.func @transform_8(%arg0: i32) -> (i32, i32) {
    %c0_i32 = arith.constant 0 : i32
    %c0_i32_0 = arith.constant 0 : i32
    %c0_i32_1 = arith.constant 0 : i32
    return %c0_i32, %c0_i32_0 : i32, i32
  }
  func.func @transform_9(%arg0: i32) -> (i32, i32) {
    %c0_i32 = arith.constant 0 : i32
    %c0_i32_0 = arith.constant 0 : i32
    %c0_i32_1 = arith.constant 0 : i32
    return %c0_i32, %c0_i32_0 : i32, i32
  }
  func.func @transform_10(%arg0: i32) -> (i32, i32) {
    %c0_i32 = arith.constant 0 : i32
    %c0_i32_0 = arith.constant 0 : i32
    %c0_i32_1 = arith.constant 0 : i32
    return %c0_i32, %c0_i32_0 : i32, i32
  }
  func.func @transform_11(%arg0: i32) -> (i32, i32) {
    %c0_i32 = arith.constant 0 : i32
    %c0_i32_0 = arith.constant 0 : i32
    return %arg0, %c0_i32 : i32, i32
  }
}

</mosaic_0001>

<bundles_post_ra>
// kernel: _generator_forward.1
= control target key start
LH: loop header
LB: loop body
LE: loop exit
PB: predicated region body
PF: predicated region fallthrough
CT: control target
= control target key end

     0   :  { %v7995_v0 = vmov 0.0   ;;  %vm7996_vm0 = vmmov 0   ;;  %v7997_v27 = vmov 0   ;;  %s10648_s1 = inlined_call_operand.vmem [shape: bf16[128,128], index: 1, kind: input, shape index: {}]   ;;  %s10649_s3 = inlined_call_operand.vmem [shape: bf16[128,256], index: 3, kind: input, shape index: {}]   ;;  %s10650_s0 = inlined_call_operand.vmem [shape: f32[8,128], index: 0, kind: input, shape index: {}]   ;;  %s10651_s5 = inlined_call_operand.vmem [shape: bf16[256,512], index: 5, kind: input, shape index: {}]   ;;  %s10652_s2 = inlined_call_operand.vmem [shape: f32[1,128], index: 2, kind: input, shape index: {}]   ;;  %s10653_s7 = inlined_call_operand.vmem [shape: bf16[512,1024], index: 7, kind: input, shape index: {}]   ;;  %s10654_s4 = inlined_call_operand.vmem [shape: f32[1,256], index: 4, kind: input, shape index: {}]   ;;  %s10655_s6 = inlined_call_operand.vmem [shape: f32[1,512], index: 6, kind: input, shape index: {}]   ;;  %s10656_s9 = inlined_call_operand.vmem [shape: bf16[1024,896], index: 9, kind: input, shape index: {}]   ;;  %s10657_s8 = inlined_call_operand.vmem [shape: f32[1,1024], index: 8, kind: input, shape index: {}]   ;;  %s10658_s10 = inlined_call_operand.vmem [shape: f32[1,896], index: 10, kind: input, shape index: {}]   ;;  %s10659_s11 = inlined_call_operand.vmem [shape: f32[8,896], index: 11, kind: output, shape index: {}]  }
   0x1   :  { %7123 = vmatprep.subr.bf16.mxu0 %v7995_v0  ;;  %v7212_v1 = vld [vmem:[%s10648_s1] sm:$0xff]   ;;  %7139 = vmatprep.mubr.msk.bf16.mxu0 %vm7996_vm0, %v7995_v0  ;;  %v7213_v2 = vld [vmem:[%s10648_s1 + $0x8] sm:$0xff]   ;;  %v7214_v3 = vld [vmem:[%s10648_s1 + $0x10] sm:$0xff]  }
   0x2   :  { %7124 = vmatpush3.bf16.msra.mxu0 %v7212_v1  ;;  %v7220_v4 = vld [vmem:[%s10649_s3 + $0x4] ss:$8 sps:$4 sm:$0xff]   ;;  %v7222_v5 = vld [vmem:[%s10649_s3] ss:$8 sps:$4 sm:$0xff]   ;;  %v7215_v6 = vld [vmem:[%s10648_s1 + $0x18] sm:$0xff]   ;;  %293 = vmatprep.mubr.bf16.mxu1 %v7997_v27 }
   0x3   :  { %7125 = vmatprep.subr.bf16.mxu0 %v7995_v0  ;;  %v7223_v7 = vld [vmem:[%s10649_s3 + $0x14] ss:$8 sps:$4 sm:$0xff]   ;;  %261 = vmatprep.subr.bf16.mxu1 %v7220_v4  ;;  %v7225_v8 = vld [vmem:[%s10649_s3 + $0x10] ss:$8 sps:$4 sm:$0xff]   ;;  %v7226_v9 = vld [vmem:[%s10649_s3 + $0x24] ss:$8 sps:$4 sm:$0xff]  }
   0x4   :  { %262 = vmatpush1.bf16.msra.mxu1 %v7222_v5  ;;  %v7216_v10 = vld [vmem:[%s10648_s1 + $0x20] sm:$0xff]   ;;  %v7229_v12 = vld [vmem:[%s10649_s3 + $0x34] ss:$8 sps:$4 sm:$0xff]   ;;  %v7217_v13 = vld [vmem:[%s10648_s1 + $0x28] sm:$0xff]  }
   0x5   :  { %263 = vmatprep.subr.bf16.mxu1 %v7223_v7  ;;  %v7228_v11 = vld [vmem:[%s10649_s3 + $0x20] ss:$8 sps:$4 sm:$0xff]   ;;  %v7231_v14 = vld [vmem:[%s10649_s3 + $0x30] ss:$8 sps:$4 sm:$0xff]   ;;  %v7232_v15 = vld [vmem:[%s10649_s3 + $0x44] ss:$8 sps:$4 sm:$0xff]  }
   0x6   :  { %7126 = vmatpush3.bf16.msra.mxu0 %v7213_v2  ;;  %v7218_v16 = vld [vmem:[%s10648_s1 + $0x30] sm:$0xff]   ;;  %v7234_v17 = vld [vmem:[%s10649_s3 + $0x40] ss:$8 sps:$4 sm:$0xff]   ;;  %v7219_v19 = vld [vmem:[%s10648_s1 + $0x38] sm:$0xff]  }
   0x7   :  { %7127 = vmatprep.subr.bf16.mxu0 %v7995_v0  ;;  %v7235_v18 = vld [vmem:[%s10649_s3 + $0x54] ss:$8 sps:$4 sm:$0xff]   ;;  %v39_v20 = vld [vmem:[%s10650_s0] sm:$0xff]  ;;  %v7237_v21 = vld [vmem:[%s10649_s3 + $0x50] ss:$8 sps:$4 sm:$0xff]  }
   0x8   :  { %264 = vmatpush1.bf16.msra.mxu1 %v7225_v8  ;;  %v40_v22 = vpack.c.bf16 %v39_v20, %v39_v20  ;;  %v7238_v23 = vld [vmem:[%s10649_s3 + $0x64] ss:$8 sps:$4 sm:$0xff]   ;;  %v7240_v24 = vld [vmem:[%s10649_s3 + $0x60] ss:$8 sps:$4 sm:$0xff]   ;;  %v7241_v25 = vld [vmem:[%s10649_s3 + $0x74] ss:$8 sps:$4 sm:$0xff]  }
   0x9   :  { %265 = vmatprep.subr.bf16.mxu1 %v7226_v9  ;;  %v7243_v26 = vld [vmem:[%s10649_s3 + $0x70] ss:$8 sps:$4 sm:$0xff]   ;;  %v7246_v28 = vld [vmem:[%s10651_s5 + $0x4] ss:$16 sps:$4 sm:$0xff]   ;;  %v6233_v29 = vld [vmem:[%s10652_s2] ss:$0 sm:$0xff] }
   0xa   :  { %7128 = vmatpush3.bf16.msra.mxu0 %v7214_v3  ;;  %v7244_v34 = vld [vmem:[%s10651_s5] ss:$16 sps:$4 sm:$0xff]   ;;  %v7249_v37 = vld [vmem:[%s10651_s5 + $0x24] ss:$16 sps:$4 sm:$0xff]   ;;  %v7294_v3 = vld [vmem:[%s10651_s5 + $0xc] ss:$16 sps:$4 sm:$0xff]  }
   0xb   :  { %7129 = vmatprep.subr.bf16.mxu0 %v7995_v0  ;;  %v7247_v38 = vld [vmem:[%s10651_s5 + $0x20] ss:$16 sps:$4 sm:$0xff]   ;;  %v7252_v39 = vld [vmem:[%s10651_s5 + $0x44] ss:$16 sps:$4 sm:$0xff]  }
   0xc   :  { %266 = vmatpush1.bf16.msra.mxu1 %v7228_v11  ;;  %v7250_v40 = vld [vmem:[%s10651_s5 + $0x40] ss:$16 sps:$4 sm:$0xff]   ;;  %v7255_v41 = vld [vmem:[%s10651_s5 + $0x64] ss:$16 sps:$4 sm:$0xff]  }
   0xd   :  { %267 = vmatprep.subr.bf16.mxu1 %v7229_v12  ;;  %v7253_v42 = vld [vmem:[%s10651_s5 + $0x60] ss:$16 sps:$4 sm:$0xff]   ;;  %v7258_v43 = vld [vmem:[%s10651_s5 + $0x84] ss:$16 sps:$4 sm:$0xff]  }
   0xe   :  { %7130 = vmatpush3.bf16.msra.mxu0 %v7215_v6  ;;  %v7256_v44 = vld [vmem:[%s10651_s5 + $0x80] ss:$16 sps:$4 sm:$0xff]   ;;  %v7261_v45 = vld [vmem:[%s10651_s5 + $0xa4] ss:$16 sps:$4 sm:$0xff]  }
   0xf   :  { %7131 = vmatprep.subr.bf16.mxu0 %v7995_v0  ;;  %v7259_v46 = vld [vmem:[%s10651_s5 + $0xa0] ss:$16 sps:$4 sm:$0xff]   ;;  %v7264_v47 = vld [vmem:[%s10651_s5 + $0xc4] ss:$16 sps:$4 sm:$0xff]  }
  0x10   :  { %268 = vmatpush1.bf16.msra.mxu1 %v7231_v14  ;;  %v7262_v48 = vld [vmem:[%s10651_s5 + $0xc0] ss:$16 sps:$4 sm:$0xff]   ;;  %v7267_v49 = vld [vmem:[%s10651_s5 + $0xe4] ss:$16 sps:$4 sm:$0xff]  }
  0x11   :  { %269 = vmatprep.subr.bf16.mxu1 %v7232_v15  ;;  %v7265_v50 = vld [vmem:[%s10651_s5 + $0xe0] ss:$16 sps:$4 sm:$0xff]   ;;  %v7270_v51 = vld [vmem:[%s10651_s5 + $0x104] ss:$16 sps:$4 sm:$0xff]  }
  0x12   :  { %7132 = vmatpush3.bf16.msra.mxu0 %v7216_v10  ;;  %v7268_v52 = vld [vmem:[%s10651_s5 + $0x100] ss:$16 sps:$4 sm:$0xff]   ;;  %v7273_v53 = vld [vmem:[%s10651_s5 + $0x124] ss:$16 sps:$4 sm:$0xff]  }
  0x13   :  { %7133 = vmatprep.subr.bf16.mxu0 %v7995_v0  ;;  %v7271_v54 = vld [vmem:[%s10651_s5 + $0x120] ss:$16 sps:$4 sm:$0xff]   ;;  %v7276_v55 = vld [vmem:[%s10651_s5 + $0x144] ss:$16 sps:$4 sm:$0xff]  }
  0x14   :  { %270 = vmatpush1.bf16.msra.mxu1 %v7234_v17  ;;  %v7274_v56 = vld [vmem:[%s10651_s5 + $0x140] ss:$16 sps:$4 sm:$0xff]   ;;  %v7279_v57 = vld [vmem:[%s10651_s5 + $0x164] ss:$16 sps:$4 sm:$0xff]  }
  0x15   :  { %271 = vmatprep.subr.bf16.mxu1 %v7235_v18  ;;  %v7277_v58 = vld [vmem:[%s10651_s5 + $0x160] ss:$16 sps:$4 sm:$0xff]   ;;  %v7282_v59 = vld [vmem:[%s10651_s5 + $0x184] ss:$16 sps:$4 sm:$0xff]  }
  0x16   :  { %7134 = vmatpush3.bf16.msra.mxu0 %v7217_v13  ;;  %v7280_v60 = vld [vmem:[%s10651_s5 + $0x180] ss:$16 sps:$4 sm:$0xff]   ;;  %v7285_v61 = vld [vmem:[%s10651_s5 + $0x1a4] ss:$16 sps:$4 sm:$0xff]  }
  0x17   :  { %7135 = vmatprep.subr.bf16.mxu0 %v7995_v0  ;;  %v7283_v62 = vld [vmem:[%s10651_s5 + $0x1a0] ss:$16 sps:$4 sm:$0xff]   ;;  %v7288_v63 = vld [vmem:[%s10651_s5 + $0x1c4] ss:$16 sps:$4 sm:$0xff]  }
  0x18   :  { %272 = vmatpush1.bf16.msra.mxu1 %v7237_v21  ;;  %v7291_v1 = vld [vmem:[%s10651_s5 + $0x1e4] ss:$16 sps:$4 sm:$0xff]   ;;  %v7289_v2 = vld [vmem:[%s10651_s5 + $0x1e0] ss:$16 sps:$4 sm:$0xff]  }
  0x19   :  { %273 = vmatprep.subr.bf16.mxu1 %v7238_v23  ;;  %v796_v4 = vld [vmem:[%s10653_s7] sm:$0xff] }
  0x1a   :  { %7136 = vmatpush3.bf16.msra.mxu0 %v7218_v16  ;;  %v800_v5 = vld [vmem:[%s10653_s7 + $0x20] sm:$0xff] }
  0x1b   :  { %7137 = vmatprep.subr.bf16.mxu0 %v7995_v0  ;;  %v7286_v0 = vld [vmem:[%s10651_s5 + $0x1c0] ss:$16 sps:$4 sm:$0xff]   ;;  %v6322_v6 = vcombine.low %v796_v4, %v800_v5  ;;  %v6323_v7 = vcombine.high %v796_v4, %v800_v5 }
  0x1c   :  { %274 = vmatpush1.bf16.msra.mxu1 %v7240_v24  ;;  %v804_v8 = vld [vmem:[%s10653_s7 + $0x40] sm:$0xff] }
  0x1d   :  { %275 = vmatprep.subr.bf16.mxu1 %v7241_v25  ;;  %v808_v9 = vld [vmem:[%s10653_s7 + $0x60] sm:$0xff] }
  0x1e   :  { %7138 = vmatpush3.bf16.msra.mxu0 %v7219_v19  ;;  %v6331_v10 = vcombine.high %v804_v8, %v808_v9  ;;  %v6330_v11 = vcombine.low %v804_v8, %v808_v9  ;;  %v812_v12 = vld [vmem:[%s10653_s7 + $0x80] sm:$0xff] }
  0x1f   :  { %2374 = vmatprep.subr.bf16.mxu0 %v6323_v7  ;;  %v816_v13 = vld [vmem:[%s10653_s7 + $0xa0] sm:$0xff] }
  0x20   :  { %276 = vmatpush1.bf16.msra.mxu1 %v7243_v26  ;;  %v6339_v14 = vcombine.high %v812_v12, %v816_v13  ;;  %v6338_v15 = vcombine.low %v812_v12, %v816_v13  ;;  %v820_v16 = vld [vmem:[%s10653_s7 + $0xc0] sm:$0xff] }
  0x21   :  { %7140 = vmatmul.mubr.bf16.vlgmr.msra.gmra.mrb[0].mxu0 %v40_v22  ;;  %710 = vmatprep.subr.bf16.mxu1 %v7246_v28  ;;  %v824_v17 = vld [vmem:[%s10653_s7 + $0xe0] sm:$0xff] }
  0x22   :  { %2375 = vmatpush1.bf16.msra.mxu0 %v6322_v6  ;;  %v6347_v18 = vcombine.high %v820_v16, %v824_v17  ;;  %v6346_v19 = vcombine.low %v820_v16, %v824_v17  ;;  %v828_v20 = vld [vmem:[%s10653_s7 + $0x100] sm:$0xff]  ;;  %v7297_v16 = vld [vmem:[%s10651_s5 + $0x2c] ss:$16 sps:$4 sm:$0xff]   ;;  %v7295_v17 = vld [vmem:[%s10651_s5 + $0x28] ss:$16 sps:$4 sm:$0xff]  }
  0x23   :  { %2376 = vmatprep.subr.bf16.mxu0 %v6331_v10  ;;  %v832_v21 = vld [vmem:[%s10653_s7 + $0x120] sm:$0xff] }
  0x24   :  { %v6355_v22 = vcombine.high %v828_v20, %v832_v21  ;;  %v6354_v23 = vcombine.low %v828_v20, %v832_v21  ;;  %v836_v24 = vld [vmem:[%s10653_s7 + $0x140] sm:$0xff]  ;;  %v7303_v20 = vld [vmem:[%s10651_s5 + $0x6c] ss:$16 sps:$4 sm:$0xff]   ;;  %v7301_v21 = vld [vmem:[%s10651_s5 + $0x68] ss:$16 sps:$4 sm:$0xff]  }
  0x25   :  { %v840_v25 = vld [vmem:[%s10653_s7 + $0x160] sm:$0xff] }
  0x26   :  { %2377 = vmatpush1.bf16.msra.mxu0 %v6330_v11  ;;  %v6363_v26 = vcombine.high %v836_v24, %v840_v25  ;;  %v6362_v27 = vcombine.low %v836_v24, %v840_v25  ;;  %v844_v28 = vld [vmem:[%s10653_s7 + $0x180] sm:$0xff]  ;;  %v7309_v24 = vld [vmem:[%s10651_s5 + $0xac] ss:$16 sps:$4 sm:$0xff]   ;;  %v7307_v25 = vld [vmem:[%s10651_s5 + $0xa8] ss:$16 sps:$4 sm:$0xff]  }
  0x27   :  { %2378 = vmatprep.subr.bf16.mxu0 %v6339_v14  ;;  %v7292_v14 = vld [vmem:[%s10651_s5 + $0x8] ss:$16 sps:$4 sm:$0xff]  }
  0x2a   :  { %2379 = vmatpush1.bf16.msra.mxu0 %v6338_v15 }
  0x2b   :  { %2380 = vmatprep.subr.bf16.mxu0 %v6347_v18  ;;  %v7300_v18 = vld [vmem:[%s10651_s5 + $0x4c] ss:$16 sps:$4 sm:$0xff]  }
  0x2e   :  { %2381 = vmatpush1.bf16.msra.mxu0 %v6346_v19  ;;  %v7298_v19 = vld [vmem:[%s10651_s5 + $0x48] ss:$16 sps:$4 sm:$0xff]  }
  0x2f   :  { %2382 = vmatprep.subr.bf16.mxu0 %v6355_v22  ;;  %v7306_v22 = vld [vmem:[%s10651_s5 + $0x8c] ss:$16 sps:$4 sm:$0xff]  }
  0x32   :  { %2383 = vmatpush1.bf16.msra.mxu0 %v6354_v23  ;;  %v7304_v23 = vld [vmem:[%s10651_s5 + $0x88] ss:$16 sps:$4 sm:$0xff]  }
  0x33   :  { %2384 = vmatprep.subr.bf16.mxu0 %v6363_v26  ;;  %v7312_v26 = vld [vmem:[%s10651_s5 + $0xcc] ss:$16 sps:$4 sm:$0xff]  }
  0x36   :  { %2385 = vmatpush1.bf16.msra.mxu0 %v6362_v27  ;;  %v7310_v27 = vld [vmem:[%s10651_s5 + $0xc8] ss:$16 sps:$4 sm:$0xff]  }
  0xf4   :  { %v146_v30 = vpop.f32.mrb[0].mxu0 }
  0xf5   :  { %v147_v31 = vadd.f32 %v6233_v29, %v146_v30  ;;  %v7141_v32 = vpop.f32.mrb[1].mxu0  ;;  %v848_v29 = vld [vmem:[%s10653_s7 + $0x1a0] sm:$0xff] }
  0xf6   :  { %v149_v33 = vpop.f32.mrb[2].mxu0  ;;  %v6371_v30 = vcombine.high %v844_v28, %v848_v29  ;;  %v852_v32 = vld [vmem:[%s10653_s7 + $0x1c0] sm:$0xff] }
  0xf7   :  { %v152_v35 = vpack.c.bf16 %v147_v31, %v147_v31  ;;  %v7142_v36 = vpop.f32.mrb[3].mxu0  ;;  %v6370_v31 = vcombine.low %v844_v28, %v848_v29  ;;  %v856_v33 = vld [vmem:[%s10653_s7 + $0x1e0] sm:$0xff]  ;;  %v7315_v28 = vld [vmem:[%s10651_s5 + $0xec] ss:$16 sps:$4 sm:$0xff]   ;;  %v7313_v29 = vld [vmem:[%s10651_s5 + $0xe8] ss:$16 sps:$4 sm:$0xff]  }
  0xf8   :  { %2386 = vmatprep.subr.bf16.mxu0 %v6371_v30  ;;  %v860_v36 = vld [vmem:[%s10653_s7 + $0x200] sm:$0xff]  ;;  %v7318_v30 = vld [vmem:[%s10651_s5 + $0x10c] ss:$16 sps:$4 sm:$0xff]  }
  0xf9   :  { %294 = vmatmul.mubr.bf16.vlgmr.msra.gmra.mrb[0].mxu1 %v152_v35  ;;  %2387 = vmatpush1.bf16.msra.mxu0 %v6370_v31  ;;  %v6378_v35 = vcombine.low %v852_v32, %v856_v33  ;;  %v7316_v31 = vld [vmem:[%s10651_s5 + $0x108] ss:$16 sps:$4 sm:$0xff]  }
  0xfa   :  { %711 = vmatpush1.bf16.msra.mxu1 %v7244_v34  ;;  %v6379_v34 = vcombine.high %v852_v32, %v856_v33  ;;  %v7321_v32 = vld [vmem:[%s10651_s5 + $0x12c] ss:$16 sps:$4 sm:$0xff]   ;;  %v7319_v33 = vld [vmem:[%s10651_s5 + $0x128] ss:$16 sps:$4 sm:$0xff]  }
  0xfb   :  { %712 = vmatprep.subr.bf16.mxu1 %v7249_v37  ;;  %v864_v37 = vld [vmem:[%s10653_s7 + $0x220] sm:$0xff] }
  0xfc   :  { %2388 = vmatprep.subr.bf16.mxu0 %v6379_v34  ;;  %v7324_v34 = vld [vmem:[%s10651_s5 + $0x14c] ss:$16 sps:$4 sm:$0xff]  }
  0xfd   :  { %2389 = vmatpush1.bf16.msra.mxu0 %v6378_v35  ;;  %v7322_v35 = vld [vmem:[%s10651_s5 + $0x148] ss:$16 sps:$4 sm:$0xff]  }
  0xfe   :  { %713 = vmatpush1.bf16.msra.mxu1 %v7247_v38  ;;  %v6387_v38 = vcombine.high %v860_v36, %v864_v37 }
  0xff   :  { %714 = vmatprep.subr.bf16.mxu1 %v7252_v39  ;;  %v6386_v39 = vcombine.low %v860_v36, %v864_v37  ;;  %v7327_v36 = vld [vmem:[%s10651_s5 + $0x16c] ss:$16 sps:$4 sm:$0xff]   ;;  %v7325_v37 = vld [vmem:[%s10651_s5 + $0x168] ss:$16 sps:$4 sm:$0xff]  }
 0x100   :  { %2390 = vmatprep.subr.bf16.mxu0 %v6387_v38  ;;  %v7330_v38 = vld [vmem:[%s10651_s5 + $0x18c] ss:$16 sps:$4 sm:$0xff]  }
 0x101   :  { %2391 = vmatpush1.bf16.msra.mxu0 %v6386_v39  ;;  %v7328_v39 = vld [vmem:[%s10651_s5 + $0x188] ss:$16 sps:$4 sm:$0xff]  }
 0x102   :  { %715 = vmatpush1.bf16.msra.mxu1 %v7250_v40  ;;  %v868_v40 = vld [vmem:[%s10653_s7 + $0x240] sm:$0xff] }
 0x103   :  { %716 = vmatprep.subr.bf16.mxu1 %v7255_v41  ;;  %v872_v41 = vld [vmem:[%s10653_s7 + $0x260] sm:$0xff] }
 0x106   :  { %717 = vmatpush1.bf16.msra.mxu1 %v7253_v42  ;;  %v6395_v42 = vcombine.high %v868_v40, %v872_v41 }
 0x107   :  { %718 = vmatprep.subr.bf16.mxu1 %v7258_v43  ;;  %v6394_v43 = vcombine.low %v868_v40, %v872_v41  ;;  %v7333_v40 = vld [vmem:[%s10651_s5 + $0x1ac] ss:$16 sps:$4 sm:$0xff]   ;;  %v7331_v41 = vld [vmem:[%s10651_s5 + $0x1a8] ss:$16 sps:$4 sm:$0xff]  }
 0x108   :  { %2392 = vmatprep.subr.bf16.mxu0 %v6395_v42  ;;  %v7336_v42 = vld [vmem:[%s10651_s5 + $0x1cc] ss:$16 sps:$4 sm:$0xff]  }
 0x109   :  { %2393 = vmatpush1.bf16.msra.mxu0 %v6394_v43  ;;  %v7334_v43 = vld [vmem:[%s10651_s5 + $0x1c8] ss:$16 sps:$4 sm:$0xff]  }
 0x10a   :  { %719 = vmatpush1.bf16.msra.mxu1 %v7256_v44  ;;  %v876_v44 = vld [vmem:[%s10653_s7 + $0x280] sm:$0xff] }
 0x10b   :  { %720 = vmatprep.subr.bf16.mxu1 %v7261_v45  ;;  %v880_v45 = vld [vmem:[%s10653_s7 + $0x2a0] sm:$0xff] }
 0x10e   :  { %721 = vmatpush1.bf16.msra.mxu1 %v7259_v46  ;;  %v6403_v46 = vcombine.high %v876_v44, %v880_v45 }
 0x10f   :  { %722 = vmatprep.subr.bf16.mxu1 %v7264_v47  ;;  %v6402_v47 = vcombine.low %v876_v44, %v880_v45  ;;  %v7339_v44 = vld [vmem:[%s10651_s5 + $0x1ec] ss:$16 sps:$4 sm:$0xff]  }
 0x110   :  { %2394 = vmatprep.subr.bf16.mxu0 %v6403_v46  ;;  %v797_v45 = vld [vmem:[%s10653_s7 + $0x8] sm:$0xff] }
 0x111   :  { %2395 = vmatpush1.bf16.msra.mxu0 %v6402_v47  ;;  %v801_v46 = vld [vmem:[%s10653_s7 + $0x28] sm:$0xff] }
 0x112   :  { %723 = vmatpush1.bf16.msra.mxu1 %v7262_v48  ;;  %v884_v48 = vld [vmem:[%s10653_s7 + $0x2c0] sm:$0xff]  ;;  %v7337_v47 = vld [vmem:[%s10651_s5 + $0x1e8] ss:$16 sps:$4 sm:$0xff]  }
 0x113   :  { %724 = vmatprep.subr.bf16.mxu1 %v7267_v49  ;;  %v888_v49 = vld [vmem:[%s10653_s7 + $0x2e0] sm:$0xff] }
 0x116   :  { %725 = vmatpush1.bf16.msra.mxu1 %v7265_v50  ;;  %v171_v50 = vlaneseq }
 0x117   :  { %726 = vmatprep.subr.bf16.mxu1 %v7270_v51  ;;  %v6411_v51 = vcombine.high %v884_v48, %v888_v49 }
 0x119   :  { %2396 = vmatprep.subr.bf16.mxu0 %v6411_v51  ;;  %v6324_v51 = vcombine.low %v797_v45, %v801_v46 }
 0x11a   :  { %727 = vmatpush1.bf16.msra.mxu1 %v7268_v52  ;;  %v6410_v52 = vcombine.low %v884_v48, %v888_v49  ;;  %v6325_v48 = vcombine.high %v797_v45, %v801_v46  ;;  %v805_v49 = vld [vmem:[%s10653_s7 + $0x48] sm:$0xff] }
 0x11b   :  { %728 = vmatprep.subr.bf16.mxu1 %v7273_v53  ;;  %v892_v53 = vld [vmem:[%s10653_s7 + $0x300] sm:$0xff] }
 0x11c   :  { %2397 = vmatpush1.bf16.msra.mxu0 %v6410_v52 }
 0x11e   :  { %729 = vmatpush1.bf16.msra.mxu1 %v7271_v54  ;;  %v896_v54 = vld [vmem:[%s10653_s7 + $0x320] sm:$0xff] }
 0x11f   :  { %730 = vmatprep.subr.bf16.mxu1 %v7276_v55  ;;  %v8313_v55 = vshrl.u32 %v171_v50, 7  ;;  %v809_v50 = vld [vmem:[%s10653_s7 + $0x68] sm:$0xff] }
 0x120   :  { %v6333_v52 = vcombine.high %v805_v49, %v809_v50 }
 0x122   :  { %731 = vmatpush1.bf16.msra.mxu1 %v7274_v56  ;;  %v6419_v56 = vcombine.high %v892_v53, %v896_v54 }
 0x123   :  { %732 = vmatprep.subr.bf16.mxu1 %v7279_v57  ;;  %v6418_v57 = vcombine.low %v892_v53, %v896_v54  ;;  %v813_v53 = vld [vmem:[%s10653_s7 + $0x88] sm:$0xff] }
 0x124   :  { %2398 = vmatprep.subr.bf16.mxu0 %v6419_v56  ;;  %v817_v54 = vld [vmem:[%s10653_s7 + $0xa8] sm:$0xff]  ;;  %v6332_v56 = vcombine.low %v805_v49, %v809_v50 }
 0x125   :  { %2399 = vmatpush1.bf16.msra.mxu0 %v6418_v57  ;;  %v6341_v57 = vcombine.high %v813_v53, %v817_v54 }
 0x126   :  { %733 = vmatpush1.bf16.msra.mxu1 %v7277_v58  ;;  %v900_v58 = vld [vmem:[%s10653_s7 + $0x340] sm:$0xff] }
 0x127   :  { %734 = vmatprep.subr.bf16.mxu1 %v7282_v59  ;;  %v904_v59 = vld [vmem:[%s10653_s7 + $0x360] sm:$0xff] }
 0x12a   :  { %735 = vmatpush1.bf16.msra.mxu1 %v7280_v60  ;;  %v8322_v60 = vsub.s32 0, %v8313_v55 }
 0x12b   :  { %736 = vmatprep.subr.bf16.mxu1 %v7285_v61  ;;  %v6427_v61 = vcombine.high %v900_v58, %v904_v59 }
 0x12d   :  { %2400 = vmatprep.subr.bf16.mxu0 %v6427_v61  ;;  %v6340_v61 = vcombine.low %v813_v53, %v817_v54 }
 0x12e   :  { %737 = vmatpush1.bf16.msra.mxu1 %v7283_v62  ;;  %v169_v62 = vld [vmem:[%s10654_s4] sm:$0x3] }
 0x12f   :  { %738 = vmatprep.subr.bf16.mxu1 %v7288_v63  ;;  %v8328_v63 = vsub.s32 1, %v8313_v55 }
 0x131   :  { %v178_v5 = vrot.slane %v169_v62, %v8328_v63 }
 0x132   :  { %739 = vmatpush1.bf16.msra.mxu1 %v7286_v0  ;;  %v6426_v0 = vcombine.low %v900_v58, %v904_v59  ;;  %v821_v58 = vld [vmem:[%s10653_s7 + $0xc8] sm:$0xff] }
 0x133   :  { %740 = vmatprep.subr.bf16.mxu1 %v7291_v1  ;;  %v908_v1 = vld [vmem:[%s10653_s7 + $0x380] sm:$0xff]  ;;  %v825_v59 = vld [vmem:[%s10653_s7 + $0xe8] sm:$0xff] }
 0x134   :  { %2401 = vmatpush1.bf16.msra.mxu0 %v6426_v0  ;;  %v829_v0 = vld [vmem:[%s10653_s7 + $0x108] sm:$0xff] }
 0x136   :  { %741 = vmatpush1.bf16.msra.mxu1 %v7289_v2  ;;  %v912_v2 = vld [vmem:[%s10653_s7 + $0x3a0] sm:$0xff] }
 0x137   :  { %751 = vmatprep.subr.bf16.mxu1 %v7294_v3  ;;  %v174_v3 = vrot.slane %v169_v62, %v8322_v60  ;;  %v6435_v4 = vcombine.high %v908_v1, %v912_v2  ;;  %v6434_v7 = vcombine.low %v908_v1, %v912_v2  ;;  %v6349_v62 = vcombine.high %v821_v58, %v825_v59  ;;  %v833_v1 = vld [vmem:[%s10653_s7 + $0x128] sm:$0xff] }
 0x138   :  { %v6348_v2 = vcombine.low %v821_v58, %v825_v59 }
 0x139   :  { %2402 = vmatprep.subr.bf16.mxu0 %v6435_v4  ;;  %v837_v4 = vld [vmem:[%s10653_s7 + $0x148] sm:$0xff] }
 0x13a   :  { %2403 = vmatpush1.bf16.msra.mxu0 %v6434_v7 }
 0x1cc   :  { %v295_v6 = vpop.f32.mrb[0].mxu1 }
 0x1cd   :  { %v296_v8 = vadd.f32 %v295_v6, %v174_v3  ;;  %v297_v9 = vpop.f32.mrb[1].mxu1  ;;  %v6357_v3 = vcombine.high %v829_v0, %v833_v1  ;;  %v6356_v6 = vcombine.low %v829_v0, %v833_v1  ;;  %v8568_v0 = vld [vmem:[%s10655_s6] sm:$0xf] }
 0x1ce   :  { %v298_v10 = vadd.f32 %v297_v9, %v178_v5  ;;  %v299_v11 = vpop.f32.mrb[2].mxu1  ;;  %v841_v5 = vld [vmem:[%s10653_s7 + $0x168] sm:$0xff]  ;;  %v373_v1 = vrot.slane %v8568_v0, %v8322_v60 }
 0x1cf   :  { %v300_v12 = vpop.f32.mrb[3].mxu1  ;;  %v8341_v15 = vpack.c.bf16 %v296_v8, %v296_v8  ;;  %v6365_v7 = vcombine.high %v837_v4, %v841_v5  ;;  %v845_v8 = vld [vmem:[%s10653_s7 + $0x188] sm:$0xff] }
 0x1d0   :  { %v303_v13 = vpack.c.bf16 %v298_v10, %v298_v10  ;;  %v849_v9 = vld [vmem:[%s10653_s7 + $0x1a8] sm:$0xff]  ;;  %v6364_v10 = vcombine.low %v837_v4, %v841_v5 }
 0x1d1   :  { %v6373_v11 = vcombine.high %v845_v8, %v849_v9  ;;  %v853_v12 = vld [vmem:[%s10653_s7 + $0x1c8] sm:$0xff] }
 0x1d2   :  { %742 = vmatprep.mubr.bf16.mxu1 %v303_v13 }
 0x1d3   :  { %743 = vmatmul.mubr.bf16.vlgmr.msra.gmra.mrb[4].mxu1 %v8341_v15 }
 0x1d4   :  { %752 = vmatpush1.bf16.msra.mxu1 %v7292_v14  ;;  %783 = vmatprep.mubr.bf16.mxu1 %v303_v13  ;;  %v857_v13 = vld [vmem:[%s10653_s7 + $0x1e8] sm:$0xff]  ;;  %v916_v14 = vld [vmem:[%s10653_s7 + $0x3c0] sm:$0xff] }
 0x1d5   :  { %753 = vmatprep.subr.bf16.mxu1 %v7297_v16 }
 0x1d8   :  { %754 = vmatpush1.bf16.msra.mxu1 %v7295_v17  ;;  %v6372_v17 = vcombine.low %v845_v8, %v849_v9  ;;  %v936_v9 = vld [vmem:[%s10653_s7 + $0x460] sm:$0xff] }
 0x1d9   :  { %755 = vmatprep.subr.bf16.mxu1 %v7300_v18 }
 0x1dc   :  { %756 = vmatpush1.bf16.msra.mxu1 %v7298_v19  ;;  %v6381_v19 = vcombine.high %v853_v12, %v857_v13 }
 0x1dd   :  { %757 = vmatprep.subr.bf16.mxu1 %v7303_v20  ;;  %v861_v20 = vld [vmem:[%s10653_s7 + $0x208] sm:$0xff] }
 0x1e0   :  { %758 = vmatpush1.bf16.msra.mxu1 %v7301_v21  ;;  %v865_v21 = vld [vmem:[%s10653_s7 + $0x228] sm:$0xff] }
 0x1e1   :  { %759 = vmatprep.subr.bf16.mxu1 %v7306_v22  ;;  %v8498_v22 = vld [vmem:[%s10653_s7 + $0x400] sm:$0xff] }
 0x1e4   :  { %760 = vmatpush1.bf16.msra.mxu1 %v7304_v23  ;;  %v8503_v23 = vld [vmem:[%s10653_s7 + $0x420] sm:$0xff] }
 0x1e5   :  { %761 = vmatprep.subr.bf16.mxu1 %v7309_v24  ;;  %v8508_v24 = vld [vmem:[%s10653_s7 + $0x408] sm:$0xff] }
 0x1e8   :  { %762 = vmatpush1.bf16.msra.mxu1 %v7307_v25  ;;  %v6451_v25 = vcombine.high %v8498_v22, %v8503_v23 }
 0x1e9   :  { %763 = vmatprep.subr.bf16.mxu1 %v7312_v26  ;;  %v8515_v26 = vld [vmem:[%s10653_s7 + $0x428] sm:$0xff] }
 0x1ec   :  { %764 = vmatpush1.bf16.msra.mxu1 %v7310_v27  ;;  %v6380_v27 = vcombine.low %v853_v12, %v857_v13 }
 0x1ed   :  { %765 = vmatprep.subr.bf16.mxu1 %v7315_v28  ;;  %v6450_v28 = vcombine.low %v8498_v22, %v8503_v23  ;;  %v949_v22 = vld [vmem:[%s10653_s7 + $0x4c8] sm:$0xff] }
 0x1ee   :  { %v953_v23 = vld [vmem:[%s10653_s7 + $0x4e8] sm:$0xff] }
 0x1f0   :  { %766 = vmatpush1.bf16.msra.mxu1 %v7313_v29  ;;  %v6452_v29 = vcombine.low %v8508_v24, %v8515_v26 }
 0x1f1   :  { %767 = vmatprep.subr.bf16.mxu1 %v7318_v30  ;;  %v6389_v30 = vcombine.high %v861_v20, %v865_v21 }
 0x1f4   :  { %768 = vmatpush1.bf16.msra.mxu1 %v7316_v31  ;;  %v869_v31 = vld [vmem:[%s10653_s7 + $0x248] sm:$0xff] }
 0x1f5   :  { %769 = vmatprep.subr.bf16.mxu1 %v7321_v32  ;;  %v873_v32 = vld [vmem:[%s10653_s7 + $0x268] sm:$0xff] }
 0x1f8   :  { %770 = vmatpush1.bf16.msra.mxu1 %v7319_v33  ;;  %v6388_v33 = vcombine.low %v861_v20, %v865_v21  ;;  %v945_v20 = vld [vmem:[%s10653_s7 + $0x4a8] sm:$0xff] }
 0x1f9   :  { %771 = vmatprep.subr.bf16.mxu1 %v7324_v34  ;;  %v6397_v34 = vcombine.high %v869_v31, %v873_v32 }
 0x1fc   :  { %772 = vmatpush1.bf16.msra.mxu1 %v7322_v35  ;;  %v877_v35 = vld [vmem:[%s10653_s7 + $0x288] sm:$0xff] }
 0x1fd   :  { %773 = vmatprep.subr.bf16.mxu1 %v7327_v36  ;;  %v881_v36 = vld [vmem:[%s10653_s7 + $0x2a8] sm:$0xff] }
 0x200   :  { %774 = vmatpush1.bf16.msra.mxu1 %v7325_v37  ;;  %v6396_v37 = vcombine.low %v869_v31, %v873_v32  ;;  %v948_v31 = vld [vmem:[%s10653_s7 + $0x4c0] sm:$0xff] }
 0x201   :  { %775 = vmatprep.subr.bf16.mxu1 %v7330_v38  ;;  %v6405_v38 = vcombine.high %v877_v35, %v881_v36  ;;  %v952_v32 = vld [vmem:[%s10653_s7 + $0x4e0] sm:$0xff] }
 0x204   :  { %776 = vmatpush1.bf16.msra.mxu1 %v7328_v39  ;;  %v885_v39 = vld [vmem:[%s10653_s7 + $0x2c8] sm:$0xff] }
 0x205   :  { %777 = vmatprep.subr.bf16.mxu1 %v7333_v40  ;;  %v889_v40 = vld [vmem:[%s10653_s7 + $0x2e8] sm:$0xff] }
 0x206   :  { %v6412_v45 = vcombine.low %v885_v39, %v889_v40 }
 0x208   :  { %778 = vmatpush1.bf16.msra.mxu1 %v7331_v41  ;;  %v6404_v41 = vcombine.low %v877_v35, %v881_v36  ;;  %v957_v35 = vld [vmem:[%s10653_s7 + $0x508] sm:$0xff] }
 0x209   :  { %779 = vmatprep.subr.bf16.mxu1 %v7336_v42  ;;  %v6413_v42 = vcombine.high %v885_v39, %v889_v40  ;;  %v961_v36 = vld [vmem:[%s10653_s7 + $0x528] sm:$0xff] }
 0x20a   :  { %v6485_v40 = vcombine.high %v957_v35, %v961_v36 }
 0x20c   :  { %780 = vmatpush1.bf16.msra.mxu1 %v7334_v43  ;;  %v893_v43 = vld [vmem:[%s10653_s7 + $0x308] sm:$0xff] }
 0x20d   :  { %781 = vmatprep.subr.bf16.mxu1 %v7339_v44  ;;  %v897_v44 = vld [vmem:[%s10653_s7 + $0x328] sm:$0xff] }
 0x20e   :  { %v6421_v46 = vcombine.high %v893_v43, %v897_v44  ;;  %v6420_v49 = vcombine.low %v893_v43, %v897_v44  ;;  %v965_v43 = vld [vmem:[%s10653_s7 + $0x548] sm:$0xff] }
 0x20f   :  { %v969_v44 = vld [vmem:[%s10653_s7 + $0x568] sm:$0xff] }
 0x210   :  { %782 = vmatpush1.bf16.msra.mxu1 %v7337_v47  ;;  %v901_v47 = vld [vmem:[%s10653_s7 + $0x348] sm:$0xff] }
 0x211   :  { %2456 = vmatprep.subr.bf16.mxu1 %v6325_v48  ;;  %v905_v48 = vld [vmem:[%s10653_s7 + $0x368] sm:$0xff] }
 0x212   :  { %v6429_v50 = vcombine.high %v901_v47, %v905_v48  ;;  %v6428_v53 = vcombine.low %v901_v47, %v905_v48  ;;  %v6493_v48 = vcombine.high %v965_v43, %v969_v44 }
 0x213   :  { %784 = vmatmul.mubr.bf16.vlgmr.msra.gmra.mrb[8].mxu1 %v8341_v15  ;;  %v920_v15 = vld [vmem:[%s10653_s7 + $0x3e0] sm:$0xff] }
 0x214   :  { %2457 = vmatpush1.bf16.msra.mxu1 %v6324_v51  ;;  %v6443_v16 = vcombine.high %v916_v14, %v920_v15  ;;  %v6442_v18 = vcombine.low %v916_v14, %v920_v15  ;;  %v909_v51 = vld [vmem:[%s10653_s7 + $0x388] sm:$0xff] }
 0x215   :  { %2458 = vmatprep.subr.bf16.mxu1 %v6333_v52  ;;  %v913_v52 = vld [vmem:[%s10653_s7 + $0x3a8] sm:$0xff] }
 0x216   :  { %2404 = vmatprep.subr.bf16.mxu0 %v6443_v16  ;;  %v6437_v54 = vcombine.high %v909_v51, %v913_v52  ;;  %v6436_v58 = vcombine.low %v909_v51, %v913_v52  ;;  %v973_v51 = vld [vmem:[%s10653_s7 + $0x588] sm:$0xff] }
 0x217   :  { %2405 = vmatpush1.bf16.msra.mxu0 %v6442_v18  ;;  %v944_v18 = vld [vmem:[%s10653_s7 + $0x4a0] sm:$0xff]  ;;  %v977_v52 = vld [vmem:[%s10653_s7 + $0x5a8] sm:$0xff] }
 0x218   :  { %2459 = vmatpush1.bf16.msra.mxu1 %v6332_v56  ;;  %2415 = vmatprep.subr.bf16.mxu0 %v6451_v25  ;;  %v917_v56 = vld [vmem:[%s10653_s7 + $0x3c8] sm:$0xff] }
 0x219   :  { %2460 = vmatprep.subr.bf16.mxu1 %v6341_v57  ;;  %v921_v57 = vld [vmem:[%s10653_s7 + $0x3e8] sm:$0xff] }
 0x21a   :  { %v6445_v59 = vcombine.high %v917_v56, %v921_v57 }
 0x21c   :  { %2461 = vmatpush1.bf16.msra.mxu1 %v6340_v61  ;;  %v6444_v61 = vcombine.low %v917_v56, %v921_v57  ;;  %v6501_v57 = vcombine.high %v973_v51, %v977_v52 }
 0x21d   :  { %2462 = vmatprep.subr.bf16.mxu1 %v6349_v62  ;;  %v6453_v62 = vcombine.high %v8508_v24, %v8515_v26 }
 0x220   :  { %2463 = vmatpush1.bf16.msra.mxu1 %v6348_v2  ;;  %v377_v2 = vrot.slane %v8568_v0, %v8328_v63 }
 0x221   :  { %2464 = vmatprep.subr.bf16.mxu1 %v6357_v3 }
 0x224   :  { %2465 = vmatpush1.bf16.msra.mxu1 %v6356_v6  ;;  %v932_v6 = vld [vmem:[%s10653_s7 + $0x440] sm:$0xff] }
 0x225   :  { %2466 = vmatprep.subr.bf16.mxu1 %v6365_v7  ;;  %v6459_v15 = vcombine.high %v932_v6, %v936_v9  ;;  %v6458_v21 = vcombine.low %v932_v6, %v936_v9  ;;  %v992_v6 = vld [vmem:[%s10653_s7 + $0x620] sm:$0xff] }
 0x228   :  { %2467 = vmatpush1.bf16.msra.mxu1 %v6364_v10  ;;  %v933_v10 = vld [vmem:[%s10653_s7 + $0x448] sm:$0xff] }
 0x229   :  { %2468 = vmatprep.subr.bf16.mxu1 %v6373_v11  ;;  %v937_v11 = vld [vmem:[%s10653_s7 + $0x468] sm:$0xff] }
 0x22a   :  { %v6461_v16 = vcombine.high %v933_v10, %v937_v11  ;;  %v6460_v25 = vcombine.low %v933_v10, %v937_v11 }
 0x22c   :  { %2469 = vmatpush1.bf16.msra.mxu1 %v6372_v17  ;;  %v940_v17 = vld [vmem:[%s10653_s7 + $0x480] sm:$0xff] }
 0x22d   :  { %2470 = vmatprep.subr.bf16.mxu1 %v6381_v19  ;;  %v941_v19 = vld [vmem:[%s10653_s7 + $0x488] sm:$0xff]  ;;  %v6466_v24 = vcombine.low %v940_v17, %v944_v18 }
 0x22e   :  { %v6468_v26 = vcombine.low %v941_v19, %v945_v20 }
 0x230   :  { %2471 = vmatpush1.bf16.msra.mxu1 %v6380_v27  ;;  %v6467_v27 = vcombine.high %v940_v17, %v944_v18  ;;  %v997_v17 = vld [vmem:[%s10653_s7 + $0x648] sm:$0xff] }
 0x231   :  { %2472 = vmatprep.subr.bf16.mxu1 %v6389_v30  ;;  %v6469_v30 = vcombine.high %v941_v19, %v945_v20  ;;  %v1001_v18 = vld [vmem:[%s10653_s7 + $0x668] sm:$0xff] }
 0x234   :  { %2473 = vmatpush1.bf16.msra.mxu1 %v6388_v33  ;;  %v956_v33 = vld [vmem:[%s10653_s7 + $0x500] sm:$0xff] }
 0x235   :  { %2474 = vmatprep.subr.bf16.mxu1 %v6397_v34  ;;  %v960_v34 = vld [vmem:[%s10653_s7 + $0x520] sm:$0xff] }
 0x236   :  { %v6483_v39 = vcombine.high %v956_v33, %v960_v34 }
 0x238   :  { %2475 = vmatpush1.bf16.msra.mxu1 %v6396_v37  ;;  %v6474_v37 = vcombine.low %v948_v31, %v952_v32 }
 0x239   :  { %2476 = vmatprep.subr.bf16.mxu1 %v6405_v38  ;;  %v6476_v38 = vcombine.low %v949_v22, %v953_v23 }
 0x23c   :  { %2477 = vmatpush1.bf16.msra.mxu1 %v6404_v41  ;;  %v964_v41 = vld [vmem:[%s10653_s7 + $0x540] sm:$0xff] }
 0x23d   :  { %2478 = vmatprep.subr.bf16.mxu1 %v6413_v42  ;;  %v968_v42 = vld [vmem:[%s10653_s7 + $0x560] sm:$0xff] }
 0x23e   :  { %v6491_v47 = vcombine.high %v964_v41, %v968_v42 }
 0x240   :  { %2479 = vmatpush1.bf16.msra.mxu1 %v6412_v45  ;;  %v6482_v45 = vcombine.low %v956_v33, %v960_v34  ;;  %v1013_v33 = vld [vmem:[%s10653_s7 + $0x6c8] sm:$0xff] }
 0x241   :  { %2480 = vmatprep.subr.bf16.mxu1 %v6421_v46  ;;  %v6484_v46 = vcombine.low %v957_v35, %v961_v36  ;;  %v1017_v34 = vld [vmem:[%s10653_s7 + $0x6e8] sm:$0xff] }
 0x244   :  { %2481 = vmatpush1.bf16.msra.mxu1 %v6420_v49  ;;  %v972_v49 = vld [vmem:[%s10653_s7 + $0x580] sm:$0xff] }
 0x245   :  { %2482 = vmatprep.subr.bf16.mxu1 %v6429_v50  ;;  %v976_v50 = vld [vmem:[%s10653_s7 + $0x5a0] sm:$0xff] }
 0x246   :  { %v6499_v56 = vcombine.high %v972_v49, %v976_v50 }
 0x248   :  { %2483 = vmatpush1.bf16.msra.mxu1 %v6428_v53  ;;  %v6490_v53 = vcombine.low %v964_v41, %v968_v42  ;;  %v1021_v41 = vld [vmem:[%s10653_s7 + $0x708] sm:$0xff] }
 0x249   :  { %2484 = vmatprep.subr.bf16.mxu1 %v6437_v54  ;;  %v6492_v54 = vcombine.low %v965_v43, %v969_v44  ;;  %v1025_v42 = vld [vmem:[%s10653_s7 + $0x728] sm:$0xff]  ;;  %v6540_v44 = vcombine.low %v1013_v33, %v1017_v34 }
 0x24c   :  { %2485 = vmatpush1.bf16.msra.mxu1 %v6436_v58  ;;  %v980_v58 = vld [vmem:[%s10653_s7 + $0x5c0] sm:$0xff] }
 0x24d   :  { %2486 = vmatprep.subr.bf16.mxu1 %v6445_v59  ;;  %v984_v59 = vld [vmem:[%s10653_s7 + $0x5e0] sm:$0xff] }
 0x24e   :  { %v6506_v9 = vcombine.low %v980_v58, %v984_v59 }
 0x250   :  { %2487 = vmatpush1.bf16.msra.mxu1 %v6444_v61  ;;  %v981_v61 = vld [vmem:[%s10653_s7 + $0x5c8] sm:$0xff] }
 0x251   :  { %2497 = vmatprep.subr.bf16.mxu1 %v6453_v62  ;;  %v985_v62 = vld [vmem:[%s10653_s7 + $0x5e8] sm:$0xff] }
 0x252   :  { %v6508_v10 = vcombine.low %v981_v61, %v985_v62 }
 0x2a6   :  { %v744_v3 = vpop.f32.mrb[4].mxu1 }
 0x2a7   :  { %v745_v4 = vadd.f32 %v744_v3, %v373_v1  ;;  %v746_v5 = vpop.f32.mrb[5].mxu1  ;;  %v6498_v1 = vcombine.low %v972_v49, %v976_v50  ;;  %v6507_v3 = vcombine.high %v980_v58, %v984_v59  ;;  %v1029_v49 = vld [vmem:[%s10653_s7 + $0x748] sm:$0xff] }
 0x2a8   :  { %v747_v7 = vadd.f32 %v746_v5, %v377_v2  ;;  %v748_v8 = vpop.f32.mrb[6].mxu1  ;;  %v6500_v2 = vcombine.low %v973_v51, %v977_v52  ;;  %v988_v5 = vld [vmem:[%s10653_s7 + $0x600] sm:$0xff]  ;;  %v1033_v50 = vld [vmem:[%s10653_s7 + $0x768] sm:$0xff]  ;;  %v6548_v52 = vcombine.low %v1021_v41, %v1025_v42 }
 0x2a9   :  { %v749_v12 = vpop.f32.mrb[7].mxu1  ;;  %v8588_v14 = vpack.c.bf16 %v745_v4, %v745_v4  ;;  %v6509_v4 = vcombine.high %v981_v61, %v985_v62  ;;  %v993_v8 = vld [vmem:[%s10653_s7 + $0x628] sm:$0xff]  ;;  %v6515_v11 = vcombine.high %v988_v5, %v992_v6  ;;  %v6514_v19 = vcombine.low %v988_v5, %v992_v6  ;;  %v1048_v6 = vld [vmem:[%s10653_s7 + $0x7e0] sm:$0xff] }
 0x2aa   :  { %v8586_v13 = vpack.c.bf16 %v747_v7, %v747_v7  ;;  %v989_v7 = vld [vmem:[%s10653_s7 + $0x608] sm:$0xff]  ;;  %v6556_v62 = vcombine.low %v1029_v49, %v1033_v50  ;;  %v8763_v5 = vsub.s32 3, %v8313_v55 }
 0x2ab   :  { %v6517_v12 = vcombine.high %v989_v7, %v993_v8  ;;  %v6516_v20 = vcombine.low %v989_v7, %v993_v8  ;;  %v1037_v58 = vld [vmem:[%s10653_s7 + $0x788] sm:$0xff] }
 0x2ac   :  { %2406 = vmatprep.mubr.bf16.mxu0 %v8586_v13  ;;  %2488 = vmatprep.mubr.bf16.mxu1 %v8586_v13  ;;  %v1041_v59 = vld [vmem:[%s10653_s7 + $0x7a8] sm:$0xff] }
 0x2ad   :  { %2407 = vmatmul.mubr.bf16.vlgmr.msra.gmra.mrb[4].mxu0 %v8588_v14  ;;  %2489 = vmatmul.mubr.bf16.vlgmr.msra.gmra.mrb[12].mxu1 %v8588_v14  ;;  %v1045_v7 = vld [vmem:[%s10653_s7 + $0x7c8] sm:$0xff] }
 0x2ae   :  { %2416 = vmatpush1.bf16.msra.mxu0 %v6450_v28  ;;  %2498 = vmatpush1.bf16.msra.mxu1 %v6452_v29  ;;  %v6475_v28 = vcombine.high %v948_v31, %v952_v32  ;;  %v6477_v29 = vcombine.high %v949_v22, %v953_v23  ;;  %v1005_v31 = vld [vmem:[%s10653_s7 + $0x688] sm:$0xff]  ;;  %v6524_v23 = vcombine.low %v997_v17, %v1001_v18 }
 0x2af   :  { %2417 = vmatprep.subr.bf16.mxu0 %v6459_v15  ;;  %2499 = vmatprep.subr.bf16.mxu1 %v6461_v16  ;;  %v996_v15 = vld [vmem:[%s10653_s7 + $0x640] sm:$0xff]  ;;  %v1009_v32 = vld [vmem:[%s10653_s7 + $0x6a8] sm:$0xff] }
 0x2b0   :  { %v1000_v16 = vld [vmem:[%s10653_s7 + $0x660] sm:$0xff]  ;;  %v6532_v36 = vcombine.low %v1005_v31, %v1009_v32  ;;  %v1049_v8 = vld [vmem:[%s10653_s7 + $0x7e8] sm:$0xff] }
 0x2b1   :  { %v6522_v22 = vcombine.low %v996_v15, %v1000_v16 }
 0x2b2   :  { %2418 = vmatpush1.bf16.msra.mxu0 %v6458_v21  ;;  %2500 = vmatpush1.bf16.msra.mxu1 %v6460_v25  ;;  %v6523_v21 = vcombine.high %v996_v15, %v1000_v16  ;;  %v6525_v25 = vcombine.high %v997_v17, %v1001_v18  ;;  %v6573_v15 = vcombine.high %v1045_v7, %v1049_v8  ;;  %v798_v16 = vld [vmem:[%s10653_s7 + $0x10] sm:$0xff] }
 0x2b3   :  { %2419 = vmatprep.subr.bf16.mxu0 %v6467_v27  ;;  %2501 = vmatprep.subr.bf16.mxu1 %v6469_v30  ;;  %v1004_v27 = vld [vmem:[%s10653_s7 + $0x680] sm:$0xff]  ;;  %v385_v17 = vrot.slane %v8568_v0, %v8763_v5  ;;  %v802_v18 = vld [vmem:[%s10653_s7 + $0x30] sm:$0xff] }
 0x2b4   :  { %v1008_v30 = vld [vmem:[%s10653_s7 + $0x6a0] sm:$0xff] }
 0x2b5   :  { %v6530_v35 = vcombine.low %v1004_v27, %v1008_v30 }
 0x2b6   :  { %2420 = vmatpush1.bf16.msra.mxu0 %v6466_v24  ;;  %2502 = vmatpush1.bf16.msra.mxu1 %v6468_v26  ;;  %v6531_v24 = vcombine.high %v1004_v27, %v1008_v30  ;;  %v6533_v26 = vcombine.high %v1005_v31, %v1009_v32  ;;  %v6572_v27 = vcombine.low %v1045_v7, %v1049_v8  ;;  %v839_v7 = vld [vmem:[%s10653_s7 + $0x158] sm:$0xff] }
 0x2b7   :  { %2421 = vmatprep.subr.bf16.mxu0 %v6475_v28  ;;  %2503 = vmatprep.subr.bf16.mxu1 %v6477_v29  ;;  %v1012_v28 = vld [vmem:[%s10653_s7 + $0x6c0] sm:$0xff]  ;;  %v843_v8 = vld [vmem:[%s10653_s7 + $0x178] sm:$0xff] }
 0x2b8   :  { %v1016_v29 = vld [vmem:[%s10653_s7 + $0x6e0] sm:$0xff] }
 0x2b9   :  { %v6538_v43 = vcombine.low %v1012_v28, %v1016_v29 }
 0x2ba   :  { %2422 = vmatpush1.bf16.msra.mxu0 %v6474_v37  ;;  %2504 = vmatpush1.bf16.msra.mxu1 %v6476_v38  ;;  %v6539_v37 = vcombine.high %v1012_v28, %v1016_v29  ;;  %v6541_v38 = vcombine.high %v1013_v33, %v1017_v34  ;;  %v810_v28 = vld [vmem:[%s10653_s7 + $0x70] sm:$0xff]  ;;  %v807_v29 = vld [vmem:[%s10653_s7 + $0x58] sm:$0xff] }
 0x2bb   :  { %2423 = vmatprep.subr.bf16.mxu0 %v6483_v39  ;;  %2505 = vmatprep.subr.bf16.mxu1 %v6485_v40  ;;  %v1020_v39 = vld [vmem:[%s10653_s7 + $0x700] sm:$0xff]  ;;  %v811_v33 = vld [vmem:[%s10653_s7 + $0x78] sm:$0xff] }
 0x2bc   :  { %v1024_v40 = vld [vmem:[%s10653_s7 + $0x720] sm:$0xff] }
 0x2bd   :  { %v6546_v51 = vcombine.low %v1020_v39, %v1024_v40 }
 0x2be   :  { %2424 = vmatpush1.bf16.msra.mxu0 %v6482_v45  ;;  %2506 = vmatpush1.bf16.msra.mxu1 %v6484_v46  ;;  %v6547_v45 = vcombine.high %v1020_v39, %v1024_v40  ;;  %v6549_v46 = vcombine.high %v1021_v41, %v1025_v42  ;;  %v6337_v39 = vcombine.high %v807_v29, %v811_v33  ;;  %v814_v40 = vld [vmem:[%s10653_s7 + $0x90] sm:$0xff]  ;;  %v815_v42 = vld [vmem:[%s10653_s7 + $0x98] sm:$0xff] }
 0x2bf   :  { %2425 = vmatprep.subr.bf16.mxu0 %v6491_v47  ;;  %2507 = vmatprep.subr.bf16.mxu1 %v6493_v48  ;;  %v1028_v47 = vld [vmem:[%s10653_s7 + $0x740] sm:$0xff]  ;;  %v818_v41 = vld [vmem:[%s10653_s7 + $0xb0] sm:$0xff] }
 0x2c0   :  { %v1032_v48 = vld [vmem:[%s10653_s7 + $0x760] sm:$0xff] }
 0x2c1   :  { %v6554_v61 = vcombine.low %v1028_v47, %v1032_v48 }
 0x2c2   :  { %2426 = vmatpush1.bf16.msra.mxu0 %v6490_v53  ;;  %2508 = vmatpush1.bf16.msra.mxu1 %v6492_v54  ;;  %v6555_v53 = vcombine.high %v1028_v47, %v1032_v48  ;;  %v6557_v54 = vcombine.high %v1029_v49, %v1033_v50  ;;  %v822_v47 = vld [vmem:[%s10653_s7 + $0xd0] sm:$0xff]  ;;  %v823_v50 = vld [vmem:[%s10653_s7 + $0xd8] sm:$0xff] }
 0x2c3   :  { %2427 = vmatprep.subr.bf16.mxu0 %v6499_v56  ;;  %2509 = vmatprep.subr.bf16.mxu1 %v6501_v57  ;;  %v1036_v56 = vld [vmem:[%s10653_s7 + $0x780] sm:$0xff]  ;;  %v826_v49 = vld [vmem:[%s10653_s7 + $0xf0] sm:$0xff] }
 0x2c4   :  { %v1040_v57 = vld [vmem:[%s10653_s7 + $0x7a0] sm:$0xff] }
 0x2c6   :  { %2428 = vmatpush1.bf16.msra.mxu0 %v6498_v1  ;;  %2510 = vmatpush1.bf16.msra.mxu1 %v6500_v2  ;;  %v6563_v1 = vcombine.high %v1036_v56, %v1040_v57  ;;  %v6565_v2 = vcombine.high %v1037_v58, %v1041_v59 }
 0x2c7   :  { %2429 = vmatprep.subr.bf16.mxu0 %v6507_v3  ;;  %2511 = vmatprep.subr.bf16.mxu1 %v6509_v4  ;;  %v8757_v3 = vsub.s32 2, %v8313_v55  ;;  %v1044_v4 = vld [vmem:[%s10653_s7 + $0x7c0] sm:$0xff] }
 0x2ca   :  { %2430 = vmatpush1.bf16.msra.mxu0 %v6506_v9  ;;  %2512 = vmatpush1.bf16.msra.mxu1 %v6508_v10  ;;  %v6562_v9 = vcombine.low %v1036_v56, %v1040_v57  ;;  %v6564_v10 = vcombine.low %v1037_v58, %v1041_v59  ;;  %v834_v57 = vld [vmem:[%s10653_s7 + $0x130] sm:$0xff]  ;;  %v831_v58 = vld [vmem:[%s10653_s7 + $0x118] sm:$0xff] }
 0x2cb   :  { %2431 = vmatprep.subr.bf16.mxu0 %v6515_v11  ;;  %2513 = vmatprep.subr.bf16.mxu1 %v6517_v12  ;;  %v381_v11 = vrot.slane %v8568_v0, %v8757_v3  ;;  %v6571_v12 = vcombine.high %v1044_v4, %v1048_v6  ;;  %v6327_v0 = vcombine.high %v798_v16, %v802_v18  ;;  %v835_v59 = vld [vmem:[%s10653_s7 + $0x138] sm:$0xff] }
 0x2ce   :  { %2432 = vmatpush1.bf16.msra.mxu0 %v6514_v19  ;;  %2514 = vmatpush1.bf16.msra.mxu1 %v6516_v20  ;;  %v799_v19 = vld [vmem:[%s10653_s7 + $0x18] sm:$0xff] }
 0x2cf   :  { %2433 = vmatprep.subr.bf16.mxu0 %v6523_v21  ;;  %2515 = vmatprep.subr.bf16.mxu1 %v6525_v25  ;;  %v803_v20 = vld [vmem:[%s10653_s7 + $0x38] sm:$0xff]  ;;  %v6570_v25 = vcombine.low %v1044_v4, %v1048_v6  ;;  %v6361_v4 = vcombine.high %v831_v58, %v835_v59  ;;  %v842_v6 = vld [vmem:[%s10653_s7 + $0x170] sm:$0xff] }
 0x2d0   :  { %v6329_v32 = vcombine.high %v799_v19, %v803_v20 }
 0x2d2   :  { %2434 = vmatpush1.bf16.msra.mxu0 %v6522_v22  ;;  %2516 = vmatpush1.bf16.msra.mxu1 %v6524_v23 }
 0x2d3   :  { %2435 = vmatprep.subr.bf16.mxu0 %v6531_v24  ;;  %2517 = vmatprep.subr.bf16.mxu1 %v6533_v26  ;;  %v806_v24 = vld [vmem:[%s10653_s7 + $0x50] sm:$0xff] }
 0x2d6   :  { %2436 = vmatpush1.bf16.msra.mxu0 %v6530_v35  ;;  %2518 = vmatpush1.bf16.msra.mxu1 %v6532_v36  ;;  %v6326_v35 = vcombine.low %v798_v16, %v802_v18  ;;  %v847_v16 = vld [vmem:[%s10653_s7 + $0x198] sm:$0xff] }
 0x2d7   :  { %2437 = vmatprep.subr.bf16.mxu0 %v6539_v37  ;;  %2519 = vmatprep.subr.bf16.mxu1 %v6541_v38  ;;  %v6328_v37 = vcombine.low %v799_v19, %v803_v20  ;;  %v6335_v38 = vcombine.high %v806_v24, %v810_v28  ;;  %v851_v18 = vld [vmem:[%s10653_s7 + $0x1b8] sm:$0xff]  ;;  %v6368_v20 = vcombine.low %v839_v7, %v843_v8 }
 0x2da   :  { %2438 = vmatpush1.bf16.msra.mxu0 %v6538_v43  ;;  %2520 = vmatpush1.bf16.msra.mxu1 %v6540_v44  ;;  %v819_v43 = vld [vmem:[%s10653_s7 + $0xb8] sm:$0xff]  ;;  %v6334_v44 = vcombine.low %v806_v24, %v810_v28  ;;  %v862_v24 = vld [vmem:[%s10653_s7 + $0x210] sm:$0xff] }
 0x2db   :  { %2439 = vmatprep.subr.bf16.mxu0 %v6547_v45  ;;  %2521 = vmatprep.subr.bf16.mxu1 %v6549_v46  ;;  %v6336_v45 = vcombine.low %v807_v29, %v811_v33  ;;  %v6343_v46 = vcombine.high %v814_v40, %v818_v41  ;;  %v6345_v48 = vcombine.high %v815_v42, %v819_v43  ;;  %v863_v28 = vld [vmem:[%s10653_s7 + $0x218] sm:$0xff] }
 0x2dc   :  { %v867_v33 = vld [vmem:[%s10653_s7 + $0x238] sm:$0xff] }
 0x2de   :  { %2440 = vmatpush1.bf16.msra.mxu0 %v6546_v51  ;;  %2522 = vmatpush1.bf16.msra.mxu1 %v6548_v52  ;;  %v6342_v51 = vcombine.low %v814_v40, %v818_v41  ;;  %v6344_v52 = vcombine.low %v815_v42, %v819_v43  ;;  %v874_v40 = vld [vmem:[%s10653_s7 + $0x270] sm:$0xff]  ;;  %v871_v41 = vld [vmem:[%s10653_s7 + $0x258] sm:$0xff]  ;;  %v6393_v42 = vcombine.high %v863_v28, %v867_v33 }
 0x2df   :  { %2441 = vmatprep.subr.bf16.mxu0 %v6555_v53  ;;  %2523 = vmatprep.subr.bf16.mxu1 %v6557_v54  ;;  %v6351_v53 = vcombine.high %v822_v47, %v826_v49  ;;  %v830_v54 = vld [vmem:[%s10653_s7 + $0x110] sm:$0xff]  ;;  %v875_v43 = vld [vmem:[%s10653_s7 + $0x278] sm:$0xff] }
 0x2e2   :  { %2442 = vmatpush1.bf16.msra.mxu0 %v6554_v61  ;;  %2524 = vmatpush1.bf16.msra.mxu1 %v6556_v62  ;;  %v6350_v61 = vcombine.low %v822_v47, %v826_v49  ;;  %v878_v47 = vld [vmem:[%s10653_s7 + $0x290] sm:$0xff]  ;;  %v879_v49 = vld [vmem:[%s10653_s7 + $0x298] sm:$0xff] }
 0x2e3   :  { %2443 = vmatprep.subr.bf16.mxu0 %v6563_v1  ;;  %2525 = vmatprep.subr.bf16.mxu1 %v6565_v2  ;;  %v6359_v1 = vcombine.high %v830_v54, %v834_v57  ;;  %v838_v2 = vld [vmem:[%s10653_s7 + $0x150] sm:$0xff] }
 0x2e4   :  { %v6366_v19 = vcombine.low %v838_v2, %v842_v6 }
 0x2e6   :  { %v785_v21 = vpop.f32.mrb[8].mxu1  ;;  %2444 = vmatpush1.bf16.msra.mxu0 %v6562_v9  ;;  %2526 = vmatpush1.bf16.msra.mxu1 %v6564_v10  ;;  %v6358_v9 = vcombine.low %v830_v54, %v834_v57  ;;  %v6360_v10 = vcombine.low %v831_v58, %v835_v59  ;;  %v886_v54 = vld [vmem:[%s10653_s7 + $0x2d0] sm:$0xff]  ;;  %v887_v57 = vld [vmem:[%s10653_s7 + $0x2d8] sm:$0xff] }
 0x2e7   :  { %v786_v30 = vadd.f32 %v785_v21, %v381_v11  ;;  %v787_v31 = vpop.f32.mrb[9].mxu1  ;;  %2445 = vmatprep.subr.bf16.mxu0 %v6571_v12  ;;  %2527 = vmatprep.subr.bf16.mxu1 %v6573_v15  ;;  %v6367_v11 = vcombine.high %v838_v2, %v842_v6  ;;  %v846_v12 = vld [vmem:[%s10653_s7 + $0x190] sm:$0xff]  ;;  %v891_v59 = vld [vmem:[%s10653_s7 + $0x2f8] sm:$0xff] }
 0x2e8   :  { %v788_v22 = vadd.f32 %v787_v31, %v385_v17  ;;  %v789_v23 = vpop.f32.mrb[10].mxu1  ;;  %v850_v15 = vld [vmem:[%s10653_s7 + $0x1b0] sm:$0xff]  ;;  %v6369_v17 = vcombine.high %v839_v7, %v843_v8  ;;  %v6377_v31 = vcombine.high %v847_v16, %v851_v18  ;;  %v895_v6 = vld [vmem:[%s10653_s7 + $0x318] sm:$0xff]  ;;  %v6417_v7 = vcombine.high %v887_v57, %v891_v59 }
 0x2e9   :  { %v790_v26 = vpop.f32.mrb[11].mxu1  ;;  %v8804_v36 = vpack.c.bf16 %v786_v30, %v786_v30  ;;  %v6375_v21 = vcombine.high %v846_v12, %v850_v15  ;;  %v855_v30 = vld [vmem:[%s10653_s7 + $0x1d8] sm:$0xff]  ;;  %v894_v2 = vld [vmem:[%s10653_s7 + $0x310] sm:$0xff] }
 0x2ea   :  { %v8802_v34 = vpack.c.bf16 %v788_v22, %v788_v22  ;;  %2446 = vmatpush1.bf16.msra.mxu0 %v6570_v25  ;;  %2528 = vmatpush1.bf16.msra.mxu1 %v6572_v27  ;;  %v854_v25 = vld [vmem:[%s10653_s7 + $0x1d0] sm:$0xff]  ;;  %v6376_v22 = vcombine.low %v847_v16, %v851_v18  ;;  %v899_v8 = vld [vmem:[%s10653_s7 + $0x338] sm:$0xff] }
 0x2eb   :  { %2538 = vmatprep.subr.bf16.mxu0 %v6327_v0  ;;  %2620 = vmatprep.subr.bf16.mxu1 %v6329_v32  ;;  %v858_v27 = vld [vmem:[%s10653_s7 + $0x1f0] sm:$0xff]  ;;  %v859_v0 = vld [vmem:[%s10653_s7 + $0x1f8] sm:$0xff]  ;;  %v6374_v32 = vcombine.low %v846_v12, %v850_v15 }
 0x2ec   :  { %2447 = vmatprep.mubr.bf16.mxu0 %v8802_v34  ;;  %2529 = vmatprep.mubr.bf16.mxu1 %v8802_v34  ;;  %v6383_v23 = vcombine.high %v854_v25, %v858_v27  ;;  %v866_v26 = vld [vmem:[%s10653_s7 + $0x230] sm:$0xff]  ;;  %v6385_v29 = vcombine.high %v855_v30, %v859_v0  ;;  %v903_v16 = vld [vmem:[%s10653_s7 + $0x358] sm:$0xff] }
 0x2ed   :  { %2448 = vmatmul.mubr.bf16.vlgmr.msra.gmra.mrb[4].mxu0 %v8804_v36  ;;  %2530 = vmatmul.mubr.bf16.vlgmr.msra.gmra.mrb[12].mxu1 %v8804_v36  ;;  %v902_v12 = vld [vmem:[%s10653_s7 + $0x350] sm:$0xff]  ;;  %v907_v18 = vld [vmem:[%s10653_s7 + $0x378] sm:$0xff] }
 0x2ee   :  { %2539 = vmatpush1.bf16.msra.mxu0 %v6326_v35  ;;  %2570 = vmatprep.mubr.bf16.mxu0 %v8586_v13  ;;  %v6382_v35 = vcombine.low %v854_v25, %v858_v27  ;;  %v906_v15 = vld [vmem:[%s10653_s7 + $0x370] sm:$0xff] }
 0x2ef   :  { %2621 = vmatpush1.bf16.msra.mxu1 %v6328_v37  ;;  %2652 = vmatprep.mubr.bf16.mxu1 %v8586_v13  ;;  %v827_v13 = vld [vmem:[%s10653_s7 + $0xf8] sm:$0xff]  ;;  %v6384_v37 = vcombine.low %v855_v30, %v859_v0  ;;  %v910_v25 = vld [vmem:[%s10653_s7 + $0x390] sm:$0xff] }
 0x2f0   :  { %2540 = vmatprep.subr.bf16.mxu0 %v6335_v38  ;;  %2622 = vmatprep.subr.bf16.mxu1 %v6337_v39  ;;  %v6353_v56 = vcombine.high %v823_v50, %v827_v13  ;;  %v6352_v62 = vcombine.low %v823_v50, %v827_v13  ;;  %v6391_v38 = vcombine.high %v862_v24, %v866_v26  ;;  %v870_v39 = vld [vmem:[%s10653_s7 + $0x250] sm:$0xff]  ;;  %v883_v13 = vld [vmem:[%s10653_s7 + $0x2b8] sm:$0xff] }
 0x2f1   :  { %v6401_v50 = vcombine.high %v871_v41, %v875_v43  ;;  %v6409_v58 = vcombine.high %v879_v49, %v883_v13  ;;  %v914_v27 = vld [vmem:[%s10653_s7 + $0x3b0] sm:$0xff]  ;;  %v911_v30 = vld [vmem:[%s10653_s7 + $0x398] sm:$0xff] }
 0x2f2   :  { %2541 = vmatpush1.bf16.msra.mxu0 %v6334_v44  ;;  %v6390_v44 = vcombine.low %v862_v24, %v866_v26  ;;  %v915_v0 = vld [vmem:[%s10653_s7 + $0x3b8] sm:$0xff]  ;;  %v918_v24 = vld [vmem:[%s10653_s7 + $0x3d0] sm:$0xff] }
 0x2f3   :  { %2623 = vmatpush1.bf16.msra.mxu1 %v6336_v45  ;;  %2542 = vmatprep.subr.bf16.mxu0 %v6343_v46  ;;  %v6392_v45 = vcombine.low %v863_v28, %v867_v33  ;;  %v6399_v46 = vcombine.high %v870_v39, %v874_v40  ;;  %v922_v26 = vld [vmem:[%s10653_s7 + $0x3f0] sm:$0xff]  ;;  %v919_v28 = vld [vmem:[%s10653_s7 + $0x3d8] sm:$0xff] }
 0x2f4   :  { %2624 = vmatprep.subr.bf16.mxu1 %v6345_v48  ;;  %v882_v48 = vld [vmem:[%s10653_s7 + $0x2b0] sm:$0xff]  ;;  %v923_v33 = vld [vmem:[%s10653_s7 + $0x3f8] sm:$0xff] }
 0x2f6   :  { %2543 = vmatpush1.bf16.msra.mxu0 %v6342_v51  ;;  %v6398_v51 = vcombine.low %v870_v39, %v874_v40  ;;  %v926_v39 = vld [vmem:[%s10653_s7 + $0x410] sm:$0xff] }
 0x2f7   :  { %2625 = vmatpush1.bf16.msra.mxu1 %v6344_v52  ;;  %2544 = vmatprep.subr.bf16.mxu0 %v6351_v53  ;;  %v6400_v52 = vcombine.low %v871_v41, %v875_v43  ;;  %v6407_v53 = vcombine.high %v878_v47, %v882_v48  ;;  %v930_v40 = vld [vmem:[%s10653_s7 + $0x430] sm:$0xff]  ;;  %v927_v41 = vld [vmem:[%s10653_s7 + $0x418] sm:$0xff] }
 0x2f8   :  { %2626 = vmatprep.subr.bf16.mxu1 %v6353_v56  ;;  %v890_v56 = vld [vmem:[%s10653_s7 + $0x2f0] sm:$0xff]  ;;  %v931_v43 = vld [vmem:[%s10653_s7 + $0x438] sm:$0xff] }
 0x2fa   :  { %2545 = vmatpush1.bf16.msra.mxu0 %v6350_v61  ;;  %v6406_v61 = vcombine.low %v878_v47, %v882_v48  ;;  %v934_v47 = vld [vmem:[%s10653_s7 + $0x450] sm:$0xff] }
 0x2fb   :  { %2627 = vmatpush1.bf16.msra.mxu1 %v6352_v62  ;;  %2546 = vmatprep.subr.bf16.mxu0 %v6359_v1  ;;  %v6408_v62 = vcombine.low %v879_v49, %v883_v13  ;;  %v6415_v1 = vcombine.high %v886_v54, %v890_v56  ;;  %v938_v48 = vld [vmem:[%s10653_s7 + $0x470] sm:$0xff]  ;;  %v6457_v49 = vcombine.high %v927_v41, %v931_v43  ;;  %v939_v13 = vld [vmem:[%s10653_s7 + $0x478] sm:$0xff] }
 0x2fc   :  { %2628 = vmatprep.subr.bf16.mxu1 %v6361_v4  ;;  %v898_v4 = vld [vmem:[%s10653_s7 + $0x330] sm:$0xff] }
 0x2fe   :  { %2547 = vmatpush1.bf16.msra.mxu0 %v6358_v9  ;;  %v6414_v9 = vcombine.low %v886_v54, %v890_v56  ;;  %v6456_v54 = vcombine.low %v927_v41, %v931_v43  ;;  %v943_v56 = vld [vmem:[%s10653_s7 + $0x498] sm:$0xff]  ;;  %v990_v43 = vld [vmem:[%s10653_s7 + $0x610] sm:$0xff] }
 0x2ff   :  { %2629 = vmatpush1.bf16.msra.mxu1 %v6360_v10  ;;  %2548 = vmatprep.subr.bf16.mxu0 %v6367_v11  ;;  %v6416_v10 = vcombine.low %v887_v57, %v891_v59  ;;  %v6423_v11 = vcombine.high %v894_v2, %v898_v4  ;;  %v947_v57 = vld [vmem:[%s10653_s7 + $0x4b8] sm:$0xff] }
 0x300   :  { %2630 = vmatprep.subr.bf16.mxu1 %v6369_v17  ;;  %v6425_v17 = vcombine.high %v895_v6, %v899_v8 }
 0x302   :  { %2549 = vmatpush1.bf16.msra.mxu0 %v6366_v19  ;;  %v6422_v19 = vcombine.low %v894_v2, %v898_v4 }
 0x303   :  { %2631 = vmatpush1.bf16.msra.mxu1 %v6368_v20  ;;  %2550 = vmatprep.subr.bf16.mxu0 %v6375_v21  ;;  %v6424_v20 = vcombine.low %v895_v6, %v899_v8  ;;  %v6431_v21 = vcombine.high %v902_v12, %v906_v15  ;;  %v951_v6 = vld [vmem:[%s10653_s7 + $0x4d8] sm:$0xff] }
 0x304   :  { %2632 = vmatprep.subr.bf16.mxu1 %v6377_v31  ;;  %v6433_v31 = vcombine.high %v903_v16, %v907_v18 }
 0x306   :  { %2551 = vmatpush1.bf16.msra.mxu0 %v6374_v32  ;;  %v6430_v32 = vcombine.low %v902_v12, %v906_v15  ;;  %v963_v15 = vld [vmem:[%s10653_s7 + $0x538] sm:$0xff] }
 0x307   :  { %2633 = vmatpush1.bf16.msra.mxu1 %v6376_v22  ;;  %2552 = vmatprep.subr.bf16.mxu0 %v6383_v23  ;;  %v6432_v22 = vcombine.low %v903_v16, %v907_v18  ;;  %v6439_v23 = vcombine.high %v910_v25, %v914_v27  ;;  %v966_v18 = vld [vmem:[%s10653_s7 + $0x550] sm:$0xff] }
 0x308   :  { %2634 = vmatprep.subr.bf16.mxu1 %v6385_v29  ;;  %v6441_v29 = vcombine.high %v911_v30, %v915_v0 }
 0x30a   :  { %2553 = vmatpush1.bf16.msra.mxu0 %v6382_v35  ;;  %v6438_v35 = vcombine.low %v910_v25, %v914_v27  ;;  %v967_v25 = vld [vmem:[%s10653_s7 + $0x558] sm:$0xff] }
 0x30b   :  { %2635 = vmatpush1.bf16.msra.mxu1 %v6384_v37  ;;  %2554 = vmatprep.subr.bf16.mxu0 %v6391_v38  ;;  %v6440_v37 = vcombine.low %v911_v30, %v915_v0  ;;  %v6447_v38 = vcombine.high %v918_v24, %v922_v26  ;;  %v971_v27 = vld [vmem:[%s10653_s7 + $0x578] sm:$0xff]  ;;  %v974_v0 = vld [vmem:[%s10653_s7 + $0x590] sm:$0xff] }
 0x30c   :  { %2636 = vmatprep.subr.bf16.mxu1 %v6393_v42  ;;  %v6449_v42 = vcombine.high %v919_v28, %v923_v33 }
 0x30e   :  { %2555 = vmatpush1.bf16.msra.mxu0 %v6390_v44  ;;  %v6446_v44 = vcombine.low %v918_v24, %v922_v26  ;;  %v975_v24 = vld [vmem:[%s10653_s7 + $0x598] sm:$0xff] }
 0x30f   :  { %2637 = vmatpush1.bf16.msra.mxu1 %v6392_v45  ;;  %2556 = vmatprep.subr.bf16.mxu0 %v6399_v46  ;;  %v6448_v45 = vcombine.low %v919_v28, %v923_v33  ;;  %v6455_v46 = vcombine.high %v926_v39, %v930_v40  ;;  %v979_v26 = vld [vmem:[%s10653_s7 + $0x5b8] sm:$0xff]  ;;  %v6497_v28 = vcombine.high %v967_v25, %v971_v27  ;;  %v982_v33 = vld [vmem:[%s10653_s7 + $0x5d0] sm:$0xff] }
 0x310   :  { %2638 = vmatprep.subr.bf16.mxu1 %v6401_v50  ;;  %v935_v50 = vld [vmem:[%s10653_s7 + $0x458] sm:$0xff]  ;;  %v6505_v41 = vcombine.high %v975_v24, %v979_v26 }
 0x311   :  { %v6465_v59 = vcombine.high %v935_v50, %v939_v13  ;;  %v6464_v2 = vcombine.low %v935_v50, %v939_v13  ;;  %v998_v13 = vld [vmem:[%s10653_s7 + $0x650] sm:$0xff] }
 0x312   :  { %2557 = vmatpush1.bf16.msra.mxu0 %v6398_v51  ;;  %v6454_v51 = vcombine.low %v926_v39, %v930_v40  ;;  %v983_v39 = vld [vmem:[%s10653_s7 + $0x5d8] sm:$0xff] }
 0x313   :  { %2639 = vmatpush1.bf16.msra.mxu1 %v6400_v52  ;;  %2558 = vmatprep.subr.bf16.mxu0 %v6407_v53  ;;  %v942_v52 = vld [vmem:[%s10653_s7 + $0x490] sm:$0xff]  ;;  %v987_v40 = vld [vmem:[%s10653_s7 + $0x5f8] sm:$0xff] }
 0x314   :  { %2640 = vmatprep.subr.bf16.mxu1 %v6409_v58  ;;  %v946_v53 = vld [vmem:[%s10653_s7 + $0x4b0] sm:$0xff]  ;;  %v6463_v58 = vcombine.high %v934_v47, %v938_v48 }
 0x315   :  { %v6471_v4 = vcombine.high %v942_v52, %v946_v53  ;;  %v6470_v8 = vcombine.low %v942_v52, %v946_v53  ;;  %v1002_v53 = vld [vmem:[%s10653_s7 + $0x670] sm:$0xff] }
 0x316   :  { %2559 = vmatpush1.bf16.msra.mxu0 %v6406_v61  ;;  %v6462_v61 = vcombine.low %v934_v47, %v938_v48  ;;  %v991_v47 = vld [vmem:[%s10653_s7 + $0x618] sm:$0xff] }
 0x317   :  { %2641 = vmatpush1.bf16.msra.mxu1 %v6408_v62  ;;  %2560 = vmatprep.subr.bf16.mxu0 %v6415_v1  ;;  %v950_v62 = vld [vmem:[%s10653_s7 + $0x4d0] sm:$0xff]  ;;  %v995_v48 = vld [vmem:[%s10653_s7 + $0x638] sm:$0xff] }
 0x318   :  { %2642 = vmatprep.subr.bf16.mxu1 %v6417_v7  ;;  %v954_v1 = vld [vmem:[%s10653_s7 + $0x4f0] sm:$0xff]  ;;  %v6473_v7 = vcombine.high %v943_v56, %v947_v57 }
 0x319   :  { %v6479_v12 = vcombine.high %v950_v62, %v954_v1 }
 0x31a   :  { %2561 = vmatpush1.bf16.msra.mxu0 %v6414_v9  ;;  %v958_v9 = vld [vmem:[%s10653_s7 + $0x510] sm:$0xff] }
 0x31b   :  { %2643 = vmatpush1.bf16.msra.mxu1 %v6416_v10  ;;  %2562 = vmatprep.subr.bf16.mxu0 %v6423_v11  ;;  %v962_v10 = vld [vmem:[%s10653_s7 + $0x530] sm:$0xff]  ;;  %v6472_v11 = vcombine.low %v943_v56, %v947_v57  ;;  %v999_v56 = vld [vmem:[%s10653_s7 + $0x658] sm:$0xff] }
 0x31c   :  { %2644 = vmatprep.subr.bf16.mxu1 %v6425_v17  ;;  %v6478_v17 = vcombine.low %v950_v62, %v954_v1  ;;  %v1003_v57 = vld [vmem:[%s10653_s7 + $0x678] sm:$0xff]  ;;  %v1006_v1 = vld [vmem:[%s10653_s7 + $0x690] sm:$0xff] }
 0x31d   :  { %v6529_v62 = vcombine.high %v999_v56, %v1003_v57 }
 0x31e   :  { %2563 = vmatpush1.bf16.msra.mxu0 %v6422_v19  ;;  %v970_v19 = vld [vmem:[%s10653_s7 + $0x570] sm:$0xff] }
 0x31f   :  { %2645 = vmatpush1.bf16.msra.mxu1 %v6424_v20  ;;  %2564 = vmatprep.subr.bf16.mxu0 %v6431_v21  ;;  %v6487_v21 = vcombine.high %v958_v9, %v962_v10 }
 0x320   :  { %2646 = vmatprep.subr.bf16.mxu1 %v6433_v31  ;;  %v6486_v31 = vcombine.low %v958_v9, %v962_v10  ;;  %v1014_v10 = vld [vmem:[%s10653_s7 + $0x6d0] sm:$0xff] }
 0x322   :  { %2565 = vmatpush1.bf16.msra.mxu0 %v6430_v32  ;;  %v978_v32 = vld [vmem:[%s10653_s7 + $0x5b0] sm:$0xff] }
 0x323   :  { %2647 = vmatpush1.bf16.msra.mxu1 %v6432_v22  ;;  %2566 = vmatprep.subr.bf16.mxu0 %v6439_v23  ;;  %v6495_v23 = vcombine.high %v966_v18, %v970_v19 }
 0x324   :  { %2648 = vmatprep.subr.bf16.mxu1 %v6441_v29  ;;  %v6494_v29 = vcombine.low %v966_v18, %v970_v19  ;;  %v1022_v19 = vld [vmem:[%s10653_s7 + $0x710] sm:$0xff] }
 0x326   :  { %2567 = vmatpush1.bf16.msra.mxu0 %v6438_v35  ;;  %v986_v35 = vld [vmem:[%s10653_s7 + $0x5f0] sm:$0xff] }
 0x327   :  { %2649 = vmatpush1.bf16.msra.mxu1 %v6440_v37  ;;  %2568 = vmatprep.subr.bf16.mxu0 %v6447_v38  ;;  %v6496_v37 = vcombine.low %v967_v25, %v971_v27  ;;  %v6503_v38 = vcombine.high %v974_v0, %v978_v32  ;;  %v6510_v50 = vcombine.low %v982_v33, %v986_v35  ;;  %v1027_v25 = vld [vmem:[%s10653_s7 + $0x738] sm:$0xff] }
 0x328   :  { %2650 = vmatprep.subr.bf16.mxu1 %v6449_v42  ;;  %v6502_v42 = vcombine.low %v974_v0, %v978_v32  ;;  %v1030_v32 = vld [vmem:[%s10653_s7 + $0x750] sm:$0xff] }
 0x32a   :  { %2569 = vmatpush1.bf16.msra.mxu0 %v6446_v44  ;;  %v994_v44 = vld [vmem:[%s10653_s7 + $0x630] sm:$0xff] }
 0x32b   :  { %2651 = vmatpush1.bf16.msra.mxu1 %v6448_v45  ;;  %2579 = vmatprep.subr.bf16.mxu0 %v6455_v46  ;;  %v6504_v45 = vcombine.low %v975_v24, %v979_v26  ;;  %v6511_v46 = vcombine.high %v982_v33, %v986_v35  ;;  %v6519_v52 = vcombine.high %v990_v43, %v994_v44  ;;  %v1035_v24 = vld [vmem:[%s10653_s7 + $0x778] sm:$0xff]  ;;  %v1038_v35 = vld [vmem:[%s10653_s7 + $0x790] sm:$0xff] }
 0x32c   :  { %2661 = vmatprep.subr.bf16.mxu1 %v6457_v49  ;;  %v6513_v49 = vcombine.high %v983_v39, %v987_v40 }
 0x32d   :  { %2571 = vmatmul.mubr.bf16.vlgmr.msra.gmra.mrb[8].mxu0 %v8588_v14 }
 0x32e   :  { %2653 = vmatmul.mubr.bf16.vlgmr.msra.gmra.mrb[16].mxu1 %v8588_v14  ;;  %2580 = vmatpush1.bf16.msra.mxu0 %v6454_v51  ;;  %v955_v14 = vld [vmem:[%s10653_s7 + $0x4f8] sm:$0xff]  ;;  %v6512_v51 = vcombine.low %v983_v39, %v987_v40 }
 0x32f   :  { %2611 = vmatprep.mubr.bf16.mxu0 %v8802_v34  ;;  %2662 = vmatpush1.bf16.msra.mxu1 %v6456_v54  ;;  %v6481_v16 = vcombine.high %v951_v6, %v955_v14  ;;  %v6480_v20 = vcombine.low %v951_v6, %v955_v14  ;;  %v6521_v54 = vcombine.high %v991_v47, %v995_v48  ;;  %v1011_v6 = vld [vmem:[%s10653_s7 + $0x6b8] sm:$0xff] }
 0x330   :  { %2693 = vmatprep.mubr.bf16.mxu1 %v8802_v34  ;;  %2581 = vmatprep.subr.bf16.mxu0 %v6463_v58  ;;  %v959_v34 = vld [vmem:[%s10653_s7 + $0x518] sm:$0xff]  ;;  %v6518_v58 = vcombine.low %v990_v43, %v994_v44  ;;  %v6526_v14 = vcombine.low %v998_v13, %v1002_v53  ;;  %v1046_v44 = vld [vmem:[%s10653_s7 + $0x7d0] sm:$0xff] }
 0x331   :  { %2663 = vmatprep.subr.bf16.mxu1 %v6465_v59  ;;  %v6489_v30 = vcombine.high %v959_v34, %v963_v15  ;;  %v6488_v22 = vcombine.low %v959_v34, %v963_v15  ;;  %v6520_v59 = vcombine.low %v991_v47, %v995_v48  ;;  %v1019_v34 = vld [vmem:[%s10653_s7 + $0x6f8] sm:$0xff] }
 0x332   :  { %2582 = vmatpush1.bf16.msra.mxu0 %v6462_v61  ;;  %v6527_v61 = vcombine.high %v998_v13, %v1002_v53  ;;  %v1043_v39 = vld [vmem:[%s10653_s7 + $0x7b8] sm:$0xff] }
 0x333   :  { %2664 = vmatpush1.bf16.msra.mxu1 %v6464_v2  ;;  %2583 = vmatprep.subr.bf16.mxu0 %v6471_v4  ;;  %v1010_v2 = vld [vmem:[%s10653_s7 + $0x6b0] sm:$0xff]  ;;  %v1007_v4 = vld [vmem:[%s10653_s7 + $0x698] sm:$0xff] }
 0x334   :  { %2665 = vmatprep.subr.bf16.mxu1 %v6473_v7  ;;  %v6528_v7 = vcombine.low %v999_v56, %v1003_v57  ;;  %v6537_v9 = vcombine.high %v1007_v4, %v1011_v6  ;;  %v6534_v15 = vcombine.low %v1006_v1, %v1010_v2  ;;  %v1051_v47 = vld [vmem:[%s10653_s7 + $0x7f8] sm:$0xff]  ;;  %v7345_v56 = vld [vmem:[%s10656_s9 + $0xc] ss:$28 sps:$4 sm:$0xff]  }
 0x335   :  { %v7343_v57 = vld [vmem:[%s10656_s9 + $0x8] ss:$28 sps:$4 sm:$0xff]  }
 0x336   :  { %2584 = vmatpush1.bf16.msra.mxu0 %v6470_v8  ;;  %v6535_v8 = vcombine.high %v1006_v1, %v1010_v2  ;;  %v7354_v1 = vld [vmem:[%s10656_s9 + $0x74] ss:$28 sps:$4 sm:$0xff]  }
 0x337   :  { %2666 = vmatpush1.bf16.msra.mxu1 %v6472_v11  ;;  %2585 = vmatprep.subr.bf16.mxu0 %v6479_v12  ;;  %v1018_v11 = vld [vmem:[%s10653_s7 + $0x6f0] sm:$0xff]  ;;  %v1015_v12 = vld [vmem:[%s10653_s7 + $0x6d8] sm:$0xff] }
 0x338   :  { %2667 = vmatprep.subr.bf16.mxu1 %v6481_v16  ;;  %v6536_v16 = vcombine.low %v1007_v4, %v1011_v6  ;;  %v6545_v18 = vcombine.high %v1015_v12, %v1019_v34  ;;  %v6542_v27 = vcombine.low %v1014_v10, %v1018_v11  ;;  %v7352_v2 = vld [vmem:[%s10656_s9 + $0x70] ss:$28 sps:$4 sm:$0xff]   ;;  %v7357_v4 = vld [vmem:[%s10656_s9 + $0x7c] ss:$28 sps:$4 sm:$0xff]  }
 0x339   :  { %v7355_v6 = vld [vmem:[%s10656_s9 + $0x78] ss:$28 sps:$4 sm:$0xff]  }
 0x33a   :  { %2586 = vmatpush1.bf16.msra.mxu0 %v6478_v17  ;;  %v6543_v17 = vcombine.high %v1014_v10, %v1018_v11  ;;  %v7364_v10 = vld [vmem:[%s10656_s9 + $0xe0] ss:$28 sps:$4 sm:$0xff]   ;;  %v7369_v11 = vld [vmem:[%s10656_s9 + $0xec] ss:$28 sps:$4 sm:$0xff]  }
 0x33b   :  { %2668 = vmatpush1.bf16.msra.mxu1 %v6480_v20  ;;  %2587 = vmatprep.subr.bf16.mxu0 %v6487_v21  ;;  %v1026_v20 = vld [vmem:[%s10653_s7 + $0x730] sm:$0xff]  ;;  %v1023_v21 = vld [vmem:[%s10653_s7 + $0x718] sm:$0xff] }
 0x33c   :  { %2669 = vmatprep.subr.bf16.mxu1 %v6489_v30  ;;  %v6544_v30 = vcombine.low %v1015_v12, %v1019_v34  ;;  %v6553_v0 = vcombine.high %v1023_v21, %v1027_v25  ;;  %v6550_v26 = vcombine.low %v1022_v19, %v1026_v20  ;;  %v7367_v12 = vld [vmem:[%s10656_s9 + $0xe8] ss:$28 sps:$4 sm:$0xff]   ;;  %v7372_v34 = vld [vmem:[%s10656_s9 + $0x11c] ss:$28 sps:$4 sm:$0xff]  }
 0x33e   :  { %2588 = vmatpush1.bf16.msra.mxu0 %v6486_v31  ;;  %v6551_v31 = vcombine.high %v1022_v19, %v1026_v20  ;;  %v7376_v19 = vld [vmem:[%s10656_s9 + $0x150] ss:$28 sps:$4 sm:$0xff]   ;;  %v7381_v20 = vld [vmem:[%s10656_s9 + $0x15c] ss:$28 sps:$4 sm:$0xff]  }
 0x33f   :  { %2670 = vmatpush1.bf16.msra.mxu1 %v6488_v22  ;;  %2589 = vmatprep.subr.bf16.mxu0 %v6495_v23  ;;  %v1034_v22 = vld [vmem:[%s10653_s7 + $0x770] sm:$0xff]  ;;  %v1031_v23 = vld [vmem:[%s10653_s7 + $0x758] sm:$0xff] }
 0x340   :  { %2671 = vmatprep.subr.bf16.mxu1 %v6497_v28  ;;  %v6552_v28 = vcombine.low %v1023_v21, %v1027_v25  ;;  %v6561_v33 = vcombine.high %v1031_v23, %v1035_v24  ;;  %v6558_v40 = vcombine.low %v1030_v32, %v1034_v22  ;;  %v7379_v21 = vld [vmem:[%s10656_s9 + $0x158] ss:$28 sps:$4 sm:$0xff]   ;;  %v7384_v25 = vld [vmem:[%s10656_s9 + $0x18c] ss:$28 sps:$4 sm:$0xff]  }
 0x342   :  { %2590 = vmatpush1.bf16.msra.mxu0 %v6494_v29  ;;  %v6559_v29 = vcombine.high %v1030_v32, %v1034_v22  ;;  %v7388_v32 = vld [vmem:[%s10656_s9 + $0x1c0] ss:$28 sps:$4 sm:$0xff]   ;;  %v7393_v22 = vld [vmem:[%s10656_s9 + $0x1cc] ss:$28 sps:$4 sm:$0xff]  }
 0x343   :  { %2672 = vmatpush1.bf16.msra.mxu1 %v6496_v37  ;;  %2591 = vmatprep.subr.bf16.mxu0 %v6503_v38  ;;  %v1042_v37 = vld [vmem:[%s10653_s7 + $0x7b0] sm:$0xff]  ;;  %v1039_v38 = vld [vmem:[%s10653_s7 + $0x798] sm:$0xff] }
 0x344   :  { %2673 = vmatprep.subr.bf16.mxu1 %v6505_v41  ;;  %v6560_v41 = vcombine.low %v1031_v23, %v1035_v24  ;;  %v6569_v43 = vcombine.high %v1039_v38, %v1043_v39  ;;  %v6566_v48 = vcombine.low %v1038_v35, %v1042_v37  ;;  %v7391_v23 = vld [vmem:[%s10656_s9 + $0x1c8] ss:$28 sps:$4 sm:$0xff]   ;;  %v7396_v24 = vld [vmem:[%s10656_s9 + $0x1fc] ss:$28 sps:$4 sm:$0xff]  }
 0x346   :  { %2592 = vmatpush1.bf16.msra.mxu0 %v6502_v42  ;;  %v6567_v42 = vcombine.high %v1038_v35, %v1042_v37  ;;  %v7400_v35 = vld [vmem:[%s10656_s9 + $0x230] ss:$28 sps:$4 sm:$0xff]   ;;  %v7405_v37 = vld [vmem:[%s10656_s9 + $0x23c] ss:$28 sps:$4 sm:$0xff]  }
 0x347   :  { %2674 = vmatpush1.bf16.msra.mxu1 %v6504_v45  ;;  %2593 = vmatprep.subr.bf16.mxu0 %v6511_v46  ;;  %v1050_v45 = vld [vmem:[%s10653_s7 + $0x7f0] sm:$0xff]  ;;  %v1047_v46 = vld [vmem:[%s10653_s7 + $0x7d8] sm:$0xff] }
 0x348   :  { %2675 = vmatprep.subr.bf16.mxu1 %v6513_v49  ;;  %v6568_v49 = vcombine.low %v1039_v38, %v1043_v39  ;;  %v6577_v13 = vcombine.high %v1047_v46, %v1051_v47  ;;  %v6576_v53 = vcombine.low %v1047_v46, %v1051_v47  ;;  %v7403_v38 = vld [vmem:[%s10656_s9 + $0x238] ss:$28 sps:$4 sm:$0xff]   ;;  %v7408_v39 = vld [vmem:[%s10656_s9 + $0x26c] ss:$28 sps:$4 sm:$0xff]  }
 0x349   :  { %v7415_v46 = vld [vmem:[%s10656_s9 + $0x2a8] ss:$28 sps:$4 sm:$0xff]   ;;  %v7420_v47 = vld [vmem:[%s10656_s9 + $0x2dc] ss:$28 sps:$4 sm:$0xff]  }
 0x34a   :  { %2594 = vmatpush1.bf16.msra.mxu0 %v6510_v50  ;;  %v6575_v50 = vcombine.high %v1046_v44, %v1050_v45 }
 0x34b   :  { %2676 = vmatpush1.bf16.msra.mxu1 %v6512_v51  ;;  %2595 = vmatprep.subr.bf16.mxu0 %v6519_v52  ;;  %v7342_v51 = vld [vmem:[%s10656_s9 + $0x4] ss:$28 sps:$4 sm:$0xff]   ;;  %v6574_v52 = vcombine.low %v1046_v44, %v1050_v45  ;;  %v7417_v45 = vld [vmem:[%s10656_s9 + $0x2ac] ss:$28 sps:$4 sm:$0xff]  }
 0x34c   :  { %2677 = vmatprep.subr.bf16.mxu1 %v6521_v54  ;;  %v7340_v54 = vld [vmem:[%s10656_s9] ss:$28 sps:$4 sm:$0xff]  }
 0x34d   :  { %v7412_v44 = vld [vmem:[%s10656_s9 + $0x2a0] ss:$28 sps:$4 sm:$0xff]  }
 0x34e   :  { %2596 = vmatpush1.bf16.msra.mxu0 %v6518_v58  ;;  %v7348_v58 = vld [vmem:[%s10656_s9 + $0x3c] ss:$28 sps:$4 sm:$0xff]  }
 0x34f   :  { %2678 = vmatpush1.bf16.msra.mxu1 %v6520_v59  ;;  %2597 = vmatprep.subr.bf16.mxu0 %v6527_v61  ;;  %v7346_v59 = vld [vmem:[%s10656_s9 + $0x38] ss:$28 sps:$4 sm:$0xff]   ;;  %v7351_v61 = vld [vmem:[%s10656_s9 + $0x44] ss:$28 sps:$4 sm:$0xff]  }
 0x350   :  { %2679 = vmatprep.subr.bf16.mxu1 %v6529_v62  ;;  %v7349_v62 = vld [vmem:[%s10656_s9 + $0x40] ss:$28 sps:$4 sm:$0xff]  }
 0x352   :  { %2598 = vmatpush1.bf16.msra.mxu0 %v6526_v14  ;;  %v7358_v14 = vld [vmem:[%s10656_s9 + $0xa8] ss:$28 sps:$4 sm:$0xff]  }
 0x353   :  { %2680 = vmatpush1.bf16.msra.mxu1 %v6528_v7  ;;  %2599 = vmatprep.subr.bf16.mxu0 %v6535_v8  ;;  %v7363_v7 = vld [vmem:[%s10656_s9 + $0xb4] ss:$28 sps:$4 sm:$0xff]  }
 0x354   :  { %2681 = vmatprep.subr.bf16.mxu1 %v6537_v9  ;;  %v7361_v8 = vld [vmem:[%s10656_s9 + $0xb0] ss:$28 sps:$4 sm:$0xff]   ;;  %v7366_v9 = vld [vmem:[%s10656_s9 + $0xe4] ss:$28 sps:$4 sm:$0xff]  }
 0x356   :  { %2600 = vmatpush1.bf16.msra.mxu0 %v6534_v15  ;;  %v7370_v15 = vld [vmem:[%s10656_s9 + $0x118] ss:$28 sps:$4 sm:$0xff]  }
 0x357   :  { %2682 = vmatpush1.bf16.msra.mxu1 %v6536_v16  ;;  %2601 = vmatprep.subr.bf16.mxu0 %v6543_v17  ;;  %v7375_v16 = vld [vmem:[%s10656_s9 + $0x124] ss:$28 sps:$4 sm:$0xff]  }
 0x358   :  { %2683 = vmatprep.subr.bf16.mxu1 %v6545_v18  ;;  %v7373_v17 = vld [vmem:[%s10656_s9 + $0x120] ss:$28 sps:$4 sm:$0xff]   ;;  %v7378_v18 = vld [vmem:[%s10656_s9 + $0x154] ss:$28 sps:$4 sm:$0xff]  }
 0x35a   :  { %2602 = vmatpush1.bf16.msra.mxu0 %v6542_v27  ;;  %v7387_v27 = vld [vmem:[%s10656_s9 + $0x194] ss:$28 sps:$4 sm:$0xff]  }
 0x35b   :  { %2684 = vmatpush1.bf16.msra.mxu1 %v6544_v30  ;;  %2603 = vmatprep.subr.bf16.mxu0 %v6551_v31  ;;  %v7382_v30 = vld [vmem:[%s10656_s9 + $0x188] ss:$28 sps:$4 sm:$0xff]   ;;  %v7385_v31 = vld [vmem:[%s10656_s9 + $0x190] ss:$28 sps:$4 sm:$0xff]  }
 0x35c   :  { %2685 = vmatprep.subr.bf16.mxu1 %v6553_v0  ;;  %v7390_v0 = vld [vmem:[%s10656_s9 + $0x1c4] ss:$28 sps:$4 sm:$0xff]  }
 0x35e   :  { %2604 = vmatpush1.bf16.msra.mxu0 %v6550_v26  ;;  %v7394_v26 = vld [vmem:[%s10656_s9 + $0x1f8] ss:$28 sps:$4 sm:$0xff]  }
 0x35f   :  { %2686 = vmatpush1.bf16.msra.mxu1 %v6552_v28  ;;  %2605 = vmatprep.subr.bf16.mxu0 %v6559_v29  ;;  %v7399_v28 = vld [vmem:[%s10656_s9 + $0x204] ss:$28 sps:$4 sm:$0xff]  }
 0x360   :  { %2687 = vmatprep.subr.bf16.mxu1 %v6561_v33  ;;  %v7397_v29 = vld [vmem:[%s10656_s9 + $0x200] ss:$28 sps:$4 sm:$0xff]   ;;  %v7402_v33 = vld [vmem:[%s10656_s9 + $0x234] ss:$28 sps:$4 sm:$0xff]  }
 0x362   :  { %2606 = vmatpush1.bf16.msra.mxu0 %v6558_v40  ;;  %v7406_v40 = vld [vmem:[%s10656_s9 + $0x268] ss:$28 sps:$4 sm:$0xff]  }
 0x363   :  { %2688 = vmatpush1.bf16.msra.mxu1 %v6560_v41  ;;  %2607 = vmatprep.subr.bf16.mxu0 %v6567_v42  ;;  %v7411_v41 = vld [vmem:[%s10656_s9 + $0x274] ss:$28 sps:$4 sm:$0xff]  }
 0x364   :  { %2689 = vmatprep.subr.bf16.mxu1 %v6569_v43  ;;  %v7409_v42 = vld [vmem:[%s10656_s9 + $0x270] ss:$28 sps:$4 sm:$0xff]   ;;  %v7414_v43 = vld [vmem:[%s10656_s9 + $0x2a4] ss:$28 sps:$4 sm:$0xff]  }
 0x366   :  { %2608 = vmatpush1.bf16.msra.mxu0 %v6566_v48  ;;  %v7418_v48 = vld [vmem:[%s10656_s9 + $0x2d8] ss:$28 sps:$4 sm:$0xff]  }
 0x367   :  { %2690 = vmatpush1.bf16.msra.mxu1 %v6568_v49  ;;  %2609 = vmatprep.subr.bf16.mxu0 %v6575_v50  ;;  %v7423_v49 = vld [vmem:[%s10656_s9 + $0x2e4] ss:$28 sps:$4 sm:$0xff]  }
 0x368   :  { %2691 = vmatprep.subr.bf16.mxu1 %v6577_v13  ;;  %v7421_v50 = vld [vmem:[%s10656_s9 + $0x2e0] ss:$28 sps:$4 sm:$0xff]   ;;  %v7426_v13 = vld [vmem:[%s10656_s9 + $0x314] ss:$28 sps:$4 sm:$0xff]  }
 0x36a   :  { %2610 = vmatpush1.bf16.msra.mxu0 %v6574_v52  ;;  %v7429_v52 = vld [vmem:[%s10656_s9 + $0x31c] ss:$28 sps:$4 sm:$0xff]  }
 0x36b   :  { %2692 = vmatpush1.bf16.msra.mxu1 %v6576_v53  ;;  %5563 = vmatprep.subr.bf16.mxu0 %v7342_v51  ;;  %v7424_v51 = vld [vmem:[%s10656_s9 + $0x310] ss:$28 sps:$4 sm:$0xff]   ;;  %v7427_v53 = vld [vmem:[%s10656_s9 + $0x318] ss:$28 sps:$4 sm:$0xff]  }
 0x36c   :  { %5727 = vmatprep.subr.bf16.mxu1 %v7345_v56  ;;  %v7430_v56 = vld [vmem:[%s10656_s9 + $0x348] ss:$28 sps:$4 sm:$0xff]  }
 0x36d   :  { %2612 = vmatmul.mubr.bf16.vlgmr.msra.gmra.mrb[8].mxu0 %v8804_v36 }
 0x36e   :  { %2694 = vmatmul.mubr.bf16.vlgmr.msra.gmra.mrb[16].mxu1 %v8804_v36  ;;  %5564 = vmatpush1.bf16.msra.mxu0 %v7340_v54  ;;  %v7360_v36 = vld [vmem:[%s10656_s9 + $0xac] ss:$28 sps:$4 sm:$0xff]  }
 0x36f   :  { %5728 = vmatpush1.bf16.msra.mxu1 %v7343_v57  ;;  %5565 = vmatprep.subr.bf16.mxu0 %v7348_v58  ;;  %v7432_v54 = vld [vmem:[%s10656_s9 + $0x34c] ss:$28 sps:$4 sm:$0xff]   ;;  %v7435_v57 = vld [vmem:[%s10656_s9 + $0x354] ss:$28 sps:$4 sm:$0xff]  }
 0x370   :  { %5729 = vmatprep.subr.bf16.mxu1 %v7351_v61  ;;  %v7433_v58 = vld [vmem:[%s10656_s9 + $0x350] ss:$28 sps:$4 sm:$0xff]  }
 0x371   :  { %v7441_v61 = vld [vmem:[%s10656_s9 + $0x38c] ss:$28 sps:$4 sm:$0xff]  }
 0x372   :  { %5566 = vmatpush1.bf16.msra.mxu0 %v7346_v59  ;;  %v7438_v59 = vld [vmem:[%s10656_s9 + $0x384] ss:$28 sps:$4 sm:$0xff]  }
 0x373   :  { %5730 = vmatpush1.bf16.msra.mxu1 %v7349_v62  ;;  %5567 = vmatprep.subr.bf16.mxu0 %v7354_v1  ;;  %v9379_v62 = vld [vmem:[%s10657_s8] sm:$0xff] }
 0x374   :  { %5731 = vmatprep.subr.bf16.mxu1 %v7357_v4  ;;  %v1057_v1 = vrot.slane %v9379_v62, %v8322_v60  ;;  %v1069_v4 = vrot.slane %v9379_v62, %v8763_v5 }
 0x376   :  { %5568 = vmatpush1.bf16.msra.mxu0 %v7352_v2  ;;  %v1061_v2 = vrot.slane %v9379_v62, %v8328_v63 }
 0x377   :  { %5732 = vmatpush1.bf16.msra.mxu1 %v7355_v6  ;;  %5569 = vmatprep.subr.bf16.mxu0 %v7360_v36 }
 0x378   :  { %5733 = vmatprep.subr.bf16.mxu1 %v7363_v7 }
 0x37a   :  { %5570 = vmatpush1.bf16.msra.mxu0 %v7358_v14 }
 0x37b   :  { %5734 = vmatpush1.bf16.msra.mxu1 %v7361_v8  ;;  %5571 = vmatprep.subr.bf16.mxu0 %v7366_v9 }
 0x37c   :  { %5735 = vmatprep.subr.bf16.mxu1 %v7369_v11 }
 0x37e   :  { %5572 = vmatpush1.bf16.msra.mxu0 %v7364_v10 }
 0x37f   :  { %5736 = vmatpush1.bf16.msra.mxu1 %v7367_v12  ;;  %5573 = vmatprep.subr.bf16.mxu0 %v7372_v34 }
 0x380   :  { %5737 = vmatprep.subr.bf16.mxu1 %v7375_v16  ;;  %v7436_v16 = vld [vmem:[%s10656_s9 + $0x380] ss:$28 sps:$4 sm:$0xff]  }
 0x382   :  { %5574 = vmatpush1.bf16.msra.mxu0 %v7370_v15 }
 0x383   :  { %5738 = vmatpush1.bf16.msra.mxu1 %v7373_v17  ;;  %5575 = vmatprep.subr.bf16.mxu0 %v7378_v18  ;;  %v7439_v17 = vld [vmem:[%s10656_s9 + $0x388] ss:$28 sps:$4 sm:$0xff]  }
 0x384   :  { %5739 = vmatprep.subr.bf16.mxu1 %v7381_v20  ;;  %v7442_v20 = vld [vmem:[%s10656_s9 + $0x3b8] ss:$28 sps:$4 sm:$0xff]  }
 0x386   :  { %5576 = vmatpush1.bf16.msra.mxu0 %v7376_v19 }
 0x387   :  { %5740 = vmatpush1.bf16.msra.mxu1 %v7379_v21  ;;  %5577 = vmatprep.subr.bf16.mxu0 %v7384_v25  ;;  %v7444_v21 = vld [vmem:[%s10656_s9 + $0x3bc] ss:$28 sps:$4 sm:$0xff]   ;;  %v7447_v25 = vld [vmem:[%s10656_s9 + $0x3c4] ss:$28 sps:$4 sm:$0xff]  }
 0x388   :  { %5741 = vmatprep.subr.bf16.mxu1 %v7387_v27 }
 0x38a   :  { %5578 = vmatpush1.bf16.msra.mxu0 %v7382_v30  ;;  %v7445_v30 = vld [vmem:[%s10656_s9 + $0x3c0] ss:$28 sps:$4 sm:$0xff]  }
 0x38b   :  { %5742 = vmatpush1.bf16.msra.mxu1 %v7385_v31  ;;  %5579 = vmatprep.subr.bf16.mxu0 %v7390_v0  ;;  %v7450_v31 = vld [vmem:[%s10656_s9 + $0x3f4] ss:$28 sps:$4 sm:$0xff]   ;;  %v7453_v0 = vld [vmem:[%s10656_s9 + $0x3fc] ss:$28 sps:$4 sm:$0xff]  }
 0x38c   :  { %5743 = vmatprep.subr.bf16.mxu1 %v7393_v22  ;;  %v7451_v22 = vld [vmem:[%s10656_s9 + $0x3f8] ss:$28 sps:$4 sm:$0xff]  }
 0x38e   :  { %5580 = vmatpush1.bf16.msra.mxu0 %v7388_v32  ;;  %v7448_v32 = vld [vmem:[%s10656_s9 + $0x3f0] ss:$28 sps:$4 sm:$0xff]  }
 0x38f   :  { %5744 = vmatpush1.bf16.msra.mxu1 %v7391_v23  ;;  %5581 = vmatprep.subr.bf16.mxu0 %v7396_v24  ;;  %v7456_v23 = vld [vmem:[%s10656_s9 + $0x42c] ss:$28 sps:$4 sm:$0xff]   ;;  %v7459_v24 = vld [vmem:[%s10656_s9 + $0x434] ss:$28 sps:$4 sm:$0xff]  }
 0x390   :  { %5745 = vmatprep.subr.bf16.mxu1 %v7399_v28  ;;  %v7457_v28 = vld [vmem:[%s10656_s9 + $0x430] ss:$28 sps:$4 sm:$0xff]  }
 0x392   :  { %5582 = vmatpush1.bf16.msra.mxu0 %v7394_v26  ;;  %v7454_v26 = vld [vmem:[%s10656_s9 + $0x428] ss:$28 sps:$4 sm:$0xff]  }
 0x393   :  { %5746 = vmatpush1.bf16.msra.mxu1 %v7397_v29  ;;  %5583 = vmatprep.subr.bf16.mxu0 %v7402_v33  ;;  %v7462_v29 = vld [vmem:[%s10656_s9 + $0x464] ss:$28 sps:$4 sm:$0xff]   ;;  %v7465_v33 = vld [vmem:[%s10656_s9 + $0x46c] ss:$28 sps:$4 sm:$0xff]  }
 0x394   :  { %5747 = vmatprep.subr.bf16.mxu1 %v7405_v37  ;;  %v7463_v37 = vld [vmem:[%s10656_s9 + $0x468] ss:$28 sps:$4 sm:$0xff]  }
 0x396   :  { %5584 = vmatpush1.bf16.msra.mxu0 %v7400_v35  ;;  %v7460_v35 = vld [vmem:[%s10656_s9 + $0x460] ss:$28 sps:$4 sm:$0xff]  }
 0x397   :  { %5748 = vmatpush1.bf16.msra.mxu1 %v7403_v38  ;;  %5585 = vmatprep.subr.bf16.mxu0 %v7408_v39  ;;  %v7468_v38 = vld [vmem:[%s10656_s9 + $0x49c] ss:$28 sps:$4 sm:$0xff]   ;;  %v7471_v39 = vld [vmem:[%s10656_s9 + $0x4a4] ss:$28 sps:$4 sm:$0xff]  }
 0x398   :  { %5749 = vmatprep.subr.bf16.mxu1 %v7411_v41  ;;  %v7469_v41 = vld [vmem:[%s10656_s9 + $0x4a0] ss:$28 sps:$4 sm:$0xff]  }
 0x39a   :  { %5586 = vmatpush1.bf16.msra.mxu0 %v7406_v40  ;;  %v7466_v40 = vld [vmem:[%s10656_s9 + $0x498] ss:$28 sps:$4 sm:$0xff]  }
 0x39b   :  { %5750 = vmatpush1.bf16.msra.mxu1 %v7409_v42  ;;  %5587 = vmatprep.subr.bf16.mxu0 %v7414_v43  ;;  %v7474_v42 = vld [vmem:[%s10656_s9 + $0x4d4] ss:$28 sps:$4 sm:$0xff]   ;;  %v7477_v43 = vld [vmem:[%s10656_s9 + $0x4dc] ss:$28 sps:$4 sm:$0xff]  }
 0x39c   :  { %5751 = vmatprep.subr.bf16.mxu1 %v7417_v45  ;;  %v7475_v45 = vld [vmem:[%s10656_s9 + $0x4d8] ss:$28 sps:$4 sm:$0xff]  }
 0x39e   :  { %5588 = vmatpush1.bf16.msra.mxu0 %v7412_v44  ;;  %v7472_v44 = vld [vmem:[%s10656_s9 + $0x4d0] ss:$28 sps:$4 sm:$0xff]  }
 0x39f   :  { %5752 = vmatpush1.bf16.msra.mxu1 %v7415_v46  ;;  %5589 = vmatprep.subr.bf16.mxu0 %v7420_v47  ;;  %v7480_v46 = vld [vmem:[%s10656_s9 + $0x50c] ss:$28 sps:$4 sm:$0xff]   ;;  %v7483_v47 = vld [vmem:[%s10656_s9 + $0x514] ss:$28 sps:$4 sm:$0xff]  }
 0x3a0   :  { %5753 = vmatprep.subr.bf16.mxu1 %v7423_v49  ;;  %v7481_v49 = vld [vmem:[%s10656_s9 + $0x510] ss:$28 sps:$4 sm:$0xff]  }
 0x3a2   :  { %5590 = vmatpush1.bf16.msra.mxu0 %v7418_v48  ;;  %v7478_v48 = vld [vmem:[%s10656_s9 + $0x508] ss:$28 sps:$4 sm:$0xff]  }
 0x3a3   :  { %5754 = vmatpush1.bf16.msra.mxu1 %v7421_v50  ;;  %5591 = vmatprep.subr.bf16.mxu0 %v7426_v13  ;;  %v7486_v50 = vld [vmem:[%s10656_s9 + $0x544] ss:$28 sps:$4 sm:$0xff]   ;;  %v7489_v13 = vld [vmem:[%s10656_s9 + $0x54c] ss:$28 sps:$4 sm:$0xff]  }
 0x3a4   :  { %5755 = vmatprep.subr.bf16.mxu1 %v7429_v52  ;;  %v7487_v52 = vld [vmem:[%s10656_s9 + $0x548] ss:$28 sps:$4 sm:$0xff]  }
 0x3a6   :  { %5592 = vmatpush1.bf16.msra.mxu0 %v7424_v51  ;;  %v7484_v51 = vld [vmem:[%s10656_s9 + $0x540] ss:$28 sps:$4 sm:$0xff]  }
 0x3a7   :  { %5756 = vmatpush1.bf16.msra.mxu1 %v7427_v53  ;;  %5593 = vmatprep.subr.bf16.mxu0 %v7432_v54  ;;  %v7492_v53 = vld [vmem:[%s10656_s9 + $0x57c] ss:$28 sps:$4 sm:$0xff]   ;;  %v7495_v54 = vld [vmem:[%s10656_s9 + $0x584] ss:$28 sps:$4 sm:$0xff]  }
 0x3a8   :  { %5757 = vmatprep.subr.bf16.mxu1 %v7435_v57  ;;  %v7493_v57 = vld [vmem:[%s10656_s9 + $0x580] ss:$28 sps:$4 sm:$0xff]  }
 0x3aa   :  { %5594 = vmatpush1.bf16.msra.mxu0 %v7430_v56  ;;  %v7490_v56 = vld [vmem:[%s10656_s9 + $0x578] ss:$28 sps:$4 sm:$0xff]  }
 0x3ab   :  { %5758 = vmatpush1.bf16.msra.mxu1 %v7433_v58  ;;  %5604 = vmatprep.subr.bf16.mxu0 %v7438_v59  ;;  %v7498_v58 = vld [vmem:[%s10656_s9 + $0x5b4] ss:$28 sps:$4 sm:$0xff]   ;;  %v7501_v59 = vld [vmem:[%s10656_s9 + $0x5bc] ss:$28 sps:$4 sm:$0xff]  }
 0x3ac   :  { %5768 = vmatprep.subr.bf16.mxu1 %v7441_v61  ;;  %v7496_v61 = vld [vmem:[%s10656_s9 + $0x5b0] ss:$28 sps:$4 sm:$0xff]  }
 0x3c0   :  { %v2449_v6 = vpop.f32.mrb[4].mxu0  ;;  %v9387_v36 = vpop.f32.mrb[12].mxu1 }
 0x3c1   :  { %v7143_v14 = vadd.f32 %v2449_v6, %v1057_v1  ;;  %v2451_v7 = vpop.f32.mrb[5].mxu0  ;;  %v2533_v8 = vpop.f32.mrb[13].mxu1  ;;  %v7499_v1 = vld [vmem:[%s10656_s9 + $0x5b8] ss:$28 sps:$4 sm:$0xff]   ;;  %v7502_v6 = vld [vmem:[%s10656_s9 + $0x5e8] ss:$28 sps:$4 sm:$0xff]  }
 0x3c2   :  { %v7144_v9 = vadd.f32 %v2451_v7, %v1061_v2  ;;  %v2453_v10 = vpop.f32.mrb[6].mxu0  ;;  %v2535_v11 = vpop.f32.mrb[14].mxu1  ;;  %v7146_v12 = vadd.f32 %v2533_v8, %v1069_v4  ;;  %v7504_v2 = vld [vmem:[%s10656_s9 + $0x5ec] ss:$28 sps:$4 sm:$0xff]   ;;  %v7507_v4 = vld [vmem:[%s10656_s9 + $0x5f4] ss:$28 sps:$4 sm:$0xff]  }
 0x3c3   :  { %v2454_v34 = vpop.f32.mrb[7].mxu0  ;;  %v2536_v15 = vpop.f32.mrb[15].mxu1  ;;  %v9397_v19 = vpack.c.bf16 %v7143_v14, %v7143_v14  ;;  %v7505_v14 = vld [vmem:[%s10656_s9 + $0x5f0] ss:$28 sps:$4 sm:$0xff]   ;;  %v7510_v7 = vld [vmem:[%s10656_s9 + $0x624] ss:$28 sps:$4 sm:$0xff]  }
 0x3c4   :  { %v9395_v18 = vpack.c.bf16 %v7144_v9, %v7144_v9  ;;  %v9410_v27 = vpack.c.bf16 %v7146_v12, %v7146_v12  ;;  %v7513_v8 = vld [vmem:[%s10656_s9 + $0x62c] ss:$28 sps:$4 sm:$0xff]   ;;  %v7508_v9 = vld [vmem:[%s10656_s9 + $0x620] ss:$28 sps:$4 sm:$0xff]   ;;  %v7514_v34 = vld [vmem:[%s10656_s9 + $0x658] ss:$28 sps:$4 sm:$0xff]  }
 0x3c5   :  { %v7511_v10 = vld [vmem:[%s10656_s9 + $0x628] ss:$28 sps:$4 sm:$0xff]   ;;  %v7516_v11 = vld [vmem:[%s10656_s9 + $0x65c] ss:$28 sps:$4 sm:$0xff]  }
 0x3c6   :  { %5595 = vmatprep.mubr.bf16.mxu0 %v9395_v18  ;;  %5759 = vmatprep.mubr.bf16.mxu1 %v9395_v18  ;;  %v7519_v12 = vld [vmem:[%s10656_s9 + $0x664] ss:$28 sps:$4 sm:$0xff]  }
 0x3c7   :  { %5596 = vmatmul.mubr.bf16.vlgmr.msra.gmra.mrb[12].mxu0 %v9397_v19  ;;  %5760 = vmatmul.mubr.bf16.vlgmr.msra.gmra.mrb[20].mxu1 %v9397_v19  ;;  %v7517_v15 = vld [vmem:[%s10656_s9 + $0x660] ss:$28 sps:$4 sm:$0xff]  }
 0x3c8   :  { %5605 = vmatpush1.bf16.msra.mxu0 %v7436_v16  ;;  %5769 = vmatpush1.bf16.msra.mxu1 %v7439_v17  ;;  %v7522_v16 = vld [vmem:[%s10656_s9 + $0x694] ss:$28 sps:$4 sm:$0xff]   ;;  %v7525_v17 = vld [vmem:[%s10656_s9 + $0x69c] ss:$28 sps:$4 sm:$0xff]  }
 0x3c9   :  { %5636 = vmatprep.mubr.bf16.mxu0 %v9410_v27  ;;  %5800 = vmatprep.mubr.bf16.mxu1 %v9410_v27 }
 0x3ca   :  { %5606 = vmatprep.subr.bf16.mxu0 %v7444_v21  ;;  %5770 = vmatprep.subr.bf16.mxu1 %v7447_v25  ;;  %v7523_v21 = vld [vmem:[%s10656_s9 + $0x698] ss:$28 sps:$4 sm:$0xff]   ;;  %v1065_v25 = vrot.slane %v9379_v62, %v8757_v3 }
 0x3cc   :  { %5607 = vmatpush1.bf16.msra.mxu0 %v7442_v20  ;;  %5771 = vmatpush1.bf16.msra.mxu1 %v7445_v30  ;;  %v7520_v20 = vld [vmem:[%s10656_s9 + $0x690] ss:$28 sps:$4 sm:$0xff]  }
 0x3cd   :  { %5608 = vmatprep.subr.bf16.mxu0 %v7450_v31  ;;  %5772 = vmatprep.subr.bf16.mxu1 %v7453_v0  ;;  %v7528_v30 = vld [vmem:[%s10656_s9 + $0x6cc] ss:$28 sps:$4 sm:$0xff]   ;;  %v7531_v31 = vld [vmem:[%s10656_s9 + $0x6d4] ss:$28 sps:$4 sm:$0xff]  }
 0x3ce   :  { %v7526_v0 = vld [vmem:[%s10656_s9 + $0x6c8] ss:$28 sps:$4 sm:$0xff]  }
 0x3d0   :  { %5609 = vmatpush1.bf16.msra.mxu0 %v7448_v32  ;;  %5773 = vmatpush1.bf16.msra.mxu1 %v7451_v22  ;;  %v7529_v32 = vld [vmem:[%s10656_s9 + $0x6d0] ss:$28 sps:$4 sm:$0xff]   ;;  %v7145_v22 = vadd.f32 %v9387_v36, %v1065_v25  ;;  %v7535_v36 = vld [vmem:[%s10656_s9 + $0x708] ss:$28 sps:$4 sm:$0xff]  }
 0x3d1   :  { %5610 = vmatprep.subr.bf16.mxu0 %v7456_v23  ;;  %5774 = vmatprep.subr.bf16.mxu1 %v7459_v24  ;;  %v7534_v23 = vld [vmem:[%s10656_s9 + $0x704] ss:$28 sps:$4 sm:$0xff]   ;;  %v7537_v24 = vld [vmem:[%s10656_s9 + $0x70c] ss:$28 sps:$4 sm:$0xff]  }
 0x3d2   :  { %v7606_v25 = vld [vmem:[%s10656_s9 + $0x9a4] ss:$28 sps:$4 sm:$0xff]  }
 0x3d4   :  { %5611 = vmatpush1.bf16.msra.mxu0 %v7454_v26  ;;  %5775 = vmatpush1.bf16.msra.mxu1 %v7457_v28  ;;  %v7532_v26 = vld [vmem:[%s10656_s9 + $0x700] ss:$28 sps:$4 sm:$0xff]   ;;  %v9602_v28 = vpack.c.bf16 %v7145_v22, %v7145_v22 }
 0x3d5   :  { %5612 = vmatprep.subr.bf16.mxu0 %v7462_v29  ;;  %5776 = vmatprep.subr.bf16.mxu1 %v7465_v33  ;;  %v7540_v29 = vld [vmem:[%s10656_s9 + $0x73c] ss:$28 sps:$4 sm:$0xff]   ;;  %v7543_v33 = vld [vmem:[%s10656_s9 + $0x744] ss:$28 sps:$4 sm:$0xff]  }
 0x3d6   :  { %v7615_v22 = vld [vmem:[%s10656_s9 + $0x9e4] ss:$28 sps:$4 sm:$0xff]  }
 0x3d8   :  { %5613 = vmatpush1.bf16.msra.mxu0 %v7460_v35  ;;  %5777 = vmatpush1.bf16.msra.mxu1 %v7463_v37  ;;  %v7538_v35 = vld [vmem:[%s10656_s9 + $0x738] ss:$28 sps:$4 sm:$0xff]   ;;  %v7541_v37 = vld [vmem:[%s10656_s9 + $0x740] ss:$28 sps:$4 sm:$0xff]  }
 0x3d9   :  { %5614 = vmatprep.subr.bf16.mxu0 %v7468_v38  ;;  %5778 = vmatprep.subr.bf16.mxu1 %v7471_v39  ;;  %v7546_v38 = vld [vmem:[%s10656_s9 + $0x774] ss:$28 sps:$4 sm:$0xff]   ;;  %v7549_v39 = vld [vmem:[%s10656_s9 + $0x77c] ss:$28 sps:$4 sm:$0xff]  }
 0x3dc   :  { %5615 = vmatpush1.bf16.msra.mxu0 %v7466_v40  ;;  %5779 = vmatpush1.bf16.msra.mxu1 %v7469_v41  ;;  %v7544_v40 = vld [vmem:[%s10656_s9 + $0x770] ss:$28 sps:$4 sm:$0xff]   ;;  %v7547_v41 = vld [vmem:[%s10656_s9 + $0x778] ss:$28 sps:$4 sm:$0xff]  }
 0x3dd   :  { %5616 = vmatprep.subr.bf16.mxu0 %v7474_v42  ;;  %5780 = vmatprep.subr.bf16.mxu1 %v7477_v43  ;;  %v7552_v42 = vld [vmem:[%s10656_s9 + $0x7ac] ss:$28 sps:$4 sm:$0xff]   ;;  %v7555_v43 = vld [vmem:[%s10656_s9 + $0x7b4] ss:$28 sps:$4 sm:$0xff]  }
 0x3e0   :  { %5617 = vmatpush1.bf16.msra.mxu0 %v7472_v44  ;;  %5781 = vmatpush1.bf16.msra.mxu1 %v7475_v45  ;;  %v7550_v44 = vld [vmem:[%s10656_s9 + $0x7a8] ss:$28 sps:$4 sm:$0xff]   ;;  %v7553_v45 = vld [vmem:[%s10656_s9 + $0x7b0] ss:$28 sps:$4 sm:$0xff]  }
 0x3e1   :  { %5618 = vmatprep.subr.bf16.mxu0 %v7480_v46  ;;  %5782 = vmatprep.subr.bf16.mxu1 %v7483_v47  ;;  %v7558_v46 = vld [vmem:[%s10656_s9 + $0x7e4] ss:$28 sps:$4 sm:$0xff]   ;;  %v7561_v47 = vld [vmem:[%s10656_s9 + $0x7ec] ss:$28 sps:$4 sm:$0xff]  }
 0x3e4   :  { %5619 = vmatpush1.bf16.msra.mxu0 %v7478_v48  ;;  %5783 = vmatpush1.bf16.msra.mxu1 %v7481_v49  ;;  %v7556_v48 = vld [vmem:[%s10656_s9 + $0x7e0] ss:$28 sps:$4 sm:$0xff]   ;;  %v7559_v49 = vld [vmem:[%s10656_s9 + $0x7e8] ss:$28 sps:$4 sm:$0xff]  }
 0x3e5   :  { %5620 = vmatprep.subr.bf16.mxu0 %v7486_v50  ;;  %5784 = vmatprep.subr.bf16.mxu1 %v7489_v13  ;;  %v7564_v50 = vld [vmem:[%s10656_s9 + $0x81c] ss:$28 sps:$4 sm:$0xff]   ;;  %v7567_v13 = vld [vmem:[%s10656_s9 + $0x824] ss:$28 sps:$4 sm:$0xff]  }
 0x3e8   :  { %5621 = vmatpush1.bf16.msra.mxu0 %v7484_v51  ;;  %5785 = vmatpush1.bf16.msra.mxu1 %v7487_v52  ;;  %v7562_v51 = vld [vmem:[%s10656_s9 + $0x818] ss:$28 sps:$4 sm:$0xff]   ;;  %v7565_v52 = vld [vmem:[%s10656_s9 + $0x820] ss:$28 sps:$4 sm:$0xff]  }
 0x3e9   :  { %5622 = vmatprep.subr.bf16.mxu0 %v7492_v53  ;;  %5786 = vmatprep.subr.bf16.mxu1 %v7495_v54  ;;  %v7570_v53 = vld [vmem:[%s10656_s9 + $0x854] ss:$28 sps:$4 sm:$0xff]   ;;  %v7573_v54 = vld [vmem:[%s10656_s9 + $0x85c] ss:$28 sps:$4 sm:$0xff]  }
 0x3ec   :  { %5623 = vmatpush1.bf16.msra.mxu0 %v7490_v56  ;;  %5787 = vmatpush1.bf16.msra.mxu1 %v7493_v57  ;;  %v7568_v56 = vld [vmem:[%s10656_s9 + $0x850] ss:$28 sps:$4 sm:$0xff]   ;;  %v7571_v57 = vld [vmem:[%s10656_s9 + $0x858] ss:$28 sps:$4 sm:$0xff]  }
 0x3ed   :  { %5624 = vmatprep.subr.bf16.mxu0 %v7498_v58  ;;  %5788 = vmatprep.subr.bf16.mxu1 %v7501_v59  ;;  %v7576_v58 = vld [vmem:[%s10656_s9 + $0x88c] ss:$28 sps:$4 sm:$0xff]   ;;  %v7579_v59 = vld [vmem:[%s10656_s9 + $0x894] ss:$28 sps:$4 sm:$0xff]  }
 0x3f0   :  { %5625 = vmatpush1.bf16.msra.mxu0 %v7496_v61  ;;  %5789 = vmatpush1.bf16.msra.mxu1 %v7499_v1  ;;  %v7574_v61 = vld [vmem:[%s10656_s9 + $0x888] ss:$28 sps:$4 sm:$0xff]   ;;  %v7577_v1 = vld [vmem:[%s10656_s9 + $0x890] ss:$28 sps:$4 sm:$0xff]  }
 0x3f1   :  { %5626 = vmatprep.subr.bf16.mxu0 %v7504_v2  ;;  %5790 = vmatprep.subr.bf16.mxu1 %v7507_v4  ;;  %v7582_v2 = vld [vmem:[%s10656_s9 + $0x8c4] ss:$28 sps:$4 sm:$0xff]   ;;  %v7585_v4 = vld [vmem:[%s10656_s9 + $0x8cc] ss:$28 sps:$4 sm:$0xff]  }
 0x3f4   :  { %5627 = vmatpush1.bf16.msra.mxu0 %v7502_v6  ;;  %5791 = vmatpush1.bf16.msra.mxu1 %v7505_v14  ;;  %v7580_v6 = vld [vmem:[%s10656_s9 + $0x8c0] ss:$28 sps:$4 sm:$0xff]   ;;  %v7583_v14 = vld [vmem:[%s10656_s9 + $0x8c8] ss:$28 sps:$4 sm:$0xff]  }
 0x3f5   :  { %5628 = vmatprep.subr.bf16.mxu0 %v7510_v7  ;;  %5792 = vmatprep.subr.bf16.mxu1 %v7513_v8  ;;  %v7588_v7 = vld [vmem:[%s10656_s9 + $0x8fc] ss:$28 sps:$4 sm:$0xff]   ;;  %v7591_v8 = vld [vmem:[%s10656_s9 + $0x904] ss:$28 sps:$4 sm:$0xff]  }
 0x3f8   :  { %5629 = vmatpush1.bf16.msra.mxu0 %v7508_v9  ;;  %5793 = vmatpush1.bf16.msra.mxu1 %v7511_v10  ;;  %v7586_v9 = vld [vmem:[%s10656_s9 + $0x8f8] ss:$28 sps:$4 sm:$0xff]   ;;  %v7589_v10 = vld [vmem:[%s10656_s9 + $0x900] ss:$28 sps:$4 sm:$0xff]  }
 0x3f9   :  { %5630 = vmatprep.subr.bf16.mxu0 %v7516_v11  ;;  %5794 = vmatprep.subr.bf16.mxu1 %v7519_v12  ;;  %v7594_v11 = vld [vmem:[%s10656_s9 + $0x934] ss:$28 sps:$4 sm:$0xff]   ;;  %v7597_v12 = vld [vmem:[%s10656_s9 + $0x93c] ss:$28 sps:$4 sm:$0xff]  }
 0x3fc   :  { %5631 = vmatpush1.bf16.msra.mxu0 %v7514_v34  ;;  %5795 = vmatpush1.bf16.msra.mxu1 %v7517_v15  ;;  %v7592_v34 = vld [vmem:[%s10656_s9 + $0x930] ss:$28 sps:$4 sm:$0xff]   ;;  %v7595_v15 = vld [vmem:[%s10656_s9 + $0x938] ss:$28 sps:$4 sm:$0xff]  }
 0x3fd   :  { %5632 = vmatprep.subr.bf16.mxu0 %v7522_v16  ;;  %5796 = vmatprep.subr.bf16.mxu1 %v7525_v17  ;;  %v7600_v16 = vld [vmem:[%s10656_s9 + $0x96c] ss:$28 sps:$4 sm:$0xff]   ;;  %v7603_v17 = vld [vmem:[%s10656_s9 + $0x974] ss:$28 sps:$4 sm:$0xff]  }
 0x400   :  { %5633 = vmatpush1.bf16.msra.mxu0 %v7520_v20  ;;  %5797 = vmatpush1.bf16.msra.mxu1 %v7523_v21  ;;  %v7598_v20 = vld [vmem:[%s10656_s9 + $0x968] ss:$28 sps:$4 sm:$0xff]   ;;  %v7601_v21 = vld [vmem:[%s10656_s9 + $0x970] ss:$28 sps:$4 sm:$0xff]  }
 0x401   :  { %5634 = vmatprep.subr.bf16.mxu0 %v7528_v30  ;;  %5798 = vmatprep.subr.bf16.mxu1 %v7531_v31  ;;  %v7609_v30 = vld [vmem:[%s10656_s9 + $0x9ac] ss:$28 sps:$4 sm:$0xff]   ;;  %v7604_v31 = vld [vmem:[%s10656_s9 + $0x9a0] ss:$28 sps:$4 sm:$0xff]  }
 0x404   :  { %5635 = vmatpush1.bf16.msra.mxu0 %v7526_v0  ;;  %5799 = vmatpush1.bf16.msra.mxu1 %v7529_v32  ;;  %v7607_v0 = vld [vmem:[%s10656_s9 + $0x9a8] ss:$28 sps:$4 sm:$0xff]   ;;  %v7612_v32 = vld [vmem:[%s10656_s9 + $0x9dc] ss:$28 sps:$4 sm:$0xff]  }
 0x405   :  { %5645 = vmatprep.subr.bf16.mxu0 %v7534_v23  ;;  %5809 = vmatprep.subr.bf16.mxu1 %v7537_v24  ;;  %v7610_v23 = vld [vmem:[%s10656_s9 + $0x9d8] ss:$28 sps:$4 sm:$0xff]   ;;  %v7613_v24 = vld [vmem:[%s10656_s9 + $0x9e0] ss:$28 sps:$4 sm:$0xff]  }
 0x407   :  { %5637 = vmatmul.mubr.bf16.vlgmr.msra.gmra.mrb[12].mxu0 %v9602_v28  ;;  %5801 = vmatmul.mubr.bf16.vlgmr.msra.gmra.mrb[20].mxu1 %v9602_v28 }
 0x408   :  { %5646 = vmatpush1.bf16.msra.mxu0 %v7532_v26  ;;  %5810 = vmatpush1.bf16.msra.mxu1 %v7535_v36  ;;  %v7618_v26 = vld [vmem:[%s10656_s9 + $0xa14] ss:$28 sps:$4 sm:$0xff]   ;;  %v7621_v36 = vld [vmem:[%s10656_s9 + $0xa1c] ss:$28 sps:$4 sm:$0xff]  }
 0x409   :  { %5647 = vmatprep.subr.bf16.mxu0 %v7540_v29  ;;  %5811 = vmatprep.subr.bf16.mxu1 %v7543_v33  ;;  %v1072_v29 = vsub.s32 4, %v8313_v55  ;;  %v1076_v33 = vsub.s32 5, %v8313_v55 }
 0x40c   :  { %5648 = vmatpush1.bf16.msra.mxu0 %v7538_v35  ;;  %5812 = vmatpush1.bf16.msra.mxu1 %v7541_v37  ;;  %v1084_v35 = vsub.s32 7, %v8313_v55  ;;  %v7616_v37 = vld [vmem:[%s10656_s9 + $0xa10] ss:$28 sps:$4 sm:$0xff]  }
 0x40d   :  { %5649 = vmatprep.subr.bf16.mxu0 %v7546_v38  ;;  %5813 = vmatprep.subr.bf16.mxu1 %v7549_v39  ;;  %v7619_v38 = vld [vmem:[%s10656_s9 + $0xa18] ss:$28 sps:$4 sm:$0xff]   ;;  %v1073_v39 = vrot.slane %v9379_v62, %v1072_v29 }
 0x410   :  { %5650 = vmatpush1.bf16.msra.mxu0 %v7544_v40  ;;  %5814 = vmatpush1.bf16.msra.mxu1 %v7547_v41  ;;  %v7624_v40 = vld [vmem:[%s10656_s9 + $0xa4c] ss:$28 sps:$4 sm:$0xff]   ;;  %v7627_v41 = vld [vmem:[%s10656_s9 + $0xa54] ss:$28 sps:$4 sm:$0xff]  }
 0x411   :  { %5651 = vmatprep.subr.bf16.mxu0 %v7552_v42  ;;  %5815 = vmatprep.subr.bf16.mxu1 %v7555_v43  ;;  %v1077_v42 = vrot.slane %v9379_v62, %v1076_v33  ;;  %v1085_v43 = vrot.slane %v9379_v62, %v1084_v35  ;;  %v7630_v62 = vld [vmem:[%s10656_s9 + $0xa84] ss:$28 sps:$4 sm:$0xff]   ;;  %v7675_v35 = vld [vmem:[%s10656_s9 + $0xc14] ss:$28 sps:$4 sm:$0xff]  }
 0x414   :  { %5652 = vmatpush1.bf16.msra.mxu0 %v7550_v44  ;;  %5816 = vmatpush1.bf16.msra.mxu1 %v7553_v45  ;;  %v7622_v45 = vld [vmem:[%s10656_s9 + $0xa48] ss:$28 sps:$4 sm:$0xff]  }
 0x415   :  { %5653 = vmatprep.subr.bf16.mxu0 %v7558_v46  ;;  %5817 = vmatprep.subr.bf16.mxu1 %v7561_v47  ;;  %v7625_v46 = vld [vmem:[%s10656_s9 + $0xa50] ss:$28 sps:$4 sm:$0xff]  }
 0x418   :  { %5654 = vmatpush1.bf16.msra.mxu0 %v7556_v48  ;;  %5818 = vmatpush1.bf16.msra.mxu1 %v7559_v49 }
 0x419   :  { %5655 = vmatprep.subr.bf16.mxu0 %v7564_v50  ;;  %5819 = vmatprep.subr.bf16.mxu1 %v7567_v13  ;;  %v7633_v50 = vld [vmem:[%s10656_s9 + $0xa8c] ss:$28 sps:$4 sm:$0xff]  }
 0x41c   :  { %5656 = vmatpush1.bf16.msra.mxu0 %v7562_v51  ;;  %5820 = vmatpush1.bf16.msra.mxu1 %v7565_v52 }
 0x41d   :  { %5657 = vmatprep.subr.bf16.mxu0 %v7570_v53  ;;  %5821 = vmatprep.subr.bf16.mxu1 %v7573_v54 }
 0x420   :  { %5658 = vmatpush1.bf16.msra.mxu0 %v7568_v56  ;;  %5822 = vmatpush1.bf16.msra.mxu1 %v7571_v57 }
 0x421   :  { %5659 = vmatprep.subr.bf16.mxu0 %v7576_v58  ;;  %5823 = vmatprep.subr.bf16.mxu1 %v7579_v59  ;;  %v7628_v59 = vld [vmem:[%s10656_s9 + $0xa80] ss:$28 sps:$4 sm:$0xff]  }
 0x424   :  { %5660 = vmatpush1.bf16.msra.mxu0 %v7574_v61  ;;  %5824 = vmatpush1.bf16.msra.mxu1 %v7577_v1  ;;  %v7631_v61 = vld [vmem:[%s10656_s9 + $0xa88] ss:$28 sps:$4 sm:$0xff]  }
 0x425   :  { %5661 = vmatprep.subr.bf16.mxu0 %v7582_v2  ;;  %5825 = vmatprep.subr.bf16.mxu1 %v7585_v4  ;;  %v7636_v2 = vld [vmem:[%s10656_s9 + $0xabc] ss:$28 sps:$4 sm:$0xff]   ;;  %v7639_v4 = vld [vmem:[%s10656_s9 + $0xac4] ss:$28 sps:$4 sm:$0xff]  }
 0x428   :  { %5662 = vmatpush1.bf16.msra.mxu0 %v7580_v6  ;;  %5826 = vmatpush1.bf16.msra.mxu1 %v7583_v14  ;;  %v7634_v14 = vld [vmem:[%s10656_s9 + $0xab8] ss:$28 sps:$4 sm:$0xff]  }
 0x429   :  { %5663 = vmatprep.subr.bf16.mxu0 %v7588_v7  ;;  %5827 = vmatprep.subr.bf16.mxu1 %v7591_v8  ;;  %v7637_v7 = vld [vmem:[%s10656_s9 + $0xac0] ss:$28 sps:$4 sm:$0xff]   ;;  %v7642_v8 = vld [vmem:[%s10656_s9 + $0xaf4] ss:$28 sps:$4 sm:$0xff]  }
 0x42c   :  { %5664 = vmatpush1.bf16.msra.mxu0 %v7586_v9  ;;  %5828 = vmatpush1.bf16.msra.mxu1 %v7589_v10  ;;  %v7645_v9 = vld [vmem:[%s10656_s9 + $0xafc] ss:$28 sps:$4 sm:$0xff]   ;;  %v7640_v10 = vld [vmem:[%s10656_s9 + $0xaf0] ss:$28 sps:$4 sm:$0xff]  }
 0x42d   :  { %5665 = vmatprep.subr.bf16.mxu0 %v7594_v11  ;;  %5829 = vmatprep.subr.bf16.mxu1 %v7597_v12  ;;  %v7643_v11 = vld [vmem:[%s10656_s9 + $0xaf8] ss:$28 sps:$4 sm:$0xff]   ;;  %v7648_v12 = vld [vmem:[%s10656_s9 + $0xb2c] ss:$28 sps:$4 sm:$0xff]  }
 0x430   :  { %5666 = vmatpush1.bf16.msra.mxu0 %v7592_v34  ;;  %5830 = vmatpush1.bf16.msra.mxu1 %v7595_v15  ;;  %v7651_v34 = vld [vmem:[%s10656_s9 + $0xb34] ss:$28 sps:$4 sm:$0xff]   ;;  %v7646_v15 = vld [vmem:[%s10656_s9 + $0xb28] ss:$28 sps:$4 sm:$0xff]  }
 0x431   :  { %5667 = vmatprep.subr.bf16.mxu0 %v7600_v16  ;;  %5831 = vmatprep.subr.bf16.mxu1 %v7603_v17  ;;  %v7649_v16 = vld [vmem:[%s10656_s9 + $0xb30] ss:$28 sps:$4 sm:$0xff]   ;;  %v7654_v17 = vld [vmem:[%s10656_s9 + $0xb64] ss:$28 sps:$4 sm:$0xff]  }
 0x434   :  { %5668 = vmatpush1.bf16.msra.mxu0 %v7598_v20  ;;  %5832 = vmatpush1.bf16.msra.mxu1 %v7601_v21  ;;  %v7657_v20 = vld [vmem:[%s10656_s9 + $0xb6c] ss:$28 sps:$4 sm:$0xff]   ;;  %v7652_v21 = vld [vmem:[%s10656_s9 + $0xb60] ss:$28 sps:$4 sm:$0xff]  }
 0x435   :  { %5669 = vmatprep.subr.bf16.mxu0 %v7606_v25  ;;  %5833 = vmatprep.subr.bf16.mxu1 %v7609_v30  ;;  %v7655_v25 = vld [vmem:[%s10656_s9 + $0xb68] ss:$28 sps:$4 sm:$0xff]   ;;  %v7660_v30 = vld [vmem:[%s10656_s9 + $0xb9c] ss:$28 sps:$4 sm:$0xff]  }
 0x438   :  { %5670 = vmatpush1.bf16.msra.mxu0 %v7604_v31  ;;  %5834 = vmatpush1.bf16.msra.mxu1 %v7607_v0  ;;  %v7663_v31 = vld [vmem:[%s10656_s9 + $0xba4] ss:$28 sps:$4 sm:$0xff]   ;;  %v7658_v0 = vld [vmem:[%s10656_s9 + $0xb98] ss:$28 sps:$4 sm:$0xff]  }
 0x439   :  { %5671 = vmatprep.subr.bf16.mxu0 %v7612_v32  ;;  %5835 = vmatprep.subr.bf16.mxu1 %v7615_v22  ;;  %v7661_v32 = vld [vmem:[%s10656_s9 + $0xba0] ss:$28 sps:$4 sm:$0xff]   ;;  %v7666_v22 = vld [vmem:[%s10656_s9 + $0xbd4] ss:$28 sps:$4 sm:$0xff]  }
 0x43c   :  { %5672 = vmatpush1.bf16.msra.mxu0 %v7610_v23  ;;  %5836 = vmatpush1.bf16.msra.mxu1 %v7613_v24  ;;  %v7669_v23 = vld [vmem:[%s10656_s9 + $0xbdc] ss:$28 sps:$4 sm:$0xff]   ;;  %v7664_v24 = vld [vmem:[%s10656_s9 + $0xbd0] ss:$28 sps:$4 sm:$0xff]  }
 0x43d   :  { %5673 = vmatprep.subr.bf16.mxu0 %v7618_v26  ;;  %5837 = vmatprep.subr.bf16.mxu1 %v7621_v36  ;;  %v7667_v26 = vld [vmem:[%s10656_s9 + $0xbd8] ss:$28 sps:$4 sm:$0xff]   ;;  %v7672_v36 = vld [vmem:[%s10656_s9 + $0xc0c] ss:$28 sps:$4 sm:$0xff]  }
 0x440   :  { %5674 = vmatpush1.bf16.msra.mxu0 %v7616_v37  ;;  %5838 = vmatpush1.bf16.msra.mxu1 %v7619_v38  ;;  %v2613_v44 = vpop.f32.mrb[8].mxu0  ;;  %v7670_v37 = vld [vmem:[%s10656_s9 + $0xc08] ss:$28 sps:$4 sm:$0xff]   ;;  %v7673_v38 = vld [vmem:[%s10656_s9 + $0xc10] ss:$28 sps:$4 sm:$0xff]  }
 0x441   :  { %v7147_v47 = vadd.f32 %v2613_v44, %v1073_v39  ;;  %v9796_v48 = vpop.f32.mrb[16].mxu1  ;;  %v2615_v49 = vpop.f32.mrb[9].mxu0  ;;  %5675 = vmatprep.subr.bf16.mxu0 %v7624_v40  ;;  %5839 = vmatprep.subr.bf16.mxu1 %v7627_v41  ;;  %v7678_v39 = vld [vmem:[%s10656_s9 + $0xc44] ss:$28 sps:$4 sm:$0xff]   ;;  %v7681_v40 = vld [vmem:[%s10656_s9 + $0xc4c] ss:$28 sps:$4 sm:$0xff]  }
 0x442   :  { %v7148_v13 = vadd.f32 %v2615_v49, %v1077_v42  ;;  %v2697_v51 = vpop.f32.mrb[17].mxu1  ;;  %v2617_v52 = vpop.f32.mrb[10].mxu0  ;;  %v7676_v41 = vld [vmem:[%s10656_s9 + $0xc40] ss:$28 sps:$4 sm:$0xff]   ;;  %v7679_v42 = vld [vmem:[%s10656_s9 + $0xc48] ss:$28 sps:$4 sm:$0xff]  }
 0x443   :  { %v7150_v53 = vadd.f32 %v2697_v51, %v1085_v43  ;;  %v2699_v54 = vpop.f32.mrb[18].mxu1  ;;  %v2618_v56 = vpop.f32.mrb[11].mxu0  ;;  %v9812_v1 = vpack.c.bf16 %v7147_v47, %v7147_v47  ;;  %v7684_v43 = vld [vmem:[%s10656_s9 + $0xc7c] ss:$28 sps:$4 sm:$0xff]   ;;  %v7687_v44 = vld [vmem:[%s10656_s9 + $0xc84] ss:$28 sps:$4 sm:$0xff]  }
 0x444   :  { %v9804_v57 = vpack.c.bf16 %v7148_v13, %v7148_v13  ;;  %v2700_v58 = vpop.f32.mrb[19].mxu1  ;;  %5676 = vmatpush1.bf16.msra.mxu0 %v7622_v45  ;;  %5840 = vmatpush1.bf16.msra.mxu1 %v7625_v46  ;;  %v7682_v45 = vld [vmem:[%s10656_s9 + $0xc78] ss:$28 sps:$4 sm:$0xff]   ;;  %v7685_v46 = vld [vmem:[%s10656_s9 + $0xc80] ss:$28 sps:$4 sm:$0xff]  }
 0x445   :  { %5686 = vmatprep.subr.bf16.mxu0 %v7630_v62  ;;  %5850 = vmatprep.subr.bf16.mxu1 %v7633_v50  ;;  %v9822_v6 = vpack.c.bf16 %v7150_v53, %v7150_v53  ;;  %v7690_v47 = vld [vmem:[%s10656_s9 + $0xcb4] ss:$28 sps:$4 sm:$0xff]   ;;  %v7693_v49 = vld [vmem:[%s10656_s9 + $0xcbc] ss:$28 sps:$4 sm:$0xff]   ;;  %v7696_v13 = vld [vmem:[%s10656_s9 + $0xcec] ss:$28 sps:$4 sm:$0xff]  }
 0x446   :  { %5677 = vmatprep.mubr.bf16.mxu0 %v9804_v57  ;;  %5841 = vmatprep.mubr.bf16.mxu1 %v9804_v57  ;;  %v7688_v62 = vld [vmem:[%s10656_s9 + $0xcb0] ss:$28 sps:$4 sm:$0xff]   ;;  %v7691_v50 = vld [vmem:[%s10656_s9 + $0xcb8] ss:$28 sps:$4 sm:$0xff]   ;;  %v7694_v52 = vld [vmem:[%s10656_s9 + $0xce8] ss:$28 sps:$4 sm:$0xff]  }
 0x447   :  { %5678 = vmatmul.mubr.bf16.vlgmr.msra.gmra.mrb[12].mxu0 %v9812_v1  ;;  %5842 = vmatmul.mubr.bf16.vlgmr.msra.gmra.mrb[20].mxu1 %v9812_v1  ;;  %v7699_v51 = vld [vmem:[%s10656_s9 + $0xcf4] ss:$28 sps:$4 sm:$0xff]   ;;  %v7702_v54 = vld [vmem:[%s10656_s9 + $0xd24] ss:$28 sps:$4 sm:$0xff]   ;;  %v7705_v56 = vld [vmem:[%s10656_s9 + $0xd2c] ss:$28 sps:$4 sm:$0xff]  }
 0x448   :  { %5687 = vmatpush1.bf16.msra.mxu0 %v7628_v59  ;;  %5851 = vmatpush1.bf16.msra.mxu1 %v7631_v61  ;;  %v7697_v53 = vld [vmem:[%s10656_s9 + $0xcf0] ss:$28 sps:$4 sm:$0xff]   ;;  %v7700_v58 = vld [vmem:[%s10656_s9 + $0xd20] ss:$28 sps:$4 sm:$0xff]   ;;  %v7703_v59 = vld [vmem:[%s10656_s9 + $0xd28] ss:$28 sps:$4 sm:$0xff]  }
 0x449   :  { %5718 = vmatprep.mubr.bf16.mxu0 %v9822_v6  ;;  %5882 = vmatprep.mubr.bf16.mxu1 %v9822_v6  ;;  %v7708_v61 = vld [vmem:[%s10656_s9 + $0xd5c] ss:$28 sps:$4 sm:$0xff]  }
 0x44a   :  { %5688 = vmatprep.subr.bf16.mxu0 %v7636_v2  ;;  %5852 = vmatprep.subr.bf16.mxu1 %v7639_v4  ;;  %v7711_v2 = vld [vmem:[%s10656_s9 + $0xd64] ss:$28 sps:$4 sm:$0xff]   ;;  %v7706_v4 = vld [vmem:[%s10656_s9 + $0xd58] ss:$28 sps:$4 sm:$0xff]  }
 0x44c   :  { %5689 = vmatpush1.bf16.msra.mxu0 %v7634_v14  ;;  %5853 = vmatpush1.bf16.msra.mxu1 %v7637_v7  ;;  %v7709_v14 = vld [vmem:[%s10656_s9 + $0xd60] ss:$28 sps:$4 sm:$0xff]   ;;  %v1080_v7 = vsub.s32 6, %v8313_v55 }
 0x44d   :  { %5690 = vmatprep.subr.bf16.mxu0 %v7642_v8  ;;  %5854 = vmatprep.subr.bf16.mxu1 %v7645_v9  ;;  %v7714_v8 = vld [vmem:[%s10656_s9 + $0xd94] ss:$28 sps:$4 sm:$0xff]   ;;  %v7717_v9 = vld [vmem:[%s10656_s9 + $0xd9c] ss:$28 sps:$4 sm:$0xff]  }
 0x450   :  { %5691 = vmatpush1.bf16.msra.mxu0 %v7640_v10  ;;  %5855 = vmatpush1.bf16.msra.mxu1 %v7643_v11  ;;  %v7712_v10 = vld [vmem:[%s10656_s9 + $0xd90] ss:$28 sps:$4 sm:$0xff]   ;;  %v7715_v11 = vld [vmem:[%s10656_s9 + $0xd98] ss:$28 sps:$4 sm:$0xff]  }
 0x451   :  { %5692 = vmatprep.subr.bf16.mxu0 %v7648_v12  ;;  %5856 = vmatprep.subr.bf16.mxu1 %v7651_v34  ;;  %v7994_v12 = vld [vmem:[%s10657_s8] sm:$0xff] }
 0x452   :  { %v1081_v34 = vrot.slane %v7994_v12, %v1080_v7  ;;  %v7774_v12 = vld [vmem:[%s10656_s9 + $0x240] ss:$28 sps:$4 sm:$0xff]  }
 0x454   :  { %5693 = vmatpush1.bf16.msra.mxu0 %v7646_v15  ;;  %5857 = vmatpush1.bf16.msra.mxu1 %v7649_v16  ;;  %v7720_v15 = vld [vmem:[%s10656_s9 + $0xdcc] ss:$28 sps:$4 sm:$0xff]   ;;  %v7723_v16 = vld [vmem:[%s10656_s9 + $0xdd4] ss:$28 sps:$4 sm:$0xff]  }
 0x455   :  { %5694 = vmatprep.subr.bf16.mxu0 %v7654_v17  ;;  %5858 = vmatprep.subr.bf16.mxu1 %v7657_v20  ;;  %v7718_v17 = vld [vmem:[%s10656_s9 + $0xdc8] ss:$28 sps:$4 sm:$0xff]   ;;  %v7721_v20 = vld [vmem:[%s10656_s9 + $0xdd0] ss:$28 sps:$4 sm:$0xff]  }
 0x458   :  { %5695 = vmatpush1.bf16.msra.mxu0 %v7652_v21  ;;  %5859 = vmatpush1.bf16.msra.mxu1 %v7655_v25  ;;  %v7149_v21 = vadd.f32 %v9796_v48, %v1081_v34  ;;  %v7726_v25 = vld [vmem:[%s10656_s9 + $0x14] ss:$28 sps:$4 sm:$0xff]   ;;  %v7778_v34 = vld [vmem:[%s10656_s9 + $0x408] ss:$28 sps:$4 sm:$0xff]  }
 0x459   :  { %5696 = vmatprep.subr.bf16.mxu0 %v7660_v30  ;;  %5860 = vmatprep.subr.bf16.mxu1 %v7663_v31  ;;  %v7727_v30 = vld [vmem:[%s10656_s9 + $0x1d8] ss:$28 sps:$4 sm:$0xff]   ;;  %v7724_v31 = vld [vmem:[%s10656_s9 + $0x10] ss:$28 sps:$4 sm:$0xff]  }
 0x45a   :  { %v7728_v48 = vld [vmem:[%s10656_s9 + $0x18] ss:$28 sps:$4 sm:$0xff]  }
 0x45c   :  { %5697 = vmatpush1.bf16.msra.mxu0 %v7658_v0  ;;  %5861 = vmatpush1.bf16.msra.mxu1 %v7661_v32  ;;  %v10018_v0 = vpack.c.bf16 %v7149_v21, %v7149_v21  ;;  %v7731_v32 = vld [vmem:[%s10656_s9 + $0x4c] ss:$28 sps:$4 sm:$0xff]   ;;  %v7786_v21 = vld [vmem:[%s10656_s9 + $0x2b4] ss:$28 sps:$4 sm:$0xff]  }
 0x45d   :  { %5698 = vmatprep.subr.bf16.mxu0 %v7666_v22  ;;  %5862 = vmatprep.subr.bf16.mxu1 %v7669_v23  ;;  %v7732_v22 = vld [vmem:[%s10656_s9 + $0x210] ss:$28 sps:$4 sm:$0xff]   ;;  %v7729_v23 = vld [vmem:[%s10656_s9 + $0x48] ss:$28 sps:$4 sm:$0xff]  }
 0x460   :  { %5699 = vmatpush1.bf16.msra.mxu0 %v7664_v24  ;;  %5863 = vmatpush1.bf16.msra.mxu1 %v7667_v26  ;;  %v7733_v24 = vld [vmem:[%s10656_s9 + $0x50] ss:$28 sps:$4 sm:$0xff]   ;;  %v7736_v26 = vld [vmem:[%s10656_s9 + $0x84] ss:$28 sps:$4 sm:$0xff]  }
 0x461   :  { %5700 = vmatprep.subr.bf16.mxu0 %v7672_v36  ;;  %5864 = vmatprep.subr.bf16.mxu1 %v7675_v35  ;;  %v7737_v36 = vld [vmem:[%s10656_s9 + $0x248] ss:$28 sps:$4 sm:$0xff]   ;;  %v7734_v35 = vld [vmem:[%s10656_s9 + $0x80] ss:$28 sps:$4 sm:$0xff]  }
 0x464   :  { %5701 = vmatpush1.bf16.msra.mxu0 %v7670_v37  ;;  %5865 = vmatpush1.bf16.msra.mxu1 %v7673_v38  ;;  %v7741_v37 = vld [vmem:[%s10656_s9 + $0xbc] ss:$28 sps:$4 sm:$0xff]  }
 0x465   :  { %5702 = vmatprep.subr.bf16.mxu0 %v7678_v39  ;;  %5866 = vmatprep.subr.bf16.mxu1 %v7681_v40  ;;  %v7742_v38 = vld [vmem:[%s10656_s9 + $0x280] ss:$28 sps:$4 sm:$0xff]   ;;  %v7739_v39 = vld [vmem:[%s10656_s9 + $0xb8] ss:$28 sps:$4 sm:$0xff]  }
 0x466   :  { %v7743_v40 = vld [vmem:[%s10656_s9 + $0xc0] ss:$28 sps:$4 sm:$0xff]  }
 0x468   :  { %5703 = vmatpush1.bf16.msra.mxu0 %v7676_v41  ;;  %5867 = vmatpush1.bf16.msra.mxu1 %v7679_v42  ;;  %v7746_v41 = vld [vmem:[%s10656_s9 + $0xf4] ss:$28 sps:$4 sm:$0xff]  }
 0x469   :  { %5704 = vmatprep.subr.bf16.mxu0 %v7684_v43  ;;  %5868 = vmatprep.subr.bf16.mxu1 %v7687_v44  ;;  %v7747_v42 = vld [vmem:[%s10656_s9 + $0x2b8] ss:$28 sps:$4 sm:$0xff]   ;;  %v7744_v43 = vld [vmem:[%s10656_s9 + $0xf0] ss:$28 sps:$4 sm:$0xff]  }
 0x46a   :  { %v7748_v44 = vld [vmem:[%s10656_s9 + $0xf8] ss:$28 sps:$4 sm:$0xff]  }
 0x46c   :  { %5705 = vmatpush1.bf16.msra.mxu0 %v7682_v45  ;;  %5869 = vmatpush1.bf16.msra.mxu1 %v7685_v46  ;;  %v7751_v45 = vld [vmem:[%s10656_s9 + $0x12c] ss:$28 sps:$4 sm:$0xff]  }
 0x46d   :  { %5706 = vmatprep.subr.bf16.mxu0 %v7690_v47  ;;  %5870 = vmatprep.subr.bf16.mxu1 %v7693_v49  ;;  %v7752_v46 = vld [vmem:[%s10656_s9 + $0x2f0] ss:$28 sps:$4 sm:$0xff]   ;;  %v7749_v47 = vld [vmem:[%s10656_s9 + $0x128] ss:$28 sps:$4 sm:$0xff]  }
 0x46e   :  { %v7753_v49 = vld [vmem:[%s10656_s9 + $0x130] ss:$28 sps:$4 sm:$0xff]  }
 0x470   :  { %5707 = vmatpush1.bf16.msra.mxu0 %v7688_v62  ;;  %5871 = vmatpush1.bf16.msra.mxu1 %v7691_v50  ;;  %v7756_v62 = vld [vmem:[%s10656_s9 + $0x164] ss:$28 sps:$4 sm:$0xff]  }
 0x471   :  { %5708 = vmatprep.subr.bf16.mxu0 %v7696_v13  ;;  %5872 = vmatprep.subr.bf16.mxu1 %v7699_v51  ;;  %v7757_v50 = vld [vmem:[%s10656_s9 + $0x328] ss:$28 sps:$4 sm:$0xff]   ;;  %v7754_v13 = vld [vmem:[%s10656_s9 + $0x160] ss:$28 sps:$4 sm:$0xff]  }
 0x472   :  { %v7758_v51 = vld [vmem:[%s10656_s9 + $0x168] ss:$28 sps:$4 sm:$0xff]  }
 0x474   :  { %5709 = vmatpush1.bf16.msra.mxu0 %v7694_v52  ;;  %5873 = vmatpush1.bf16.msra.mxu1 %v7697_v53  ;;  %v7761_v52 = vld [vmem:[%s10656_s9 + $0x19c] ss:$28 sps:$4 sm:$0xff]  }
 0x475   :  { %5710 = vmatprep.subr.bf16.mxu0 %v7702_v54  ;;  %5874 = vmatprep.subr.bf16.mxu1 %v7705_v56  ;;  %v7762_v53 = vld [vmem:[%s10656_s9 + $0x360] ss:$28 sps:$4 sm:$0xff]   ;;  %v7759_v54 = vld [vmem:[%s10656_s9 + $0x198] ss:$28 sps:$4 sm:$0xff]  }
 0x476   :  { %v7763_v56 = vld [vmem:[%s10656_s9 + $0x1a0] ss:$28 sps:$4 sm:$0xff]  }
 0x478   :  { %5711 = vmatpush1.bf16.msra.mxu0 %v7700_v58  ;;  %5875 = vmatpush1.bf16.msra.mxu1 %v7703_v59  ;;  %v7766_v58 = vld [vmem:[%s10656_s9 + $0x1d4] ss:$28 sps:$4 sm:$0xff]  }
 0x479   :  { %5712 = vmatprep.subr.bf16.mxu0 %v7708_v61  ;;  %5876 = vmatprep.subr.bf16.mxu1 %v7711_v2  ;;  %v7767_v59 = vld [vmem:[%s10656_s9 + $0x558] ss:$28 sps:$4 sm:$0xff]   ;;  %v7764_v61 = vld [vmem:[%s10656_s9 + $0x1d0] ss:$28 sps:$4 sm:$0xff]  }
 0x47a   :  { %v7768_v2 = vld [vmem:[%s10656_s9 + $0x398] ss:$28 sps:$4 sm:$0xff]  }
 0x47c   :  { %5713 = vmatpush1.bf16.msra.mxu0 %v7706_v4  ;;  %5877 = vmatpush1.bf16.msra.mxu1 %v7709_v14  ;;  %v7771_v4 = vld [vmem:[%s10656_s9 + $0x20c] ss:$28 sps:$4 sm:$0xff]  }
 0x47d   :  { %5714 = vmatprep.subr.bf16.mxu0 %v7714_v8  ;;  %5878 = vmatprep.subr.bf16.mxu1 %v7717_v9  ;;  %v7772_v14 = vld [vmem:[%s10656_s9 + $0x590] ss:$28 sps:$4 sm:$0xff]   ;;  %v7769_v8 = vld [vmem:[%s10656_s9 + $0x208] ss:$28 sps:$4 sm:$0xff]  }
 0x47e   :  { %v7773_v9 = vld [vmem:[%s10656_s9 + $0x3d0] ss:$28 sps:$4 sm:$0xff]  }
 0x480   :  { %5715 = vmatpush1.bf16.msra.mxu0 %v7712_v10  ;;  %5879 = vmatpush1.bf16.msra.mxu1 %v7715_v11  ;;  %v7776_v10 = vld [vmem:[%s10656_s9 + $0x244] ss:$28 sps:$4 sm:$0xff]  }
 0x481   :  { %5716 = vmatprep.subr.bf16.mxu0 %v7720_v15  ;;  %5880 = vmatprep.subr.bf16.mxu1 %v7723_v16  ;;  %v7777_v11 = vld [vmem:[%s10656_s9 + $0x5c8] ss:$28 sps:$4 sm:$0xff]   ;;  %v7781_v15 = vld [vmem:[%s10656_s9 + $0x27c] ss:$28 sps:$4 sm:$0xff]  }
 0x482   :  { %v7782_v16 = vld [vmem:[%s10656_s9 + $0x600] ss:$28 sps:$4 sm:$0xff]  }
 0x484   :  { %5717 = vmatpush1.bf16.msra.mxu0 %v7718_v17  ;;  %5881 = vmatpush1.bf16.msra.mxu1 %v7721_v20  ;;  %v7779_v17 = vld [vmem:[%s10656_s9 + $0x278] ss:$28 sps:$4 sm:$0xff]   ;;  %v7783_v20 = vld [vmem:[%s10656_s9 + $0x440] ss:$28 sps:$4 sm:$0xff]  }
 0x485   :  { %5891 = vmatprep.subr.bf16.mxu0 %v7726_v25  ;;  %7035 = vmatprep.subr.bf16.mxu1 %v7727_v30  ;;  %v7787_v25 = vld [vmem:[%s10656_s9 + $0x638] ss:$28 sps:$4 sm:$0xff]   ;;  %v7784_v30 = vld [vmem:[%s10656_s9 + $0x2b0] ss:$28 sps:$4 sm:$0xff]  }
 0x487   :  { %5719 = vmatmul.mubr.bf16.vlgmr.msra.gmra.mrb[12].mxu0 %v10018_v0  ;;  %5883 = vmatmul.mubr.bf16.vlgmr.msra.gmra.mrb[20].mxu1 %v10018_v0 }
 0x488   :  { %5892 = vmatpush1.bf16.msra.mxu0 %v7724_v31  ;;  %5923 = vmatprep.mubr.bf16.mxu0 %v9395_v18  ;;  %v7788_v31 = vld [vmem:[%s10656_s9 + $0x478] ss:$28 sps:$4 sm:$0xff]  }
 0x489   :  { %7036 = vmatpush3.bf16.msra.mxu1 %v7728_v48  ;;  %6087 = vmatprep.mubr.bf16.mxu1 %v9395_v18  ;;  %v7738_v18 = vld [vmem:[%s10656_s9 + $0x88] ss:$28 sps:$4 sm:$0xff]  }
 0x48a   :  { %5893 = vmatprep.subr.bf16.mxu0 %v7731_v32  ;;  %7037 = vmatprep.subr.bf16.mxu1 %v7732_v22  ;;  %v7791_v48 = vld [vmem:[%s10656_s9 + $0x2ec] ss:$28 sps:$4 sm:$0xff]  }
 0x48b   :  { %v7792_v32 = vld [vmem:[%s10656_s9 + $0x670] ss:$28 sps:$4 sm:$0xff]   ;;  %v7789_v22 = vld [vmem:[%s10656_s9 + $0x2e8] ss:$28 sps:$4 sm:$0xff]  }
 0x48c   :  { %5894 = vmatpush1.bf16.msra.mxu0 %v7729_v23  ;;  %v7793_v23 = vld [vmem:[%s10656_s9 + $0x4b0] ss:$28 sps:$4 sm:$0xff]  }
 0x48d   :  { %7038 = vmatpush3.bf16.msra.mxu1 %v7733_v24  ;;  %5895 = vmatprep.subr.bf16.mxu0 %v7736_v26  ;;  %v7796_v24 = vld [vmem:[%s10656_s9 + $0x324] ss:$28 sps:$4 sm:$0xff]  }
 0x48e   :  { %7039 = vmatprep.subr.bf16.mxu1 %v7737_v36  ;;  %v7797_v26 = vld [vmem:[%s10656_s9 + $0x6a8] ss:$28 sps:$4 sm:$0xff]   ;;  %v7794_v36 = vld [vmem:[%s10656_s9 + $0x320] ss:$28 sps:$4 sm:$0xff]  }
 0x490   :  { %5896 = vmatpush1.bf16.msra.mxu0 %v7734_v35  ;;  %v7798_v35 = vld [vmem:[%s10656_s9 + $0x4e8] ss:$28 sps:$4 sm:$0xff]  }
 0x491   :  { %7040 = vmatpush3.bf16.msra.mxu1 %v7738_v18  ;;  %5897 = vmatprep.subr.bf16.mxu0 %v7741_v37  ;;  %v7801_v18 = vld [vmem:[%s10656_s9 + $0x35c] ss:$28 sps:$4 sm:$0xff]  }
 0x492   :  { %7041 = vmatprep.subr.bf16.mxu1 %v7742_v38  ;;  %v7802_v37 = vld [vmem:[%s10656_s9 + $0x6e0] ss:$28 sps:$4 sm:$0xff]   ;;  %v7799_v38 = vld [vmem:[%s10656_s9 + $0x358] ss:$28 sps:$4 sm:$0xff]  }
 0x494   :  { %5898 = vmatpush1.bf16.msra.mxu0 %v7739_v39  ;;  %v7803_v39 = vld [vmem:[%s10656_s9 + $0x520] ss:$28 sps:$4 sm:$0xff]  }
 0x495   :  { %7042 = vmatpush3.bf16.msra.mxu1 %v7743_v40  ;;  %5899 = vmatprep.subr.bf16.mxu0 %v7746_v41  ;;  %v7806_v40 = vld [vmem:[%s10656_s9 + $0x394] ss:$28 sps:$4 sm:$0xff]  }
 0x496   :  { %7043 = vmatprep.subr.bf16.mxu1 %v7747_v42  ;;  %v7807_v41 = vld [vmem:[%s10656_s9 + $0x8d8] ss:$28 sps:$4 sm:$0xff]   ;;  %v7804_v42 = vld [vmem:[%s10656_s9 + $0x390] ss:$28 sps:$4 sm:$0xff]  }
 0x498   :  { %5900 = vmatpush1.bf16.msra.mxu0 %v7744_v43  ;;  %v7808_v43 = vld [vmem:[%s10656_s9 + $0x718] ss:$28 sps:$4 sm:$0xff]  }
 0x499   :  { %7044 = vmatpush3.bf16.msra.mxu1 %v7748_v44  ;;  %5901 = vmatprep.subr.bf16.mxu0 %v7751_v45  ;;  %v7811_v44 = vld [vmem:[%s10656_s9 + $0x3cc] ss:$28 sps:$4 sm:$0xff]  }
 0x49a   :  { %7045 = vmatprep.subr.bf16.mxu1 %v7752_v46  ;;  %v7812_v45 = vld [vmem:[%s10656_s9 + $0x910] ss:$28 sps:$4 sm:$0xff]   ;;  %v7809_v46 = vld [vmem:[%s10656_s9 + $0x3c8] ss:$28 sps:$4 sm:$0xff]  }
 0x49c   :  { %5902 = vmatpush1.bf16.msra.mxu0 %v7749_v47  ;;  %v7813_v47 = vld [vmem:[%s10656_s9 + $0x750] ss:$28 sps:$4 sm:$0xff]  }
 0x49d   :  { %7046 = vmatpush3.bf16.msra.mxu1 %v7753_v49  ;;  %5903 = vmatprep.subr.bf16.mxu0 %v7756_v62  ;;  %v7817_v49 = vld [vmem:[%s10656_s9 + $0x948] ss:$28 sps:$4 sm:$0xff]  }
 0x49e   :  { %7047 = vmatprep.subr.bf16.mxu1 %v7757_v50  ;;  %v7818_v62 = vld [vmem:[%s10656_s9 + $0x788] ss:$28 sps:$4 sm:$0xff]   ;;  %v7821_v50 = vld [vmem:[%s10656_s9 + $0x43c] ss:$28 sps:$4 sm:$0xff]  }
 0x4a0   :  { %5904 = vmatpush1.bf16.msra.mxu0 %v7754_v13  ;;  %v7822_v13 = vld [vmem:[%s10656_s9 + $0x980] ss:$28 sps:$4 sm:$0xff]  }
 0x4a1   :  { %7048 = vmatpush3.bf16.msra.mxu1 %v7758_v51  ;;  %5905 = vmatprep.subr.bf16.mxu0 %v7761_v52  ;;  %v7819_v51 = vld [vmem:[%s10656_s9 + $0x438] ss:$28 sps:$4 sm:$0xff]   ;;  %v7823_v52 = vld [vmem:[%s10656_s9 + $0x7c0] ss:$28 sps:$4 sm:$0xff]  }
 0x4a2   :  { %7049 = vmatprep.subr.bf16.mxu1 %v7762_v53  ;;  %v7826_v53 = vld [vmem:[%s10656_s9 + $0x474] ss:$28 sps:$4 sm:$0xff]  }
 0x4a4   :  { %5906 = vmatpush1.bf16.msra.mxu0 %v7759_v54  ;;  %v7827_v54 = vld [vmem:[%s10656_s9 + $0x9b8] ss:$28 sps:$4 sm:$0xff]  }
 0x4a5   :  { %7050 = vmatpush3.bf16.msra.mxu1 %v7763_v56  ;;  %5907 = vmatprep.subr.bf16.mxu0 %v7766_v58  ;;  %v7824_v56 = vld [vmem:[%s10656_s9 + $0x470] ss:$28 sps:$4 sm:$0xff]   ;;  %v7828_v58 = vld [vmem:[%s10656_s9 + $0x7f8] ss:$28 sps:$4 sm:$0xff]  }
 0x4a6   :  { %7057 = vmatprep.subr.bf16.mxu1 %v7767_v59  ;;  %v7831_v59 = vld [vmem:[%s10656_s9 + $0x4ac] ss:$28 sps:$4 sm:$0xff]  }
 0x4a8   :  { %6088 = vmatmul.mubr.bf16.vlgmr.msra.gmra.mrb[24].mxu1 %v9397_v19  ;;  %5908 = vmatpush1.bf16.msra.mxu0 %v7764_v61  ;;  %v7832_v61 = vld [vmem:[%s10656_s9 + $0x9f0] ss:$28 sps:$4 sm:$0xff]  }
 0x4a9   :  { %7058 = vmatpush3.bf16.msra.mxu1 %v7768_v2  ;;  %6127 = vmatprep.mubr.bf16.mxu1 %v9410_v27  ;;  %v7829_v2 = vld [vmem:[%s10656_s9 + $0x4a8] ss:$28 sps:$4 sm:$0xff]  }
 0x4aa   :  { %5909 = vmatprep.subr.bf16.mxu0 %v7771_v4  ;;  %7059 = vmatprep.subr.bf16.mxu1 %v7772_v14  ;;  %v7833_v4 = vld [vmem:[%s10656_s9 + $0x830] ss:$28 sps:$4 sm:$0xff]   ;;  %v7836_v14 = vld [vmem:[%s10656_s9 + $0x4e4] ss:$28 sps:$4 sm:$0xff]  }
 0x4ac   :  { %5910 = vmatpush1.bf16.msra.mxu0 %v7769_v8  ;;  %v7837_v8 = vld [vmem:[%s10656_s9 + $0xa28] ss:$28 sps:$4 sm:$0xff]  }
 0x4ad   :  { %7060 = vmatpush3.bf16.msra.mxu1 %v7773_v9  ;;  %5911 = vmatprep.subr.bf16.mxu0 %v7776_v10  ;;  %v7834_v9 = vld [vmem:[%s10656_s9 + $0x4e0] ss:$28 sps:$4 sm:$0xff]   ;;  %v7838_v10 = vld [vmem:[%s10656_s9 + $0x868] ss:$28 sps:$4 sm:$0xff]  }
 0x4ae   :  { %7061 = vmatprep.subr.bf16.mxu1 %v7777_v11  ;;  %v7841_v11 = vld [vmem:[%s10656_s9 + $0x51c] ss:$28 sps:$4 sm:$0xff]  }
 0x4b0   :  { %5912 = vmatpush1.bf16.msra.mxu0 %v7774_v12  ;;  %v7842_v12 = vld [vmem:[%s10656_s9 + $0xa60] ss:$28 sps:$4 sm:$0xff]  }
 0x4b1   :  { %7062 = vmatpush3.bf16.msra.mxu1 %v7778_v34  ;;  %5913 = vmatprep.subr.bf16.mxu0 %v7781_v15  ;;  %v7839_v34 = vld [vmem:[%s10656_s9 + $0x518] ss:$28 sps:$4 sm:$0xff]   ;;  %v7843_v15 = vld [vmem:[%s10656_s9 + $0x8a0] ss:$28 sps:$4 sm:$0xff]  }
 0x4b2   :  { %7063 = vmatprep.subr.bf16.mxu1 %v7782_v16  ;;  %v7846_v16 = vld [vmem:[%s10656_s9 + $0x554] ss:$28 sps:$4 sm:$0xff]  }
 0x4b4   :  { %5914 = vmatpush1.bf16.msra.mxu0 %v7779_v17  ;;  %v7847_v17 = vld [vmem:[%s10656_s9 + $0xc58] ss:$28 sps:$4 sm:$0xff]  }
 0x4b5   :  { %7064 = vmatpush3.bf16.msra.mxu1 %v7783_v20  ;;  %5915 = vmatprep.subr.bf16.mxu0 %v7786_v21  ;;  %v7844_v20 = vld [vmem:[%s10656_s9 + $0x550] ss:$28 sps:$4 sm:$0xff]   ;;  %v7848_v21 = vld [vmem:[%s10656_s9 + $0xa98] ss:$28 sps:$4 sm:$0xff]  }
 0x4b6   :  { %7065 = vmatprep.subr.bf16.mxu1 %v7787_v25  ;;  %v7851_v25 = vld [vmem:[%s10656_s9 + $0x58c] ss:$28 sps:$4 sm:$0xff]  }
 0x4b8   :  { %5916 = vmatpush1.bf16.msra.mxu0 %v7784_v30  ;;  %v7852_v30 = vld [vmem:[%s10656_s9 + $0xc90] ss:$28 sps:$4 sm:$0xff]  }
 0x4b9   :  { %7066 = vmatpush3.bf16.msra.mxu1 %v7788_v31  ;;  %5917 = vmatprep.subr.bf16.mxu0 %v7791_v48  ;;  %v7849_v31 = vld [vmem:[%s10656_s9 + $0x588] ss:$28 sps:$4 sm:$0xff]   ;;  %v7853_v48 = vld [vmem:[%s10656_s9 + $0xad0] ss:$28 sps:$4 sm:$0xff]  }
 0x4ba   :  { %7067 = vmatprep.subr.bf16.mxu1 %v7792_v32  ;;  %v7856_v32 = vld [vmem:[%s10656_s9 + $0x5c4] ss:$28 sps:$4 sm:$0xff]  }
 0x4bc   :  { %5918 = vmatpush1.bf16.msra.mxu0 %v7789_v22  ;;  %v7857_v22 = vld [vmem:[%s10656_s9 + $0xcc8] ss:$28 sps:$4 sm:$0xff]  }
 0x4bd   :  { %7068 = vmatpush3.bf16.msra.mxu1 %v7793_v23  ;;  %5919 = vmatprep.subr.bf16.mxu0 %v7796_v24  ;;  %v7854_v23 = vld [vmem:[%s10656_s9 + $0x5c0] ss:$28 sps:$4 sm:$0xff]   ;;  %v7858_v24 = vld [vmem:[%s10656_s9 + $0xb08] ss:$28 sps:$4 sm:$0xff]  }
 0x4be   :  { %7069 = vmatprep.subr.bf16.mxu1 %v7797_v26  ;;  %v7861_v26 = vld [vmem:[%s10656_s9 + $0x5fc] ss:$28 sps:$4 sm:$0xff]  }
 0x4c0   :  { %5920 = vmatpush1.bf16.msra.mxu0 %v7794_v36  ;;  %v7862_v36 = vld [vmem:[%s10656_s9 + $0xd00] ss:$28 sps:$4 sm:$0xff]  }
 0x4c1   :  { %7070 = vmatpush3.bf16.msra.mxu1 %v7798_v35  ;;  %5921 = vmatprep.subr.bf16.mxu0 %v7801_v18  ;;  %v7859_v35 = vld [vmem:[%s10656_s9 + $0x5f8] ss:$28 sps:$4 sm:$0xff]   ;;  %v7863_v18 = vld [vmem:[%s10656_s9 + $0xb40] ss:$28 sps:$4 sm:$0xff]  }
 0x4c2   :  { %7071 = vmatprep.subr.bf16.mxu1 %v7802_v37  ;;  %v7866_v37 = vld [vmem:[%s10656_s9 + $0x634] ss:$28 sps:$4 sm:$0xff]  }
 0x4c4   :  { %5922 = vmatpush1.bf16.msra.mxu0 %v7799_v38  ;;  %v7867_v38 = vld [vmem:[%s10656_s9 + $0xd38] ss:$28 sps:$4 sm:$0xff]  }
 0x4c5   :  { %7072 = vmatpush3.bf16.msra.mxu1 %v7803_v39  ;;  %5932 = vmatprep.subr.bf16.mxu0 %v7806_v40  ;;  %v7864_v39 = vld [vmem:[%s10656_s9 + $0x630] ss:$28 sps:$4 sm:$0xff]   ;;  %v7868_v40 = vld [vmem:[%s10656_s9 + $0xb78] ss:$28 sps:$4 sm:$0xff]  }
 0x4c6   :  { %7079 = vmatprep.subr.bf16.mxu1 %v7807_v41  ;;  %v7871_v41 = vld [vmem:[%s10656_s9 + $0x66c] ss:$28 sps:$4 sm:$0xff]  }
 0x4c7   :  { %5924 = vmatmul.mubr.bf16.vlgmr.msra.gmra.mrb[16].mxu0 %v9397_v19  ;;  %v7816_v19 = vld [vmem:[%s10656_s9 + $0x404] ss:$28 sps:$4 sm:$0xff]  }
 0x4c8   :  { %6128 = vmatmul.mubr.bf16.vlgmr.msra.gmra.mrb[28].mxu1 %v9602_v28  ;;  %5933 = vmatpush1.bf16.msra.mxu0 %v7804_v42  ;;  %v7872_v42 = vld [vmem:[%s10656_s9 + $0xd70] ss:$28 sps:$4 sm:$0xff]  }
 0x4c9   :  { %5964 = vmatprep.mubr.bf16.mxu0 %v9410_v27  ;;  %7080 = vmatpush3.bf16.msra.mxu1 %v7808_v43  ;;  %v7814_v27 = vld [vmem:[%s10656_s9 + $0x400] ss:$28 sps:$4 sm:$0xff]   ;;  %v7869_v43 = vld [vmem:[%s10656_s9 + $0x668] ss:$28 sps:$4 sm:$0xff]  }
 0x4ca   :  { %6167 = vmatprep.mubr.bf16.mxu1 %v9804_v57  ;;  %5934 = vmatprep.subr.bf16.mxu0 %v7811_v44  ;;  %v7873_v44 = vld [vmem:[%s10656_s9 + $0xbb0] ss:$28 sps:$4 sm:$0xff]  }
 0x4cb   :  { %7081 = vmatprep.subr.bf16.mxu1 %v7812_v45  ;;  %v7876_v45 = vld [vmem:[%s10656_s9 + $0x6a4] ss:$28 sps:$4 sm:$0xff]  }
 0x4cc   :  { %5935 = vmatpush1.bf16.msra.mxu0 %v7809_v46  ;;  %v7877_v46 = vld [vmem:[%s10656_s9 + $0xda8] ss:$28 sps:$4 sm:$0xff]  }
 0x4cd   :  { %7082 = vmatpush3.bf16.msra.mxu1 %v7813_v47  ;;  %5936 = vmatprep.subr.bf16.mxu0 %v7816_v19  ;;  %v7874_v47 = vld [vmem:[%s10656_s9 + $0x6a0] ss:$28 sps:$4 sm:$0xff]   ;;  %v7878_v19 = vld [vmem:[%s10656_s9 + $0xbe8] ss:$28 sps:$4 sm:$0xff]  }
 0x4ce   :  { %7083 = vmatprep.subr.bf16.mxu1 %v7817_v49  ;;  %v7881_v49 = vld [vmem:[%s10656_s9 + $0x6dc] ss:$28 sps:$4 sm:$0xff]  }
 0x4d0   :  { %5937 = vmatpush1.bf16.msra.mxu0 %v7814_v27  ;;  %v7882_v27 = vld [vmem:[%s10656_s9 + $0xde0] ss:$28 sps:$4 sm:$0xff]  }
 0x4d1   :  { %7084 = vmatpush3.bf16.msra.mxu1 %v7818_v62  ;;  %5938 = vmatprep.subr.bf16.mxu0 %v7821_v50  ;;  %v7879_v62 = vld [vmem:[%s10656_s9 + $0x6d8] ss:$28 sps:$4 sm:$0xff]   ;;  %v7883_v50 = vld [vmem:[%s10656_s9 + $0xc20] ss:$28 sps:$4 sm:$0xff]  }
 0x4d2   :  { %7085 = vmatprep.subr.bf16.mxu1 %v7822_v13  ;;  %v7886_v13 = vld [vmem:[%s10656_s9 + $0x714] ss:$28 sps:$4 sm:$0xff]  }
 0x4d4   :  { %5939 = vmatpush1.bf16.msra.mxu0 %v7819_v51  ;;  %v7884_v51 = vld [vmem:[%s10656_s9 + $0x710] ss:$28 sps:$4 sm:$0xff]  }
 0x4d5   :  { %7086 = vmatpush3.bf16.msra.mxu1 %v7823_v52  ;;  %5940 = vmatprep.subr.bf16.mxu0 %v7826_v53  ;;  %v7889_v52 = vld [vmem:[%s10656_s9 + $0x74c] ss:$28 sps:$4 sm:$0xff]  }
 0x4d6   :  { %7087 = vmatprep.subr.bf16.mxu1 %v7827_v54  ;;  %v7887_v53 = vld [vmem:[%s10656_s9 + $0x748] ss:$28 sps:$4 sm:$0xff]  }
 0x4d7   :  { %v7892_v54 = vld [vmem:[%s10656_s9 + $0x784] ss:$28 sps:$4 sm:$0xff]  }
 0x4d8   :  { %5941 = vmatpush1.bf16.msra.mxu0 %v7824_v56  ;;  %v7890_v56 = vld [vmem:[%s10656_s9 + $0x780] ss:$28 sps:$4 sm:$0xff]  }
 0x4d9   :  { %7088 = vmatpush3.bf16.msra.mxu1 %v7828_v58  ;;  %5942 = vmatprep.subr.bf16.mxu0 %v7831_v59  ;;  %v7898_v58 = vld [vmem:[%s10656_s9 + $0x7f4] ss:$28 sps:$4 sm:$0xff]  }
 0x4da   :  { %7089 = vmatprep.subr.bf16.mxu1 %v7832_v61  ;;  %v7896_v59 = vld [vmem:[%s10656_s9 + $0x7f0] ss:$28 sps:$4 sm:$0xff]  }
 0x4db   :  { %v7901_v61 = vld [vmem:[%s10656_s9 + $0x82c] ss:$28 sps:$4 sm:$0xff]  }
 0x4dc   :  { %5943 = vmatpush1.bf16.msra.mxu0 %v7829_v2  ;;  %v7899_v2 = vld [vmem:[%s10656_s9 + $0x828] ss:$28 sps:$4 sm:$0xff]  }
 0x4dd   :  { %7090 = vmatpush3.bf16.msra.mxu1 %v7833_v4  ;;  %5944 = vmatprep.subr.bf16.mxu0 %v7836_v14  ;;  %v7904_v4 = vld [vmem:[%s10656_s9 + $0x864] ss:$28 sps:$4 sm:$0xff]  }
 0x4de   :  { %7091 = vmatprep.subr.bf16.mxu1 %v7837_v8  ;;  %v7902_v14 = vld [vmem:[%s10656_s9 + $0x860] ss:$28 sps:$4 sm:$0xff]  }
 0x4df   :  { %v7907_v8 = vld [vmem:[%s10656_s9 + $0x89c] ss:$28 sps:$4 sm:$0xff]  }
 0x4e0   :  { %5945 = vmatpush1.bf16.msra.mxu0 %v7834_v9  ;;  %v7905_v9 = vld [vmem:[%s10656_s9 + $0x898] ss:$28 sps:$4 sm:$0xff]  }
 0x4e1   :  { %7092 = vmatpush3.bf16.msra.mxu1 %v7838_v10  ;;  %5946 = vmatprep.subr.bf16.mxu0 %v7841_v11  ;;  %v7910_v10 = vld [vmem:[%s10656_s9 + $0x8d4] ss:$28 sps:$4 sm:$0xff]  }
 0x4e2   :  { %7093 = vmatprep.subr.bf16.mxu1 %v7842_v12  ;;  %v7908_v11 = vld [vmem:[%s10656_s9 + $0x8d0] ss:$28 sps:$4 sm:$0xff]  }
 0x4e3   :  { %v7913_v12 = vld [vmem:[%s10656_s9 + $0x90c] ss:$28 sps:$4 sm:$0xff]  }
 0x4e4   :  { %5947 = vmatpush1.bf16.msra.mxu0 %v7839_v34  ;;  %v7911_v34 = vld [vmem:[%s10656_s9 + $0x908] ss:$28 sps:$4 sm:$0xff]  }
 0x4e5   :  { %7094 = vmatpush3.bf16.msra.mxu1 %v7843_v15  ;;  %5948 = vmatprep.subr.bf16.mxu0 %v7846_v16  ;;  %v7916_v15 = vld [vmem:[%s10656_s9 + $0x944] ss:$28 sps:$4 sm:$0xff]  }
 0x4e6   :  { %7101 = vmatprep.subr.bf16.mxu1 %v7847_v17  ;;  %v7914_v16 = vld [vmem:[%s10656_s9 + $0x940] ss:$28 sps:$4 sm:$0xff]  }
 0x4e7   :  { %v7919_v17 = vld [vmem:[%s10656_s9 + $0x97c] ss:$28 sps:$4 sm:$0xff]  }
 0x4e8   :  { %6168 = vmatmul.mubr.bf16.vlgmr.msra.gmra.mrb[32].mxu1 %v9812_v1  ;;  %5949 = vmatpush1.bf16.msra.mxu0 %v7844_v20  ;;  %v7917_v20 = vld [vmem:[%s10656_s9 + $0x978] ss:$28 sps:$4 sm:$0xff]  }
 0x4e9   :  { %7102 = vmatpush3.bf16.msra.mxu1 %v7848_v21  ;;  %6207 = vmatprep.mubr.bf16.mxu1 %v9822_v6  ;;  %v7922_v21 = vld [vmem:[%s10656_s9 + $0x9b4] ss:$28 sps:$4 sm:$0xff]  }
 0x4ea   :  { %5950 = vmatprep.subr.bf16.mxu0 %v7851_v25  ;;  %7103 = vmatprep.subr.bf16.mxu1 %v7852_v30  ;;  %v7920_v25 = vld [vmem:[%s10656_s9 + $0x9b0] ss:$28 sps:$4 sm:$0xff]  }
 0x4eb   :  { %v7925_v30 = vld [vmem:[%s10656_s9 + $0x9ec] ss:$28 sps:$4 sm:$0xff]  }
 0x4ec   :  { %5951 = vmatpush1.bf16.msra.mxu0 %v7849_v31  ;;  %v7923_v31 = vld [vmem:[%s10656_s9 + $0x9e8] ss:$28 sps:$4 sm:$0xff]  }
 0x4ed   :  { %7104 = vmatpush3.bf16.msra.mxu1 %v7853_v48  ;;  %5952 = vmatprep.subr.bf16.mxu0 %v7856_v32  ;;  %v7928_v48 = vld [vmem:[%s10656_s9 + $0xa24] ss:$28 sps:$4 sm:$0xff]  }
 0x4ee   :  { %7105 = vmatprep.subr.bf16.mxu1 %v7857_v22  ;;  %v7926_v32 = vld [vmem:[%s10656_s9 + $0xa20] ss:$28 sps:$4 sm:$0xff]  }
 0x4ef   :  { %v7931_v22 = vld [vmem:[%s10656_s9 + $0xa5c] ss:$28 sps:$4 sm:$0xff]  }
 0x4f0   :  { %5953 = vmatpush1.bf16.msra.mxu0 %v7854_v23  ;;  %v7929_v23 = vld [vmem:[%s10656_s9 + $0xa58] ss:$28 sps:$4 sm:$0xff]  }
 0x4f1   :  { %7106 = vmatpush3.bf16.msra.mxu1 %v7858_v24  ;;  %5954 = vmatprep.subr.bf16.mxu0 %v7861_v26  ;;  %v7934_v24 = vld [vmem:[%s10656_s9 + $0xa94] ss:$28 sps:$4 sm:$0xff]  }
 0x4f2   :  { %7107 = vmatprep.subr.bf16.mxu1 %v7862_v36  ;;  %v7932_v26 = vld [vmem:[%s10656_s9 + $0xa90] ss:$28 sps:$4 sm:$0xff]  }
 0x4f3   :  { %v7937_v36 = vld [vmem:[%s10656_s9 + $0xacc] ss:$28 sps:$4 sm:$0xff]  }
 0x4f4   :  { %5955 = vmatpush1.bf16.msra.mxu0 %v7859_v35  ;;  %v7935_v35 = vld [vmem:[%s10656_s9 + $0xac8] ss:$28 sps:$4 sm:$0xff]  }
 0x4f5   :  { %7108 = vmatpush3.bf16.msra.mxu1 %v7863_v18  ;;  %5956 = vmatprep.subr.bf16.mxu0 %v7866_v37  ;;  %v7940_v18 = vld [vmem:[%s10656_s9 + $0xb04] ss:$28 sps:$4 sm:$0xff]  }
 0x4f6   :  { %7109 = vmatprep.subr.bf16.mxu1 %v7867_v38  ;;  %v7938_v37 = vld [vmem:[%s10656_s9 + $0xb00] ss:$28 sps:$4 sm:$0xff]   ;;  %v7946_v38 = vld [vmem:[%s10656_s9 + $0xb74] ss:$28 sps:$4 sm:$0xff]  }
 0x4f8   :  { %5957 = vmatpush1.bf16.msra.mxu0 %v7864_v39  ;;  %v7944_v39 = vld [vmem:[%s10656_s9 + $0xb70] ss:$28 sps:$4 sm:$0xff]  }
 0x4f9   :  { %7110 = vmatpush3.bf16.msra.mxu1 %v7868_v40  ;;  %5958 = vmatprep.subr.bf16.mxu0 %v7871_v41  ;;  %v10541_v40 = vld [vmem:[%s10658_s10] sm:$0xff]  ;;  %v7949_v41 = vld [vmem:[%s10656_s9 + $0xbac] ss:$28 sps:$4 sm:$0xff]  }
 0x4fa   :  { %7111 = vmatprep.subr.bf16.mxu1 %v7872_v42  ;;  %v3227_v42 = vrot.slane %v10541_v40, %v8322_v60 }
 0x4fc   :  { %5959 = vmatpush1.bf16.msra.mxu0 %v7869_v43  ;;  %v3235_v43 = vrot.slane %v10541_v40, %v8757_v3 }
 0x4fd   :  { %7112 = vmatpush3.bf16.msra.mxu1 %v7873_v44  ;;  %5960 = vmatprep.subr.bf16.mxu0 %v7876_v45  ;;  %v3231_v44 = vrot.slane %v10541_v40, %v8328_v63  ;;  %v3239_v45 = vrot.slane %v10541_v40, %v8763_v5  ;;  %v7950_v5 = vld [vmem:[%s10656_s9 + $0xbe0] ss:$28 sps:$4 sm:$0xff]  }
 0x4fe   :  { %7113 = vmatprep.subr.bf16.mxu1 %v7877_v46  ;;  %v7947_v46 = vld [vmem:[%s10656_s9 + $0xba8] ss:$28 sps:$4 sm:$0xff]  }
 0x500   :  { %5961 = vmatpush1.bf16.msra.mxu0 %v7874_v47  ;;  %v7952_v47 = vld [vmem:[%s10656_s9 + $0xbe4] ss:$28 sps:$4 sm:$0xff]  }
 0x501   :  { %7114 = vmatpush3.bf16.msra.mxu1 %v7878_v19  ;;  %5962 = vmatprep.subr.bf16.mxu0 %v7881_v49 }
 0x502   :  { %7115 = vmatprep.subr.bf16.mxu1 %v7882_v27 }
 0x504   :  { %5963 = vmatpush1.bf16.msra.mxu0 %v7879_v62 }
 0x505   :  { %7116 = vmatpush3.bf16.msra.mxu1 %v7883_v50  ;;  %5973 = vmatprep.subr.bf16.mxu0 %v7886_v13 }
 0x507   :  { %5965 = vmatmul.mubr.bf16.vlgmr.msra.gmra.mrb[16].mxu0 %v9602_v28  ;;  %v7895_v28 = vld [vmem:[%s10656_s9 + $0x7bc] ss:$28 sps:$4 sm:$0xff]  }
 0x508   :  { %6208 = vmatmul.mubr.bf16.vlgmr.msra.gmra.mrb[36].mxu1 %v10018_v0  ;;  %5974 = vmatpush1.bf16.msra.mxu0 %v7884_v51 }
 0x509   :  { %6005 = vmatprep.mubr.bf16.mxu0 %v9804_v57  ;;  %5975 = vmatprep.subr.bf16.mxu0 %v7889_v52  ;;  %v7893_v57 = vld [vmem:[%s10656_s9 + $0x7b8] ss:$28 sps:$4 sm:$0xff]  }
 0x50c   :  { %5976 = vmatpush1.bf16.msra.mxu0 %v7887_v53 }
 0x50d   :  { %5977 = vmatprep.subr.bf16.mxu0 %v7892_v54  ;;  %v7955_v54 = vld [vmem:[%s10656_s9 + $0xc1c] ss:$28 sps:$4 sm:$0xff]  }
 0x510   :  { %5978 = vmatpush1.bf16.msra.mxu0 %v7890_v56  ;;  %v7953_v56 = vld [vmem:[%s10656_s9 + $0xc18] ss:$28 sps:$4 sm:$0xff]  }
 0x511   :  { %5979 = vmatprep.subr.bf16.mxu0 %v7895_v28  ;;  %v7958_v28 = vld [vmem:[%s10656_s9 + $0xc54] ss:$28 sps:$4 sm:$0xff]  }
 0x514   :  { %5980 = vmatpush1.bf16.msra.mxu0 %v7893_v57  ;;  %v7956_v57 = vld [vmem:[%s10656_s9 + $0xc50] ss:$28 sps:$4 sm:$0xff]  }
 0x515   :  { %5981 = vmatprep.subr.bf16.mxu0 %v7898_v58  ;;  %v7961_v58 = vld [vmem:[%s10656_s9 + $0xc8c] ss:$28 sps:$4 sm:$0xff]  }
 0x518   :  { %5982 = vmatpush1.bf16.msra.mxu0 %v7896_v59 }
 0x519   :  { %5983 = vmatprep.subr.bf16.mxu0 %v7901_v61 }
 0x51c   :  { %5984 = vmatpush1.bf16.msra.mxu0 %v7899_v2  ;;  %v7959_v2 = vld [vmem:[%s10656_s9 + $0xc88] ss:$28 sps:$4 sm:$0xff]  }
 0x51d   :  { %5985 = vmatprep.subr.bf16.mxu0 %v7904_v4 }
 0x520   :  { %5986 = vmatpush1.bf16.msra.mxu0 %v7902_v14  ;;  %v7964_v14 = vld [vmem:[%s10656_s9 + $0xcc4] ss:$28 sps:$4 sm:$0xff]  }
 0x521   :  { %5987 = vmatprep.subr.bf16.mxu0 %v7907_v8 }
 0x524   :  { %5988 = vmatpush1.bf16.msra.mxu0 %v7905_v9  ;;  %v7962_v9 = vld [vmem:[%s10656_s9 + $0xcc0] ss:$28 sps:$4 sm:$0xff]  }
 0x525   :  { %5989 = vmatprep.subr.bf16.mxu0 %v7910_v10  ;;  %v7967_v10 = vld [vmem:[%s10656_s9 + $0xcfc] ss:$28 sps:$4 sm:$0xff]  }
 0x528   :  { %5990 = vmatpush1.bf16.msra.mxu0 %v7908_v11  ;;  %v7965_v11 = vld [vmem:[%s10656_s9 + $0xcf8] ss:$28 sps:$4 sm:$0xff]  }
 0x529   :  { %5991 = vmatprep.subr.bf16.mxu0 %v7913_v12  ;;  %v7970_v12 = vld [vmem:[%s10656_s9 + $0xd34] ss:$28 sps:$4 sm:$0xff]  }
 0x52c   :  { %5992 = vmatpush1.bf16.msra.mxu0 %v7911_v34  ;;  %v7968_v34 = vld [vmem:[%s10656_s9 + $0xd30] ss:$28 sps:$4 sm:$0xff]  }
 0x52d   :  { %5993 = vmatprep.subr.bf16.mxu0 %v7916_v15  ;;  %v7973_v15 = vld [vmem:[%s10656_s9 + $0xd6c] ss:$28 sps:$4 sm:$0xff]  }
 0x530   :  { %5994 = vmatpush1.bf16.msra.mxu0 %v7914_v16  ;;  %v7971_v16 = vld [vmem:[%s10656_s9 + $0xd68] ss:$28 sps:$4 sm:$0xff]  }
 0x531   :  { %5995 = vmatprep.subr.bf16.mxu0 %v7919_v17  ;;  %v7976_v17 = vld [vmem:[%s10656_s9 + $0xda4] ss:$28 sps:$4 sm:$0xff]  }
 0x534   :  { %5996 = vmatpush1.bf16.msra.mxu0 %v7917_v20 }
 0x535   :  { %5997 = vmatprep.subr.bf16.mxu0 %v7922_v21 }
 0x538   :  { %5998 = vmatpush1.bf16.msra.mxu0 %v7920_v25  ;;  %v7974_v25 = vld [vmem:[%s10656_s9 + $0xda0] ss:$28 sps:$4 sm:$0xff]  }
 0x539   :  { %5999 = vmatprep.subr.bf16.mxu0 %v7925_v30 }
 0x53c   :  { %6000 = vmatpush1.bf16.msra.mxu0 %v7923_v31 }
 0x53d   :  { %6001 = vmatprep.subr.bf16.mxu0 %v7928_v48  ;;  %v7979_v48 = vld [vmem:[%s10656_s9 + $0xddc] ss:$28 sps:$4 sm:$0xff]  }
 0x540   :  { %6002 = vmatpush1.bf16.msra.mxu0 %v7926_v32 }
 0x541   :  { %6003 = vmatprep.subr.bf16.mxu0 %v7931_v22  ;;  %v7977_v22 = vld [vmem:[%s10656_s9 + $0xdd8] ss:$28 sps:$4 sm:$0xff]  }
 0x544   :  { %6004 = vmatpush1.bf16.msra.mxu0 %v7929_v23  ;;  %v3251_v23 = vrot.slane %v10541_v40, %v1080_v7 }
 0x545   :  { %6014 = vmatprep.subr.bf16.mxu0 %v7934_v24 }
 0x547   :  { %6006 = vmatmul.mubr.bf16.vlgmr.msra.gmra.mrb[16].mxu0 %v9812_v1  ;;  %v7943_v1 = vld [vmem:[%s10656_s9 + $0xb3c] ss:$28 sps:$4 sm:$0xff]  }
 0x548   :  { %6015 = vmatpush1.bf16.msra.mxu0 %v7932_v26  ;;  %6046 = vmatprep.mubr.bf16.mxu0 %v9822_v6  ;;  %v7941_v6 = vld [vmem:[%s10656_s9 + $0xb38] ss:$28 sps:$4 sm:$0xff]  }
 0x549   :  { %6016 = vmatprep.subr.bf16.mxu0 %v7937_v36 }
 0x54c   :  { %6017 = vmatpush1.bf16.msra.mxu0 %v7935_v35 }
 0x54d   :  { %6018 = vmatprep.subr.bf16.mxu0 %v7940_v18 }
 0x550   :  { %6019 = vmatpush1.bf16.msra.mxu0 %v7938_v37 }
 0x551   :  { %6020 = vmatprep.subr.bf16.mxu0 %v7943_v1 }
 0x554   :  { %6021 = vmatpush1.bf16.msra.mxu0 %v7941_v6 }
 0x555   :  { %6022 = vmatprep.subr.bf16.mxu0 %v7946_v38 }
 0x558   :  { %6023 = vmatpush1.bf16.msra.mxu0 %v7944_v39 }
 0x559   :  { %6024 = vmatprep.subr.bf16.mxu0 %v7949_v41 }
 0x55a   :  { %v5720_v60 = vpop.f32.mrb[12].mxu0  ;;  %v5884_v19 = vpop.f32.mrb[20].mxu1 }
 0x55b   :  { %v7151_v49 = vadd.f32 %v5720_v60, %v3227_v42  ;;  %v7153_v3 = vadd.f32 %v5884_v19, %v3235_v43  ;;  %v5722_v27 = vpop.f32.mrb[13].mxu0  ;;  %v5886_v62 = vpop.f32.mrb[21].mxu1  ;;  %v3243_v19 = vrot.slane %v10541_v40, %v1072_v29 }
 0x55c   :  { %v7152_v50 = vadd.f32 %v5722_v27, %v3231_v44  ;;  %v7154_v63 = vadd.f32 %v5886_v62, %v3239_v45  ;;  %v5724_v13 = vpop.f32.mrb[14].mxu0  ;;  %v5888_v51 = vpop.f32.mrb[22].mxu1  ;;  %6025 = vmatpush1.bf16.msra.mxu0 %v7947_v46 }
 0x55d   :  { %7980 = vtanh.f32 %v7151_v49  ;;  %v5725_v52 = vpop.f32.mrb[15].mxu0  ;;  %v5889_v53 = vpop.f32.mrb[23].mxu1  ;;  %6026 = vmatprep.subr.bf16.mxu0 %v7952_v47  ;;  %v3247_v49 = vrot.slane %v10541_v40, %v1076_v33 }
 0x55e   :  { %7982 = vtanh.f32 %v7153_v3 }
 0x55f   :  { %7984 = vtanh.f32 %v7152_v50 }
 0x560   :  { %7986 = vtanh.f32 %v7154_v63  ;;  %6027 = vmatpush1.bf16.msra.mxu0 %v7950_v5 }
 0x561   :  { %6028 = vmatprep.subr.bf16.mxu0 %v7955_v54 }
 0x564   :  { %6029 = vmatpush1.bf16.msra.mxu0 %v7953_v56 }
 0x565   :  { %6030 = vmatprep.subr.bf16.mxu0 %v7958_v28 }
 0x567   :  { %v7981_v59 = vpop.eup %7980 }
 0x568   :  { %v7983_v61 = vpop.eup %7982  ;;  %6222 = vst [vmem:[%s10659_s11] sm:$0xff] %v7981_v59  ;;  %6031 = vmatpush1.bf16.msra.mxu0 %v7956_v57 }
 0x569   :  { %v7985_v4 = vpop.eup %7984  ;;  %6224 = vst [vmem:[%s10659_s11 + $0x10] sm:$0xff] %v7983_v61  ;;  %6032 = vmatprep.subr.bf16.mxu0 %v7961_v58 }
 0x56a   :  { %v7987_v8 = vpop.eup %7986  ;;  %6223 = vst [vmem:[%s10659_s11 + $0x8] sm:$0xff] %v7985_v4 }
 0x56b   :  { %6225 = vst [vmem:[%s10659_s11 + $0x18] sm:$0xff] %v7987_v8 }
 0x56c   :  { %6033 = vmatpush1.bf16.msra.mxu0 %v7959_v2 }
 0x56d   :  { %6034 = vmatprep.subr.bf16.mxu0 %v7964_v14 }
 0x570   :  { %6035 = vmatpush1.bf16.msra.mxu0 %v7962_v9 }
 0x571   :  { %6036 = vmatprep.subr.bf16.mxu0 %v7967_v10 }
 0x574   :  { %6037 = vmatpush1.bf16.msra.mxu0 %v7965_v11 }
 0x575   :  { %6038 = vmatprep.subr.bf16.mxu0 %v7970_v12 }
 0x578   :  { %6039 = vmatpush1.bf16.msra.mxu0 %v7968_v34 }
 0x579   :  { %6040 = vmatprep.subr.bf16.mxu0 %v7973_v15 }
 0x57b   :  { %v7051_v20 = vpop.f32.mrb[24].mxu1 }
 0x57c   :  { %v7052_v21 = vpop.f32.mrb[25].mxu1  ;;  %6041 = vmatpush1.bf16.msra.mxu0 %v7971_v16 }
 0x57d   :  { %v7053_v30 = vadd.f32 %v7052_v21, %v7051_v20  ;;  %v7054_v31 = vpop.f32.mrb[26].mxu1  ;;  %6042 = vmatprep.subr.bf16.mxu0 %v7976_v17 }
 0x57e   :  { %v7055_v32 = vpop.f32.mrb[27].mxu1 }
 0x57f   :  { %v6090_v36 = vadd.f32 %v7053_v30, %v3251_v23 }
 0x580   :  { %6043 = vmatpush1.bf16.msra.mxu0 %v7974_v25 }
 0x581   :  { %6044 = vmatprep.subr.bf16.mxu0 %v7979_v48 }
 0x584   :  { %6045 = vmatpush1.bf16.msra.mxu0 %v7977_v22 }
 0x587   :  { %6047 = vmatmul.mubr.bf16.vlgmr.msra.gmra.mrb[16].mxu0 %v10018_v0 }
 0x59b   :  { %v7073_v24 = vpop.f32.mrb[28].mxu1 }
 0x59c   :  { %v7074_v26 = vpop.f32.mrb[29].mxu1 }
 0x59d   :  { %v7075_v35 = vadd.f32 %v7074_v26, %v7073_v24  ;;  %v7076_v18 = vpop.f32.mrb[30].mxu1 }
 0x59e   :  { %v7077_v37 = vpop.f32.mrb[31].mxu1 }
 0x59f   :  { %v6130_v1 = vadd.f32 %v7075_v35, %v6090_v36 }
 0x5bb   :  { %v7095_v6 = vpop.f32.mrb[32].mxu1 }
 0x5bc   :  { %v7096_v38 = vpop.f32.mrb[33].mxu1 }
 0x5bd   :  { %v7097_v39 = vadd.f32 %v7096_v38, %v7095_v6  ;;  %v7098_v41 = vpop.f32.mrb[34].mxu1 }
 0x5be   :  { %v7099_v42 = vpop.f32.mrb[35].mxu1 }
 0x5bf   :  { %v6170_v43 = vadd.f32 %v7097_v39, %v6130_v1 }
 0x5db   :  { %v7117_v44 = vpop.f32.mrb[36].mxu1 }
 0x5dc   :  { %v7118_v45 = vpop.f32.mrb[37].mxu1 }
 0x5dd   :  { %v7119_v0 = vadd.f32 %v7118_v45, %v7117_v44  ;;  %v7120_v46 = vpop.f32.mrb[38].mxu1 }
 0x5de   :  { %v7121_v47 = vpop.f32.mrb[39].mxu1 }
 0x5df   :  { %v6210_v60 = vadd.f32 %v7119_v0, %v6170_v43 }
 0x5e1   :  { %7988 = vtanh.f32 %v6210_v60 }
 0x5eb   :  { %v7989_v7 = vpop.eup %7988 }
 0x5ec   :  { %6228 = vst [vmem:[%s10659_s11 + $0x30] sm:$0xff] %v7989_v7 }
 0x65a   :  { %v6048_v3 = vpop.f32.mrb[16].mxu0 }
 0x65b   :  { %v7155_v27 = vadd.f32 %v6048_v3, %v3243_v19  ;;  %v6050_v62 = vpop.f32.mrb[17].mxu0 }
 0x65c   :  { %v7156_v50 = vadd.f32 %v6050_v62, %v3247_v49  ;;  %v6052_v63 = vpop.f32.mrb[18].mxu0 }
 0x65d   :  { %7990 = vtanh.f32 %v7155_v27  ;;  %v6053_v13 = vpop.f32.mrb[19].mxu0 }
 0x65e   :  { %7992 = vtanh.f32 %v7156_v50 }
 0x667   :  { %v7991_v51 = vpop.eup %7990 }
 0x668   :  { %v7993_v5 = vpop.eup %7992  ;;  %6226 = vst [vmem:[%s10659_s11 + $0x20] sm:$0xff] %v7991_v51 }
 0x669   :  { %6227 = vst [vmem:[%s10659_s11 + $0x28] sm:$0xff] %v7993_v5 }

</bundles_post_ra>
